<compile_context>
chip_gen: v7x
topology: tpu7x:2x2x1
jax: 0.10.0
libtpu: 0.0.40
codegen_flags: <defaults>
</compile_context>

<pallas_src>
import jax
import jax.numpy as jnp
from jax import lax
from jax.experimental import pallas as pl
from jax.experimental.pallas import tpu as pltpu

HIDDEN = 100           # PyTorch hidden size
H_PAD = 128            # lane-aligned padded hidden size
SEQ_LEN = 10           # fixed: fc1.in_features == 1000 == SEQ_LEN * HIDDEN
FC1, FC2, FC3 = 512, 256, 64
FC3_PAD = 128          # lane-aligned padded fc3 output
BN_EPS = 1e-5


# ----------------------------------------------------------------------------
# Fused kernel: LSTM recurrence + 3x(Linear->BN->tanh) + final Linear
# ----------------------------------------------------------------------------
def fused_lstm_mlp_kernel(x_ref, wih_ref, whh_ref, b_ref,
                          w1_ref, b1_ref, g1_ref, be1_ref,
                          w2_ref, b2_ref, g2_ref, be2_ref,
                          w3_ref, b3_ref, g3_ref, be3_ref,
                          w4_ref, b4_ref,
                          o_ref,
                          gx_ref):
    # x_ref:   (T*B, D_in)  time-major, flattened rows [t*B + b]
    # wih_ref: (D_in, 4*H_PAD)  gate order (i, f, o, g), zero-padded per gate
    # whh_ref: (H_PAD, 4*H_PAD)
    # b_ref:   (1, 4*H_PAD)     = b_ih + b_hh (padded with zeros)
    # w1_ref:  (T, H_PAD, FC1)  fc1 weight split per timestep block
    # gx_ref:  (T*B, 4*H_PAD)   VMEM scratch for hoisted input projection
    TB = x_ref.shape[0]
    B = TB // SEQ_LEN
    HP = H_PAD

    # ---- hoisted input projection for ALL timesteps: one MXU pass ----------
    gx_ref[...] = (jnp.dot(x_ref[...], wih_ref[...],
                           preferred_element_type=jnp.float32) + b_ref[...])

    h0 = jnp.zeros((B, HP), jnp.float32)
    c0 = jnp.zeros((B, HP), jnp.float32)
    acc0 = jnp.zeros((B, FC1), jnp.float32)

    def step(t, carry):
        h, c, acc = carry
        row = pl.multiple_of(t * B, B)                     # sublane-aligned
        gates = gx_ref[pl.ds(row, B), :] + jnp.dot(
            h, whh_ref[...], preferred_element_type=jnp.float32)  # (B, 4*HP)
        sig = jax.nn.sigmoid(gates[:, :3 * HP])            # i, f, o together
        g = jnp.tanh(gates[:, 3 * HP:])
        i = sig[:, :HP]
        f = sig[:, HP:2 * HP]
        o = sig[:, 2 * HP:]
        c_new = f * c + i * g
        h_new = o * jnp.tanh(c_new)
        # fc1 contribution of this timestep (== fc1 on the flattened hidden
        # states); independent of the recurrence's critical path, so the
        # unrolled scheduler overlaps it with the next step's MXU/EUP work.
        acc = acc + jnp.dot(h_new, w1_ref[t],
                            preferred_element_type=jnp.float32)
        return h_new, c_new, acc

    _, _, fc1_out = lax.fori_loop(0, SEQ_LEN, step, (h0, c0, acc0),
                                  unroll=True)

    # ---- MLP head: Linear -> BN(batch stats, biased var) -> tanh -----------
    def bn_tanh(y, gamma, beta):
        mu = jnp.mean(y, axis=0, keepdims=True)
        var = jnp.mean((y - mu) ** 2, axis=0, keepdims=True)
        return jnp.tanh((y - mu) * lax.rsqrt(var + BN_EPS) * gamma + beta)

    h = bn_tanh(fc1_out + b1_ref[...], g1_ref[...], be1_ref[...])       # (B,512)
    h = bn_tanh(jnp.dot(h, w2_ref[...], preferred_element_type=jnp.float32)
                + b2_ref[...], g2_ref[...], be2_ref[...])               # (B,256)
    h = bn_tanh(jnp.dot(h, w3_ref[...], preferred_element_type=jnp.float32)
                + b3_ref[...], g3_ref[...], be3_ref[...])               # (B,128) padded
    o_ref[...] = (jnp.dot(h, w4_ref[...], preferred_element_type=jnp.float32)
                  + b4_ref[...])                                        # (B,out)


def _vmem():
    return pl.BlockSpec(memory_space=pltpu.MemorySpace.VMEM)


# ----------------------------------------------------------------------------
# Wrapper
# ----------------------------------------------------------------------------
@jax.jit
def lstm_classifier_forward(x, kp):
    """x: (B, T, D_in) batch-first (PyTorch convention). kp: padded params."""
    B, T, D = x.shape
    x_tm = jnp.transpose(x, (1, 0, 2)).reshape(T * B, D)   # time-major rows
    out_dim = kp["b4"].shape[-1]
    return pl.pallas_call(
        fused_lstm_mlp_kernel,
        out_shape=jax.ShapeDtypeStruct((B, out_dim), jnp.float32),
        in_specs=[_vmem()] * 18,
        out_specs=_vmem(),
        scratch_shapes=[pltpu.VMEM((T * B, 4 * H_PAD), jnp.float32)],
    )(x_tm,
      kp["wih_t"], kp["whh_t"], kp["b_lstm"],
      kp["w1_t"], kp["b1"], kp["g1"], kp["be1"],
      kp["w2_t"], kp["b2"], kp["g2"], kp["be2"],
      kp["w3_t"], kp["b3"], kp["g3"], kp["be3"],
      kp["w4_t"], kp["b4"])


# ----------------------------------------------------------------------------
# Parameter construction (PyTorch shapes / gate order) + exact zero-padding
# ----------------------------------------------------------------------------
def make_params(key, input_size, output_size):
    keys = jax.random.split(key, 16)

    def uni(k, shape, bound):
        return jax.random.uniform(k, shape, jnp.float32, -bound, bound)

    kH = 1.0 / jnp.sqrt(HIDDEN)
    return {
        # LSTM, stored transposed, gate order (i, f, g, o) as in PyTorch
        "wih_t": uni(keys[0], (input_size, 4 * HIDDEN), kH),
        "whh_t": uni(keys[1], (HIDDEN, 4 * HIDDEN), kH),
        "b_lstm": uni(keys[2], (1, 4 * HIDDEN), kH) + uni(keys[3], (1, 4 * HIDDEN), kH),
        # fc1 1000->512
        "w1_t": uni(keys[4], (SEQ_LEN * HIDDEN, FC1), 1.0 / jnp.sqrt(1000.0)),
        "b1": uni(keys[5], (1, FC1), 1.0 / jnp.sqrt(1000.0)),
        "g1": jnp.ones((1, FC1), jnp.float32),
        "be1": jnp.zeros((1, FC1), jnp.float32),
        # fc2 512->256
        "w2_t": uni(keys[6], (FC1, FC2), 1.0 / jnp.sqrt(512.0)),
        "b2": uni(keys[7], (1, FC2), 1.0 / jnp.sqrt(512.0)),
        "g2": jnp.ones((1, FC2), jnp.float32),
        "be2": jnp.zeros((1, FC2), jnp.float32),
        # fc3 256->64
        "w3_t": uni(keys[8], (FC2, FC3), 1.0 / jnp.sqrt(256.0)),
        "b3": uni(keys[9], (1, FC3), 1.0 / jnp.sqrt(256.0)),
        "g3": jnp.ones((1, FC3), jnp.float32),
        "be3": jnp.zeros((1, FC3), jnp.float32),
        # fc4 64->output_size
        "w4_t": uni(keys[10], (FC3, output_size), 1.0 / jnp.sqrt(64.0)),
        "b4": uni(keys[11], (1, output_size), 1.0 / jnp.sqrt(64.0)),
    }


def prepare_kernel_params(p):
    """Reorder gates to (i,f,o,g) and zero-pad to lane-aligned shapes (exact)."""
    h, hp = HIDDEN, H_PAD

    def reorder_pad_gates(w):
        # (..., 4H) in (i, f, g, o) -> (..., 4*H_PAD) in (i, f, o, g)
        i, f, g, o = jnp.split(w, 4, axis=-1)
        pad = lambda m: jnp.pad(m, [(0, 0)] * (m.ndim - 1) + [(0, hp - h)])
        return jnp.concatenate([pad(i), pad(f), pad(o), pad(g)], axis=-1)

    w1 = p["w1_t"].reshape(SEQ_LEN, h, FC1)
    w1 = jnp.pad(w1, ((0, 0), (0, hp - h), (0, 0)))            # (T, H_PAD, 512)

    dpad = FC3_PAD - FC3
    return {
        "wih_t": reorder_pad_gates(p["wih_t"]),                          # (D, 512)
        "whh_t": jnp.pad(reorder_pad_gates(p["whh_t"]), ((0, hp - h), (0, 0))),
        "b_lstm": reorder_pad_gates(p["b_lstm"]),                        # (1, 512)
        "w1_t": w1, "b1": p["b1"], "g1": p["g1"], "be1": p["be1"],
        "w2_t": p["w2_t"], "b2": p["b2"], "g2": p["g2"], "be2": p["be2"],
        "w3_t": jnp.pad(p["w3_t"], ((0, 0), (0, dpad))),                 # (256, 128)
        "b3": jnp.pad(p["b3"], ((0, 0), (0, dpad))),
        "g3": jnp.pad(p["g3"], ((0, 0), (0, dpad)), constant_values=1.0),
        "be3": jnp.pad(p["be3"], ((0, 0), (0, dpad))),
        "w4_t": jnp.pad(p["w4_t"], ((0, dpad), (0, 0))),                 # (128, out)
        "b4": p["b4"],
    }


# ----------------------------------------------------------------------------
# Pure-JAX reference (unpadded params) for correctness
# ----------------------------------------------------------------------------
def reference_forward(x, params):
    B, T, _ = x.shape
    H = HIDDEN

    def step(carry, x_t):
        h, c = carry
        gates = x_t @ params["wih_t"] + h @ params["whh_t"] + params["b_lstm"]
        i = jax.nn.sigmoid(gates[:, 0 * H:1 * H])
        f = jax.nn.sigmoid(gates[:, 1 * H:2 * H])
        g = jnp.tanh(gates[:, 2 * H:3 * H])
        o = jax.nn.sigmoid(gates[:, 3 * H:4 * H])
        c = f * c + i * g
        h = o * jnp.tanh(c)
        return (h, c), h

    h0 = jnp.zeros((B, H), jnp.float32)
    (_, _), hs = lax.scan(step, (h0, h0), jnp.transpose(x, (1, 0, 2)))
    flat = jnp.transpose(hs, (1, 0, 2)).reshape(B, T * H)

    def bn_tanh(y, gamma, beta):
        mu = jnp.mean(y, axis=0, keepdims=True)
        var = jnp.mean((y - mu) ** 2, axis=0, keepdims=True)
        return jnp.tanh((y - mu) / jnp.sqrt(var + BN_EPS) * gamma + beta)

    h = bn_tanh(flat @ params["w1_t"] + params["b1"], params["g1"], params["be1"])
    h = bn_tanh(h @ params["w2_t"] + params["b2"], params["g2"], params["be2"])
    h = bn_tanh(h @ params["w3_t"] + params["b3"], params["g3"], params["be3"])
    return h @ params["w4_t"] + params["b4"]


if __name__ == "__main__":
    INPUT_SIZE = 32
    OUTPUT_SIZE = 4
    BATCH = 8          # Config['batch_size']

    key = jax.random.PRNGKey(0)
    k_x, k_p = jax.random.split(key)
    x = jax.random.normal(k_x, (BATCH, SEQ_LEN, INPUT_SIZE), jnp.float32)
    params = make_params(k_p, INPUT_SIZE, OUTPUT_SIZE)
    kparams = prepare_kernel_params(params)

    out = lstm_classifier_forward(x, kparams)
    out = jax.block_until_ready(out)

    ref = reference_forward(x, params)
    assert out.shape == (BATCH, OUTPUT_SIZE)
    assert jnp.allclose(out, ref, atol=2e-4, rtol=2e-4), "mismatch vs JAX reference"

    print("KERNEL_OK")
</pallas_src>

<mosaic_0001>
module attributes {stable_mosaic.version = 11 : i64} {
  func.func @fused_lstm_mlp_kernel(%arg0: memref<80x32xf32, #tpu.memory_space<vmem>>, %arg1: memref<32x512xf32, #tpu.memory_space<vmem>>, %arg2: memref<128x512xf32, #tpu.memory_space<vmem>>, %arg3: memref<1x512xf32, #tpu.memory_space<vmem>>, %arg4: memref<10x128x512xf32, #tpu.memory_space<vmem>>, %arg5: memref<1x512xf32, #tpu.memory_space<vmem>>, %arg6: memref<1x512xf32, #tpu.memory_space<vmem>>, %arg7: memref<1x512xf32, #tpu.memory_space<vmem>>, %arg8: memref<512x256xf32, #tpu.memory_space<vmem>>, %arg9: memref<1x256xf32, #tpu.memory_space<vmem>>, %arg10: memref<1x256xf32, #tpu.memory_space<vmem>>, %arg11: memref<1x256xf32, #tpu.memory_space<vmem>>, %arg12: memref<256x128xf32, #tpu.memory_space<vmem>>, %arg13: memref<1x128xf32, #tpu.memory_space<vmem>>, %arg14: memref<1x128xf32, #tpu.memory_space<vmem>>, %arg15: memref<1x128xf32, #tpu.memory_space<vmem>>, %arg16: memref<128x4xf32, #tpu.memory_space<vmem>>, %arg17: memref<1x4xf32, #tpu.memory_space<vmem>>, %arg18: memref<8x4xf32, #tpu.memory_space<vmem>>, %arg19: memref<80x512xf32, #tpu.memory_space<vmem>>) attributes {dimension_semantics = [], scalar_prefetch = 0 : i64, scratch_operands = 1 : i64, tpu.core_type = #tpu.core_type<tc>} {
    %c0 = arith.constant 0 : index
    %c0_0 = arith.constant 0 : index
    %0 = vector.load %arg0[%c0, %c0_0] : memref<80x32xf32, #tpu.memory_space<vmem>>, vector<80x32xf32>
    %c0_1 = arith.constant 0 : index
    %c0_2 = arith.constant 0 : index
    %1 = vector.load %arg1[%c0_1, %c0_2] : memref<32x512xf32, #tpu.memory_space<vmem>>, vector<32x512xf32>
    %cst = arith.constant dense<0.000000e+00> : vector<80x512xf32>
    %2 = tpu.matmul %0, %1, %cst {dimension_numbers = #tpu.dot_dimension_numbers<[1], [0], [0], [1], [0, 0, 1, 1], [], []>} : vector<80x32xf32>, vector<32x512xf32>, vector<80x512xf32> -> vector<80x512xf32>
    %c0_3 = arith.constant 0 : index
    %c0_4 = arith.constant 0 : index
    %3 = vector.load %arg3[%c0_3, %c0_4] : memref<1x512xf32, #tpu.memory_space<vmem>>, vector<1x512xf32>
    %4 = vector.broadcast %3 : vector<1x512xf32> to vector<80x512xf32>
    %5 = arith.addf %2, %4 : vector<80x512xf32>
    %c0_5 = arith.constant 0 : index
    %c0_6 = arith.constant 0 : index
    %6 = vector.load %arg19[%c0_5, %c0_6] : memref<80x512xf32, #tpu.memory_space<vmem>>, vector<80x512xf32>
    tpu.vector_store %arg19[%c0_5, %c0_6], %5 {strides = array<i32>} : memref<80x512xf32, #tpu.memory_space<vmem>>, vector<80x512xf32>,
    %cst_7 = arith.constant 0.000000e+00 : f32
    %7 = vector.broadcast %cst_7 : f32 to vector<8x128xf32>
    %cst_8 = arith.constant 0.000000e+00 : f32
    %8 = vector.broadcast %cst_8 : f32 to vector<8x128xf32>
    %cst_9 = arith.constant 0.000000e+00 : f32
    %9 = vector.broadcast %cst_9 : f32 to vector<8x512xf32>
    %c0_i32 = arith.constant 0 : i32
    %c8_i32 = arith.constant 8 : i32
    %10 = arith.muli %c0_i32, %c8_i32 : i32
    %11 = tpu.assume_multiple %10, 8 : i32
    %12 = arith.index_cast %11 : i32 to index
    %c0_10 = arith.constant 0 : index
    %13 = vector.load %arg19[%12, %c0_10] : memref<80x512xf32, #tpu.memory_space<vmem>>, vector<8x512xf32>
    %c0_11 = arith.constant 0 : index
    %c0_12 = arith.constant 0 : index
    %14 = vector.load %arg2[%c0_11, %c0_12] : memref<128x512xf32, #tpu.memory_space<vmem>>, vector<128x512xf32>
    %cst_13 = arith.constant dense<0.000000e+00> : vector<8x512xf32>
    %15 = tpu.matmul %7, %14, %cst_13 {dimension_numbers = #tpu.dot_dimension_numbers<[1], [0], [0], [1], [0, 0, 1, 1], [], []>} : vector<8x128xf32>, vector<128x512xf32>, vector<8x512xf32> -> vector<8x512xf32>
    %16 = arith.addf %13, %15 : vector<8x512xf32>
    %17 = vector.extract_strided_slice %16 {offsets = [0, 0], sizes = [8, 384], strides = [1, 1]} : vector<8x512xf32> to vector<8x384xf32>
    %18 = arith.negf %17 : vector<8x384xf32>
    %19 = math.exp %18 : vector<8x384xf32>
    %cst_14 = arith.constant 1.000000e+00 : f32
    %20 = vector.broadcast %cst_14 : f32 to vector<8x384xf32>
    %21 = arith.addf %20, %19 : vector<8x384xf32>
    %22 = arith.divf %20, %21 : vector<8x384xf32>
    %23 = vector.extract_strided_slice %16 {offsets = [0, 384], sizes = [8, 128], strides = [1, 1]} : vector<8x512xf32> to vector<8x128xf32>
    %24 = math.tanh %23 : vector<8x128xf32>
    %25 = vector.extract_strided_slice %22 {offsets = [0, 0], sizes = [8, 128], strides = [1, 1]} : vector<8x384xf32> to vector<8x128xf32>
    %26 = vector.extract_strided_slice %22 {offsets = [0, 128], sizes = [8, 128], strides = [1, 1]} : vector<8x384xf32> to vector<8x128xf32>
    %27 = vector.extract_strided_slice %22 {offsets = [0, 256], sizes = [8, 128], strides = [1, 1]} : vector<8x384xf32> to vector<8x128xf32>
    %28 = arith.mulf %26, %8 : vector<8x128xf32>
    %29 = arith.mulf %25, %24 : vector<8x128xf32>
    %30 = arith.addf %28, %29 : vector<8x128xf32>
    %31 = math.tanh %30 : vector<8x128xf32>
    %32 = arith.mulf %27, %31 : vector<8x128xf32>
    %33 = arith.index_cast %c0_i32 : i32 to index
    %c0_15 = arith.constant 0 : index
    %c0_16 = arith.constant 0 : index
    %34 = vector.load %arg4[%33, %c0_15, %c0_16] : memref<10x128x512xf32, #tpu.memory_space<vmem>>, vector<1x128x512xf32>
    %35 = vector.shape_cast %34 : vector<1x128x512xf32> to vector<128x512xf32>
    %cst_17 = arith.constant dense<0.000000e+00> : vector<8x512xf32>
    %36 = tpu.matmul %32, %35, %cst_17 {dimension_numbers = #tpu.dot_dimension_numbers<[1], [0], [0], [1], [0, 0, 1, 1], [], []>} : vector<8x128xf32>, vector<128x512xf32>, vector<8x512xf32> -> vector<8x512xf32>
    %37 = arith.addf %9, %36 : vector<8x512xf32>
    %c1_i32 = arith.constant 1 : i32
    %c8_i32_18 = arith.constant 8 : i32
    %38 = arith.muli %c1_i32, %c8_i32_18 : i32
    %39 = tpu.assume_multiple %38, 8 : i32
    %40 = arith.index_cast %39 : i32 to index
    %c0_19 = arith.constant 0 : index
    %41 = vector.load %arg19[%40, %c0_19] : memref<80x512xf32, #tpu.memory_space<vmem>>, vector<8x512xf32>
    %c0_20 = arith.constant 0 : index
    %c0_21 = arith.constant 0 : index
    %42 = vector.load %arg2[%c0_20, %c0_21] : memref<128x512xf32, #tpu.memory_space<vmem>>, vector<128x512xf32>
    %cst_22 = arith.constant dense<0.000000e+00> : vector<8x512xf32>
    %43 = tpu.matmul %32, %42, %cst_22 {dimension_numbers = #tpu.dot_dimension_numbers<[1], [0], [0], [1], [0, 0, 1, 1], [], []>} : vector<8x128xf32>, vector<128x512xf32>, vector<8x512xf32> -> vector<8x512xf32>
    %44 = arith.addf %41, %43 : vector<8x512xf32>
    %45 = vector.extract_strided_slice %44 {offsets = [0, 0], sizes = [8, 384], strides = [1, 1]} : vector<8x512xf32> to vector<8x384xf32>
    %46 = arith.negf %45 : vector<8x384xf32>
    %47 = math.exp %46 : vector<8x384xf32>
    %cst_23 = arith.constant 1.000000e+00 : f32
    %48 = vector.broadcast %cst_23 : f32 to vector<8x384xf32>
    %49 = arith.addf %48, %47 : vector<8x384xf32>
    %50 = arith.divf %48, %49 : vector<8x384xf32>
    %51 = vector.extract_strided_slice %44 {offsets = [0, 384], sizes = [8, 128], strides = [1, 1]} : vector<8x512xf32> to vector<8x128xf32>
    %52 = math.tanh %51 : vector<8x128xf32>
    %53 = vector.extract_strided_slice %50 {offsets = [0, 0], sizes = [8, 128], strides = [1, 1]} : vector<8x384xf32> to vector<8x128xf32>
    %54 = vector.extract_strided_slice %50 {offsets = [0, 128], sizes = [8, 128], strides = [1, 1]} : vector<8x384xf32> to vector<8x128xf32>
    %55 = vector.extract_strided_slice %50 {offsets = [0, 256], sizes = [8, 128], strides = [1, 1]} : vector<8x384xf32> to vector<8x128xf32>
    %56 = arith.mulf %54, %30 : vector<8x128xf32>
    %57 = arith.mulf %53, %52 : vector<8x128xf32>
    %58 = arith.addf %56, %57 : vector<8x128xf32>
    %59 = math.tanh %58 : vector<8x128xf32>
    %60 = arith.mulf %55, %59 : vector<8x128xf32>
    %61 = arith.index_cast %c1_i32 : i32 to index
    %c0_24 = arith.constant 0 : index
    %c0_25 = arith.constant 0 : index
    %62 = vector.load %arg4[%61, %c0_24, %c0_25] : memref<10x128x512xf32, #tpu.memory_space<vmem>>, vector<1x128x512xf32>
    %63 = vector.shape_cast %62 : vector<1x128x512xf32> to vector<128x512xf32>
    %cst_26 = arith.constant dense<0.000000e+00> : vector<8x512xf32>
    %64 = tpu.matmul %60, %63, %cst_26 {dimension_numbers = #tpu.dot_dimension_numbers<[1], [0], [0], [1], [0, 0, 1, 1], [], []>} : vector<8x128xf32>, vector<128x512xf32>, vector<8x512xf32> -> vector<8x512xf32>
    %65 = arith.addf %37, %64 : vector<8x512xf32>
    %c2_i32 = arith.constant 2 : i32
    %c8_i32_27 = arith.constant 8 : i32
    %66 = arith.muli %c2_i32, %c8_i32_27 : i32
    %67 = tpu.assume_multiple %66, 8 : i32
    %68 = arith.index_cast %67 : i32 to index
    %c0_28 = arith.constant 0 : index
    %69 = vector.load %arg19[%68, %c0_28] : memref<80x512xf32, #tpu.memory_space<vmem>>, vector<8x512xf32>
    %c0_29 = arith.constant 0 : index
    %c0_30 = arith.constant 0 : index
    %70 = vector.load %arg2[%c0_29, %c0_30] : memref<128x512xf32, #tpu.memory_space<vmem>>, vector<128x512xf32>
    %cst_31 = arith.constant dense<0.000000e+00> : vector<8x512xf32>
    %71 = tpu.matmul %60, %70, %cst_31 {dimension_numbers = #tpu.dot_dimension_numbers<[1], [0], [0], [1], [0, 0, 1, 1], [], []>} : vector<8x128xf32>, vector<128x512xf32>, vector<8x512xf32> -> vector<8x512xf32>
    %72 = arith.addf %69, %71 : vector<8x512xf32>
    %73 = vector.extract_strided_slice %72 {offsets = [0, 0], sizes = [8, 384], strides = [1, 1]} : vector<8x512xf32> to vector<8x384xf32>
    %74 = arith.negf %73 : vector<8x384xf32>
    %75 = math.exp %74 : vector<8x384xf32>
    %cst_32 = arith.constant 1.000000e+00 : f32
    %76 = vector.broadcast %cst_32 : f32 to vector<8x384xf32>
    %77 = arith.addf %76, %75 : vector<8x384xf32>
    %78 = arith.divf %76, %77 : vector<8x384xf32>
    %79 = vector.extract_strided_slice %72 {offsets = [0, 384], sizes = [8, 128], strides = [1, 1]} : vector<8x512xf32> to vector<8x128xf32>
    %80 = math.tanh %79 : vector<8x128xf32>
    %81 = vector.extract_strided_slice %78 {offsets = [0, 0], sizes = [8, 128], strides = [1, 1]} : vector<8x384xf32> to vector<8x128xf32>
    %82 = vector.extract_strided_slice %78 {offsets = [0, 128], sizes = [8, 128], strides = [1, 1]} : vector<8x384xf32> to vector<8x128xf32>
    %83 = vector.extract_strided_slice %78 {offsets = [0, 256], sizes = [8, 128], strides = [1, 1]} : vector<8x384xf32> to vector<8x128xf32>
    %84 = arith.mulf %82, %58 : vector<8x128xf32>
    %85 = arith.mulf %81, %80 : vector<8x128xf32>
    %86 = arith.addf %84, %85 : vector<8x128xf32>
    %87 = math.tanh %86 : vector<8x128xf32>
    %88 = arith.mulf %83, %87 : vector<8x128xf32>
    %89 = arith.index_cast %c2_i32 : i32 to index
    %c0_33 = arith.constant 0 : index
    %c0_34 = arith.constant 0 : index
    %90 = vector.load %arg4[%89, %c0_33, %c0_34] : memref<10x128x512xf32, #tpu.memory_space<vmem>>, vector<1x128x512xf32>
    %91 = vector.shape_cast %90 : vector<1x128x512xf32> to vector<128x512xf32>
    %cst_35 = arith.constant dense<0.000000e+00> : vector<8x512xf32>
    %92 = tpu.matmul %88, %91, %cst_35 {dimension_numbers = #tpu.dot_dimension_numbers<[1], [0], [0], [1], [0, 0, 1, 1], [], []>} : vector<8x128xf32>, vector<128x512xf32>, vector<8x512xf32> -> vector<8x512xf32>
    %93 = arith.addf %65, %92 : vector<8x512xf32>
    %c3_i32 = arith.constant 3 : i32
    %c8_i32_36 = arith.constant 8 : i32
    %94 = arith.muli %c3_i32, %c8_i32_36 : i32
    %95 = tpu.assume_multiple %94, 8 : i32
    %96 = arith.index_cast %95 : i32 to index
    %c0_37 = arith.constant 0 : index
    %97 = vector.load %arg19[%96, %c0_37] : memref<80x512xf32, #tpu.memory_space<vmem>>, vector<8x512xf32>
    %c0_38 = arith.constant 0 : index
    %c0_39 = arith.constant 0 : index
    %98 = vector.load %arg2[%c0_38, %c0_39] : memref<128x512xf32, #tpu.memory_space<vmem>>, vector<128x512xf32>
    %cst_40 = arith.constant dense<0.000000e+00> : vector<8x512xf32>
    %99 = tpu.matmul %88, %98, %cst_40 {dimension_numbers = #tpu.dot_dimension_numbers<[1], [0], [0], [1], [0, 0, 1, 1], [], []>} : vector<8x128xf32>, vector<128x512xf32>, vector<8x512xf32> -> vector<8x512xf32>
    %100 = arith.addf %97, %99 : vector<8x512xf32>
    %101 = vector.extract_strided_slice %100 {offsets = [0, 0], sizes = [8, 384], strides = [1, 1]} : vector<8x512xf32> to vector<8x384xf32>
    %102 = arith.negf %101 : vector<8x384xf32>
    %103 = math.exp %102 : vector<8x384xf32>
    %cst_41 = arith.constant 1.000000e+00 : f32
    %104 = vector.broadcast %cst_41 : f32 to vector<8x384xf32>
    %105 = arith.addf %104, %103 : vector<8x384xf32>
    %106 = arith.divf %104, %105 : vector<8x384xf32>
    %107 = vector.extract_strided_slice %100 {offsets = [0, 384], sizes = [8, 128], strides = [1, 1]} : vector<8x512xf32> to vector<8x128xf32>
    %108 = math.tanh %107 : vector<8x128xf32>
    %109 = vector.extract_strided_slice %106 {offsets = [0, 0], sizes = [8, 128], strides = [1, 1]} : vector<8x384xf32> to vector<8x128xf32>
    %110 = vector.extract_strided_slice %106 {offsets = [0, 128], sizes = [8, 128], strides = [1, 1]} : vector<8x384xf32> to vector<8x128xf32>
    %111 = vector.extract_strided_slice %106 {offsets = [0, 256], sizes = [8, 128], strides = [1, 1]} : vector<8x384xf32> to vector<8x128xf32>
    %112 = arith.mulf %110, %86 : vector<8x128xf32>
    %113 = arith.mulf %109, %108 : vector<8x128xf32>
    %114 = arith.addf %112, %113 : vector<8x128xf32>
    %115 = math.tanh %114 : vector<8x128xf32>
    %116 = arith.mulf %111, %115 : vector<8x128xf32>
    %117 = arith.index_cast %c3_i32 : i32 to index
    %c0_42 = arith.constant 0 : index
    %c0_43 = arith.constant 0 : index
    %118 = vector.load %arg4[%117, %c0_42, %c0_43] : memref<10x128x512xf32, #tpu.memory_space<vmem>>, vector<1x128x512xf32>
    %119 = vector.shape_cast %118 : vector<1x128x512xf32> to vector<128x512xf32>
    %cst_44 = arith.constant dense<0.000000e+00> : vector<8x512xf32>
    %120 = tpu.matmul %116, %119, %cst_44 {dimension_numbers = #tpu.dot_dimension_numbers<[1], [0], [0], [1], [0, 0, 1, 1], [], []>} : vector<8x128xf32>, vector<128x512xf32>, vector<8x512xf32> -> vector<8x512xf32>
    %121 = arith.addf %93, %120 : vector<8x512xf32>
    %c4_i32 = arith.constant 4 : i32
    %c8_i32_45 = arith.constant 8 : i32
    %122 = arith.muli %c4_i32, %c8_i32_45 : i32
    %123 = tpu.assume_multiple %122, 8 : i32
    %124 = arith.index_cast %123 : i32 to index
    %c0_46 = arith.constant 0 : index
    %125 = vector.load %arg19[%124, %c0_46] : memref<80x512xf32, #tpu.memory_space<vmem>>, vector<8x512xf32>
    %c0_47 = arith.constant 0 : index
    %c0_48 = arith.constant 0 : index
    %126 = vector.load %arg2[%c0_47, %c0_48] : memref<128x512xf32, #tpu.memory_space<vmem>>, vector<128x512xf32>
    %cst_49 = arith.constant dense<0.000000e+00> : vector<8x512xf32>
    %127 = tpu.matmul %116, %126, %cst_49 {dimension_numbers = #tpu.dot_dimension_numbers<[1], [0], [0], [1], [0, 0, 1, 1], [], []>} : vector<8x128xf32>, vector<128x512xf32>, vector<8x512xf32> -> vector<8x512xf32>
    %128 = arith.addf %125, %127 : vector<8x512xf32>
    %129 = vector.extract_strided_slice %128 {offsets = [0, 0], sizes = [8, 384], strides = [1, 1]} : vector<8x512xf32> to vector<8x384xf32>
    %130 = arith.negf %129 : vector<8x384xf32>
    %131 = math.exp %130 : vector<8x384xf32>
    %cst_50 = arith.constant 1.000000e+00 : f32
    %132 = vector.broadcast %cst_50 : f32 to vector<8x384xf32>
    %133 = arith.addf %132, %131 : vector<8x384xf32>
    %134 = arith.divf %132, %133 : vector<8x384xf32>
    %135 = vector.extract_strided_slice %128 {offsets = [0, 384], sizes = [8, 128], strides = [1, 1]} : vector<8x512xf32> to vector<8x128xf32>
    %136 = math.tanh %135 : vector<8x128xf32>
    %137 = vector.extract_strided_slice %134 {offsets = [0, 0], sizes = [8, 128], strides = [1, 1]} : vector<8x384xf32> to vector<8x128xf32>
    %138 = vector.extract_strided_slice %134 {offsets = [0, 128], sizes = [8, 128], strides = [1, 1]} : vector<8x384xf32> to vector<8x128xf32>
    %139 = vector.extract_strided_slice %134 {offsets = [0, 256], sizes = [8, 128], strides = [1, 1]} : vector<8x384xf32> to vector<8x128xf32>
    %140 = arith.mulf %138, %114 : vector<8x128xf32>
    %141 = arith.mulf %137, %136 : vector<8x128xf32>
    %142 = arith.addf %140, %141 : vector<8x128xf32>
    %143 = math.tanh %142 : vector<8x128xf32>
    %144 = arith.mulf %139, %143 : vector<8x128xf32>
    %145 = arith.index_cast %c4_i32 : i32 to index
    %c0_51 = arith.constant 0 : index
    %c0_52 = arith.constant 0 : index
    %146 = vector.load %arg4[%145, %c0_51, %c0_52] : memref<10x128x512xf32, #tpu.memory_space<vmem>>, vector<1x128x512xf32>
    %147 = vector.shape_cast %146 : vector<1x128x512xf32> to vector<128x512xf32>
    %cst_53 = arith.constant dense<0.000000e+00> : vector<8x512xf32>
    %148 = tpu.matmul %144, %147, %cst_53 {dimension_numbers = #tpu.dot_dimension_numbers<[1], [0], [0], [1], [0, 0, 1, 1], [], []>} : vector<8x128xf32>, vector<128x512xf32>, vector<8x512xf32> -> vector<8x512xf32>
    %149 = arith.addf %121, %148 : vector<8x512xf32>
    %c5_i32 = arith.constant 5 : i32
    %c8_i32_54 = arith.constant 8 : i32
    %150 = arith.muli %c5_i32, %c8_i32_54 : i32
    %151 = tpu.assume_multiple %150, 8 : i32
    %152 = arith.index_cast %151 : i32 to index
    %c0_55 = arith.constant 0 : index
    %153 = vector.load %arg19[%152, %c0_55] : memref<80x512xf32, #tpu.memory_space<vmem>>, vector<8x512xf32>
    %c0_56 = arith.constant 0 : index
    %c0_57 = arith.constant 0 : index
    %154 = vector.load %arg2[%c0_56, %c0_57] : memref<128x512xf32, #tpu.memory_space<vmem>>, vector<128x512xf32>
    %cst_58 = arith.constant dense<0.000000e+00> : vector<8x512xf32>
    %155 = tpu.matmul %144, %154, %cst_58 {dimension_numbers = #tpu.dot_dimension_numbers<[1], [0], [0], [1], [0, 0, 1, 1], [], []>} : vector<8x128xf32>, vector<128x512xf32>, vector<8x512xf32> -> vector<8x512xf32>
    %156 = arith.addf %153, %155 : vector<8x512xf32>
    %157 = vector.extract_strided_slice %156 {offsets = [0, 0], sizes = [8, 384], strides = [1, 1]} : vector<8x512xf32> to vector<8x384xf32>
    %158 = arith.negf %157 : vector<8x384xf32>
    %159 = math.exp %158 : vector<8x384xf32>
    %cst_59 = arith.constant 1.000000e+00 : f32
    %160 = vector.broadcast %cst_59 : f32 to vector<8x384xf32>
    %161 = arith.addf %160, %159 : vector<8x384xf32>
    %162 = arith.divf %160, %161 : vector<8x384xf32>
    %163 = vector.extract_strided_slice %156 {offsets = [0, 384], sizes = [8, 128], strides = [1, 1]} : vector<8x512xf32> to vector<8x128xf32>
    %164 = math.tanh %163 : vector<8x128xf32>
    %165 = vector.extract_strided_slice %162 {offsets = [0, 0], sizes = [8, 128], strides = [1, 1]} : vector<8x384xf32> to vector<8x128xf32>
    %166 = vector.extract_strided_slice %162 {offsets = [0, 128], sizes = [8, 128], strides = [1, 1]} : vector<8x384xf32> to vector<8x128xf32>
    %167 = vector.extract_strided_slice %162 {offsets = [0, 256], sizes = [8, 128], strides = [1, 1]} : vector<8x384xf32> to vector<8x128xf32>
    %168 = arith.mulf %166, %142 : vector<8x128xf32>
    %169 = arith.mulf %165, %164 : vector<8x128xf32>
    %170 = arith.addf %168, %169 : vector<8x128xf32>
    %171 = math.tanh %170 : vector<8x128xf32>
    %172 = arith.mulf %167, %171 : vector<8x128xf32>
    %173 = arith.index_cast %c5_i32 : i32 to index
    %c0_60 = arith.constant 0 : index
    %c0_61 = arith.constant 0 : index
    %174 = vector.load %arg4[%173, %c0_60, %c0_61] : memref<10x128x512xf32, #tpu.memory_space<vmem>>, vector<1x128x512xf32>
    %175 = vector.shape_cast %174 : vector<1x128x512xf32> to vector<128x512xf32>
    %cst_62 = arith.constant dense<0.000000e+00> : vector<8x512xf32>
    %176 = tpu.matmul %172, %175, %cst_62 {dimension_numbers = #tpu.dot_dimension_numbers<[1], [0], [0], [1], [0, 0, 1, 1], [], []>} : vector<8x128xf32>, vector<128x512xf32>, vector<8x512xf32> -> vector<8x512xf32>
    %177 = arith.addf %149, %176 : vector<8x512xf32>
    %c6_i32 = arith.constant 6 : i32
    %c8_i32_63 = arith.constant 8 : i32
    %178 = arith.muli %c6_i32, %c8_i32_63 : i32
    %179 = tpu.assume_multiple %178, 8 : i32
    %180 = arith.index_cast %179 : i32 to index
    %c0_64 = arith.constant 0 : index
    %181 = vector.load %arg19[%180, %c0_64] : memref<80x512xf32, #tpu.memory_space<vmem>>, vector<8x512xf32>
    %c0_65 = arith.constant 0 : index
    %c0_66 = arith.constant 0 : index
    %182 = vector.load %arg2[%c0_65, %c0_66] : memref<128x512xf32, #tpu.memory_space<vmem>>, vector<128x512xf32>
    %cst_67 = arith.constant dense<0.000000e+00> : vector<8x512xf32>
    %183 = tpu.matmul %172, %182, %cst_67 {dimension_numbers = #tpu.dot_dimension_numbers<[1], [0], [0], [1], [0, 0, 1, 1], [], []>} : vector<8x128xf32>, vector<128x512xf32>, vector<8x512xf32> -> vector<8x512xf32>
    %184 = arith.addf %181, %183 : vector<8x512xf32>
    %185 = vector.extract_strided_slice %184 {offsets = [0, 0], sizes = [8, 384], strides = [1, 1]} : vector<8x512xf32> to vector<8x384xf32>
    %186 = arith.negf %185 : vector<8x384xf32>
    %187 = math.exp %186 : vector<8x384xf32>
    %cst_68 = arith.constant 1.000000e+00 : f32
    %188 = vector.broadcast %cst_68 : f32 to vector<8x384xf32>
    %189 = arith.addf %188, %187 : vector<8x384xf32>
    %190 = arith.divf %188, %189 : vector<8x384xf32>
    %191 = vector.extract_strided_slice %184 {offsets = [0, 384], sizes = [8, 128], strides = [1, 1]} : vector<8x512xf32> to vector<8x128xf32>
    %192 = math.tanh %191 : vector<8x128xf32>
    %193 = vector.extract_strided_slice %190 {offsets = [0, 0], sizes = [8, 128], strides = [1, 1]} : vector<8x384xf32> to vector<8x128xf32>
    %194 = vector.extract_strided_slice %190 {offsets = [0, 128], sizes = [8, 128], strides = [1, 1]} : vector<8x384xf32> to vector<8x128xf32>
    %195 = vector.extract_strided_slice %190 {offsets = [0, 256], sizes = [8, 128], strides = [1, 1]} : vector<8x384xf32> to vector<8x128xf32>
    %196 = arith.mulf %194, %170 : vector<8x128xf32>
    %197 = arith.mulf %193, %192 : vector<8x128xf32>
    %198 = arith.addf %196, %197 : vector<8x128xf32>
    %199 = math.tanh %198 : vector<8x128xf32>
    %200 = arith.mulf %195, %199 : vector<8x128xf32>
    %201 = arith.index_cast %c6_i32 : i32 to index
    %c0_69 = arith.constant 0 : index
    %c0_70 = arith.constant 0 : index
    %202 = vector.load %arg4[%201, %c0_69, %c0_70] : memref<10x128x512xf32, #tpu.memory_space<vmem>>, vector<1x128x512xf32>
    %203 = vector.shape_cast %202 : vector<1x128x512xf32> to vector<128x512xf32>
    %cst_71 = arith.constant dense<0.000000e+00> : vector<8x512xf32>
    %204 = tpu.matmul %200, %203, %cst_71 {dimension_numbers = #tpu.dot_dimension_numbers<[1], [0], [0], [1], [0, 0, 1, 1], [], []>} : vector<8x128xf32>, vector<128x512xf32>, vector<8x512xf32> -> vector<8x512xf32>
    %205 = arith.addf %177, %204 : vector<8x512xf32>
    %c7_i32 = arith.constant 7 : i32
    %c8_i32_72 = arith.constant 8 : i32
    %206 = arith.muli %c7_i32, %c8_i32_72 : i32
    %207 = tpu.assume_multiple %206, 8 : i32
    %208 = arith.index_cast %207 : i32 to index
    %c0_73 = arith.constant 0 : index
    %209 = vector.load %arg19[%208, %c0_73] : memref<80x512xf32, #tpu.memory_space<vmem>>, vector<8x512xf32>
    %c0_74 = arith.constant 0 : index
    %c0_75 = arith.constant 0 : index
    %210 = vector.load %arg2[%c0_74, %c0_75] : memref<128x512xf32, #tpu.memory_space<vmem>>, vector<128x512xf32>
    %cst_76 = arith.constant dense<0.000000e+00> : vector<8x512xf32>
    %211 = tpu.matmul %200, %210, %cst_76 {dimension_numbers = #tpu.dot_dimension_numbers<[1], [0], [0], [1], [0, 0, 1, 1], [], []>} : vector<8x128xf32>, vector<128x512xf32>, vector<8x512xf32> -> vector<8x512xf32>
    %212 = arith.addf %209, %211 : vector<8x512xf32>
    %213 = vector.extract_strided_slice %212 {offsets = [0, 0], sizes = [8, 384], strides = [1, 1]} : vector<8x512xf32> to vector<8x384xf32>
    %214 = arith.negf %213 : vector<8x384xf32>
    %215 = math.exp %214 : vector<8x384xf32>
    %cst_77 = arith.constant 1.000000e+00 : f32
    %216 = vector.broadcast %cst_77 : f32 to vector<8x384xf32>
    %217 = arith.addf %216, %215 : vector<8x384xf32>
    %218 = arith.divf %216, %217 : vector<8x384xf32>
    %219 = vector.extract_strided_slice %212 {offsets = [0, 384], sizes = [8, 128], strides = [1, 1]} : vector<8x512xf32> to vector<8x128xf32>
    %220 = math.tanh %219 : vector<8x128xf32>
    %221 = vector.extract_strided_slice %218 {offsets = [0, 0], sizes = [8, 128], strides = [1, 1]} : vector<8x384xf32> to vector<8x128xf32>
    %222 = vector.extract_strided_slice %218 {offsets = [0, 128], sizes = [8, 128], strides = [1, 1]} : vector<8x384xf32> to vector<8x128xf32>
    %223 = vector.extract_strided_slice %218 {offsets = [0, 256], sizes = [8, 128], strides = [1, 1]} : vector<8x384xf32> to vector<8x128xf32>
    %224 = arith.mulf %222, %198 : vector<8x128xf32>
    %225 = arith.mulf %221, %220 : vector<8x128xf32>
    %226 = arith.addf %224, %225 : vector<8x128xf32>
    %227 = math.tanh %226 : vector<8x128xf32>
    %228 = arith.mulf %223, %227 : vector<8x128xf32>
    %229 = arith.index_cast %c7_i32 : i32 to index
    %c0_78 = arith.constant 0 : index
    %c0_79 = arith.constant 0 : index
    %230 = vector.load %arg4[%229, %c0_78, %c0_79] : memref<10x128x512xf32, #tpu.memory_space<vmem>>, vector<1x128x512xf32>
    %231 = vector.shape_cast %230 : vector<1x128x512xf32> to vector<128x512xf32>
    %cst_80 = arith.constant dense<0.000000e+00> : vector<8x512xf32>
    %232 = tpu.matmul %228, %231, %cst_80 {dimension_numbers = #tpu.dot_dimension_numbers<[1], [0], [0], [1], [0, 0, 1, 1], [], []>} : vector<8x128xf32>, vector<128x512xf32>, vector<8x512xf32> -> vector<8x512xf32>
    %233 = arith.addf %205, %232 : vector<8x512xf32>
    %c8_i32_81 = arith.constant 8 : i32
    %c8_i32_82 = arith.constant 8 : i32
    %234 = arith.muli %c8_i32_81, %c8_i32_82 : i32
    %235 = tpu.assume_multiple %234, 8 : i32
    %236 = arith.index_cast %235 : i32 to index
    %c0_83 = arith.constant 0 : index
    %237 = vector.load %arg19[%236, %c0_83] : memref<80x512xf32, #tpu.memory_space<vmem>>, vector<8x512xf32>
    %c0_84 = arith.constant 0 : index
    %c0_85 = arith.constant 0 : index
    %238 = vector.load %arg2[%c0_84, %c0_85] : memref<128x512xf32, #tpu.memory_space<vmem>>, vector<128x512xf32>
    %cst_86 = arith.constant dense<0.000000e+00> : vector<8x512xf32>
    %239 = tpu.matmul %228, %238, %cst_86 {dimension_numbers = #tpu.dot_dimension_numbers<[1], [0], [0], [1], [0, 0, 1, 1], [], []>} : vector<8x128xf32>, vector<128x512xf32>, vector<8x512xf32> -> vector<8x512xf32>
    %240 = arith.addf %237, %239 : vector<8x512xf32>
    %241 = vector.extract_strided_slice %240 {offsets = [0, 0], sizes = [8, 384], strides = [1, 1]} : vector<8x512xf32> to vector<8x384xf32>
    %242 = arith.negf %241 : vector<8x384xf32>
    %243 = math.exp %242 : vector<8x384xf32>
    %cst_87 = arith.constant 1.000000e+00 : f32
    %244 = vector.broadcast %cst_87 : f32 to vector<8x384xf32>
    %245 = arith.addf %244, %243 : vector<8x384xf32>
    %246 = arith.divf %244, %245 : vector<8x384xf32>
    %247 = vector.extract_strided_slice %240 {offsets = [0, 384], sizes = [8, 128], strides = [1, 1]} : vector<8x512xf32> to vector<8x128xf32>
    %248 = math.tanh %247 : vector<8x128xf32>
    %249 = vector.extract_strided_slice %246 {offsets = [0, 0], sizes = [8, 128], strides = [1, 1]} : vector<8x384xf32> to vector<8x128xf32>
    %250 = vector.extract_strided_slice %246 {offsets = [0, 128], sizes = [8, 128], strides = [1, 1]} : vector<8x384xf32> to vector<8x128xf32>
    %251 = vector.extract_strided_slice %246 {offsets = [0, 256], sizes = [8, 128], strides = [1, 1]} : vector<8x384xf32> to vector<8x128xf32>
    %252 = arith.mulf %250, %226 : vector<8x128xf32>
    %253 = arith.mulf %249, %248 : vector<8x128xf32>
    %254 = arith.addf %252, %253 : vector<8x128xf32>
    %255 = math.tanh %254 : vector<8x128xf32>
    %256 = arith.mulf %251, %255 : vector<8x128xf32>
    %257 = arith.index_cast %c8_i32_81 : i32 to index
    %c0_88 = arith.constant 0 : index
    %c0_89 = arith.constant 0 : index
    %258 = vector.load %arg4[%257, %c0_88, %c0_89] : memref<10x128x512xf32, #tpu.memory_space<vmem>>, vector<1x128x512xf32>
    %259 = vector.shape_cast %258 : vector<1x128x512xf32> to vector<128x512xf32>
    %cst_90 = arith.constant dense<0.000000e+00> : vector<8x512xf32>
    %260 = tpu.matmul %256, %259, %cst_90 {dimension_numbers = #tpu.dot_dimension_numbers<[1], [0], [0], [1], [0, 0, 1, 1], [], []>} : vector<8x128xf32>, vector<128x512xf32>, vector<8x512xf32> -> vector<8x512xf32>
    %261 = arith.addf %233, %260 : vector<8x512xf32>
    %c9_i32 = arith.constant 9 : i32
    %c8_i32_91 = arith.constant 8 : i32
    %262 = arith.muli %c9_i32, %c8_i32_91 : i32
    %263 = tpu.assume_multiple %262, 8 : i32
    %264 = arith.index_cast %263 : i32 to index
    %c0_92 = arith.constant 0 : index
    %265 = vector.load %arg19[%264, %c0_92] : memref<80x512xf32, #tpu.memory_space<vmem>>, vector<8x512xf32>
    %c0_93 = arith.constant 0 : index
    %c0_94 = arith.constant 0 : index
    %266 = vector.load %arg2[%c0_93, %c0_94] : memref<128x512xf32, #tpu.memory_space<vmem>>, vector<128x512xf32>
    %cst_95 = arith.constant dense<0.000000e+00> : vector<8x512xf32>
    %267 = tpu.matmul %256, %266, %cst_95 {dimension_numbers = #tpu.dot_dimension_numbers<[1], [0], [0], [1], [0, 0, 1, 1], [], []>} : vector<8x128xf32>, vector<128x512xf32>, vector<8x512xf32> -> vector<8x512xf32>
    %268 = arith.addf %265, %267 : vector<8x512xf32>
    %269 = vector.extract_strided_slice %268 {offsets = [0, 0], sizes = [8, 384], strides = [1, 1]} : vector<8x512xf32> to vector<8x384xf32>
    %270 = arith.negf %269 : vector<8x384xf32>
    %271 = math.exp %270 : vector<8x384xf32>
    %cst_96 = arith.constant 1.000000e+00 : f32
    %272 = vector.broadcast %cst_96 : f32 to vector<8x384xf32>
    %273 = arith.addf %272, %271 : vector<8x384xf32>
    %274 = arith.divf %272, %273 : vector<8x384xf32>
    %275 = vector.extract_strided_slice %268 {offsets = [0, 384], sizes = [8, 128], strides = [1, 1]} : vector<8x512xf32> to vector<8x128xf32>
    %276 = math.tanh %275 : vector<8x128xf32>
    %277 = vector.extract_strided_slice %274 {offsets = [0, 0], sizes = [8, 128], strides = [1, 1]} : vector<8x384xf32> to vector<8x128xf32>
    %278 = vector.extract_strided_slice %274 {offsets = [0, 128], sizes = [8, 128], strides = [1, 1]} : vector<8x384xf32> to vector<8x128xf32>
    %279 = vector.extract_strided_slice %274 {offsets = [0, 256], sizes = [8, 128], strides = [1, 1]} : vector<8x384xf32> to vector<8x128xf32>
    %280 = arith.mulf %278, %254 : vector<8x128xf32>
    %281 = arith.mulf %277, %276 : vector<8x128xf32>
    %282 = arith.addf %280, %281 : vector<8x128xf32>
    %283 = math.tanh %282 : vector<8x128xf32>
    %284 = arith.mulf %279, %283 : vector<8x128xf32>
    %285 = arith.index_cast %c9_i32 : i32 to index
    %c0_97 = arith.constant 0 : index
    %c0_98 = arith.constant 0 : index
    %286 = vector.load %arg4[%285, %c0_97, %c0_98] : memref<10x128x512xf32, #tpu.memory_space<vmem>>, vector<1x128x512xf32>
    %287 = vector.shape_cast %286 : vector<1x128x512xf32> to vector<128x512xf32>
    %cst_99 = arith.constant dense<0.000000e+00> : vector<8x512xf32>
    %288 = tpu.matmul %284, %287, %cst_99 {dimension_numbers = #tpu.dot_dimension_numbers<[1], [0], [0], [1], [0, 0, 1, 1], [], []>} : vector<8x128xf32>, vector<128x512xf32>, vector<8x512xf32> -> vector<8x512xf32>
    %289 = arith.addf %261, %288 : vector<8x512xf32>
    %c10_i32 = arith.constant 10 : i32
    %c0_100 = arith.constant 0 : index
    %c0_101 = arith.constant 0 : index
    %290 = vector.load %arg5[%c0_100, %c0_101] : memref<1x512xf32, #tpu.memory_space<vmem>>, vector<1x512xf32>
    %291 = vector.broadcast %290 : vector<1x512xf32> to vector<8x512xf32>
    %292 = arith.addf %289, %291 : vector<8x512xf32>
    %c0_102 = arith.constant 0 : index
    %c0_103 = arith.constant 0 : index
    %293 = vector.load %arg6[%c0_102, %c0_103] : memref<1x512xf32, #tpu.memory_space<vmem>>, vector<1x512xf32>
    %c0_104 = arith.constant 0 : index
    %c0_105 = arith.constant 0 : index
    %294 = vector.load %arg7[%c0_104, %c0_105] : memref<1x512xf32, #tpu.memory_space<vmem>>, vector<1x512xf32>
    %cst_106 = arith.constant dense<0.000000e+00> : vector<512xf32>
    %295 = vector.multi_reduction <add>, %292, %cst_106 [0] : vector<8x512xf32> to vector<512xf32>
    %296 = vector.shape_cast %295 : vector<512xf32> to vector<1x512xf32>
    %cst_107 = arith.constant 8.000000e+00 : f32
    %297 = vector.broadcast %cst_107 : f32 to vector<1x512xf32>
    %298 = arith.divf %296, %297 : vector<1x512xf32>
    %299 = vector.broadcast %298 : vector<1x512xf32> to vector<8x512xf32>
    %300 = arith.subf %292, %299 : vector<8x512xf32>
    %301 = arith.mulf %300, %300 : vector<8x512xf32>
    %cst_108 = arith.constant dense<0.000000e+00> : vector<512xf32>
    %302 = vector.multi_reduction <add>, %301, %cst_108 [0] : vector<8x512xf32> to vector<512xf32>
    %303 = vector.shape_cast %302 : vector<512xf32> to vector<1x512xf32>
    %cst_109 = arith.constant 8.000000e+00 : f32
    %304 = vector.broadcast %cst_109 : f32 to vector<1x512xf32>
    %305 = arith.divf %303, %304 : vector<1x512xf32>
    %306 = vector.broadcast %298 : vector<1x512xf32> to vector<8x512xf32>
    %307 = arith.subf %292, %306 : vector<8x512xf32>
    %cst_110 = arith.constant 9.99999974E-6 : f32
    %308 = vector.broadcast %cst_110 : f32 to vector<1x512xf32>
    %309 = arith.addf %305, %308 : vector<1x512xf32>
    %310 = math.rsqrt %309 : vector<1x512xf32>
    %311 = vector.broadcast %310 : vector<1x512xf32> to vector<8x512xf32>
    %312 = arith.mulf %307, %311 : vector<8x512xf32>
    %313 = vector.broadcast %293 : vector<1x512xf32> to vector<8x512xf32>
    %314 = arith.mulf %312, %313 : vector<8x512xf32>
    %315 = vector.broadcast %294 : vector<1x512xf32> to vector<8x512xf32>
    %316 = arith.addf %314, %315 : vector<8x512xf32>
    %317 = math.tanh %316 : vector<8x512xf32>
    %c0_111 = arith.constant 0 : index
    %c0_112 = arith.constant 0 : index
    %318 = vector.load %arg8[%c0_111, %c0_112] : memref<512x256xf32, #tpu.memory_space<vmem>>, vector<512x256xf32>
    %cst_113 = arith.constant dense<0.000000e+00> : vector<8x256xf32>
    %319 = tpu.matmul %317, %318, %cst_113 {dimension_numbers = #tpu.dot_dimension_numbers<[1], [0], [0], [1], [0, 0, 1, 1], [], []>} : vector<8x512xf32>, vector<512x256xf32>, vector<8x256xf32> -> vector<8x256xf32>
    %c0_114 = arith.constant 0 : index
    %c0_115 = arith.constant 0 : index
    %320 = vector.load %arg9[%c0_114, %c0_115] : memref<1x256xf32, #tpu.memory_space<vmem>>, vector<1x256xf32>
    %321 = vector.broadcast %320 : vector<1x256xf32> to vector<8x256xf32>
    %322 = arith.addf %319, %321 : vector<8x256xf32>
    %c0_116 = arith.constant 0 : index
    %c0_117 = arith.constant 0 : index
    %323 = vector.load %arg10[%c0_116, %c0_117] : memref<1x256xf32, #tpu.memory_space<vmem>>, vector<1x256xf32>
    %c0_118 = arith.constant 0 : index
    %c0_119 = arith.constant 0 : index
    %324 = vector.load %arg11[%c0_118, %c0_119] : memref<1x256xf32, #tpu.memory_space<vmem>>, vector<1x256xf32>
    %cst_120 = arith.constant dense<0.000000e+00> : vector<256xf32>
    %325 = vector.multi_reduction <add>, %322, %cst_120 [0] : vector<8x256xf32> to vector<256xf32>
    %326 = vector.shape_cast %325 : vector<256xf32> to vector<1x256xf32>
    %cst_121 = arith.constant 8.000000e+00 : f32
    %327 = vector.broadcast %cst_121 : f32 to vector<1x256xf32>
    %328 = arith.divf %326, %327 : vector<1x256xf32>
    %329 = vector.broadcast %328 : vector<1x256xf32> to vector<8x256xf32>
    %330 = arith.subf %322, %329 : vector<8x256xf32>
    %331 = arith.mulf %330, %330 : vector<8x256xf32>
    %cst_122 = arith.constant dense<0.000000e+00> : vector<256xf32>
    %332 = vector.multi_reduction <add>, %331, %cst_122 [0] : vector<8x256xf32> to vector<256xf32>
    %333 = vector.shape_cast %332 : vector<256xf32> to vector<1x256xf32>
    %cst_123 = arith.constant 8.000000e+00 : f32
    %334 = vector.broadcast %cst_123 : f32 to vector<1x256xf32>
    %335 = arith.divf %333, %334 : vector<1x256xf32>
    %336 = vector.broadcast %328 : vector<1x256xf32> to vector<8x256xf32>
    %337 = arith.subf %322, %336 : vector<8x256xf32>
    %cst_124 = arith.constant 9.99999974E-6 : f32
    %338 = vector.broadcast %cst_124 : f32 to vector<1x256xf32>
    %339 = arith.addf %335, %338 : vector<1x256xf32>
    %340 = math.rsqrt %339 : vector<1x256xf32>
    %341 = vector.broadcast %340 : vector<1x256xf32> to vector<8x256xf32>
    %342 = arith.mulf %337, %341 : vector<8x256xf32>
    %343 = vector.broadcast %323 : vector<1x256xf32> to vector<8x256xf32>
    %344 = arith.mulf %342, %343 : vector<8x256xf32>
    %345 = vector.broadcast %324 : vector<1x256xf32> to vector<8x256xf32>
    %346 = arith.addf %344, %345 : vector<8x256xf32>
    %347 = math.tanh %346 : vector<8x256xf32>
    %c0_125 = arith.constant 0 : index
    %c0_126 = arith.constant 0 : index
    %348 = vector.load %arg12[%c0_125, %c0_126] : memref<256x128xf32, #tpu.memory_space<vmem>>, vector<256x128xf32>
    %cst_127 = arith.constant dense<0.000000e+00> : vector<8x128xf32>
    %349 = tpu.matmul %347, %348, %cst_127 {dimension_numbers = #tpu.dot_dimension_numbers<[1], [0], [0], [1], [0, 0, 1, 1], [], []>} : vector<8x256xf32>, vector<256x128xf32>, vector<8x128xf32> -> vector<8x128xf32>
    %c0_128 = arith.constant 0 : index
    %c0_129 = arith.constant 0 : index
    %350 = vector.load %arg13[%c0_128, %c0_129] : memref<1x128xf32, #tpu.memory_space<vmem>>, vector<1x128xf32>
    %351 = vector.broadcast %350 : vector<1x128xf32> to vector<8x128xf32>
    %352 = arith.addf %349, %351 : vector<8x128xf32>
    %c0_130 = arith.constant 0 : index
    %c0_131 = arith.constant 0 : index
    %353 = vector.load %arg14[%c0_130, %c0_131] : memref<1x128xf32, #tpu.memory_space<vmem>>, vector<1x128xf32>
    %c0_132 = arith.constant 0 : index
    %c0_133 = arith.constant 0 : index
    %354 = vector.load %arg15[%c0_132, %c0_133] : memref<1x128xf32, #tpu.memory_space<vmem>>, vector<1x128xf32>
    %cst_134 = arith.constant dense<0.000000e+00> : vector<128xf32>
    %355 = vector.multi_reduction <add>, %352, %cst_134 [0] : vector<8x128xf32> to vector<128xf32>
    %356 = vector.shape_cast %355 : vector<128xf32> to vector<1x128xf32>
    %cst_135 = arith.constant 8.000000e+00 : f32
    %357 = vector.broadcast %cst_135 : f32 to vector<1x128xf32>
    %358 = arith.divf %356, %357 : vector<1x128xf32>
    %359 = vector.broadcast %358 : vector<1x128xf32> to vector<8x128xf32>
    %360 = arith.subf %352, %359 : vector<8x128xf32>
    %361 = arith.mulf %360, %360 : vector<8x128xf32>
    %cst_136 = arith.constant dense<0.000000e+00> : vector<128xf32>
    %362 = vector.multi_reduction <add>, %361, %cst_136 [0] : vector<8x128xf32> to vector<128xf32>
    %363 = vector.shape_cast %362 : vector<128xf32> to vector<1x128xf32>
    %cst_137 = arith.constant 8.000000e+00 : f32
    %364 = vector.broadcast %cst_137 : f32 to vector<1x128xf32>
    %365 = arith.divf %363, %364 : vector<1x128xf32>
    %366 = vector.broadcast %358 : vector<1x128xf32> to vector<8x128xf32>
    %367 = arith.subf %352, %366 : vector<8x128xf32>
    %cst_138 = arith.constant 9.99999974E-6 : f32
    %368 = vector.broadcast %cst_138 : f32 to vector<1x128xf32>
    %369 = arith.addf %365, %368 : vector<1x128xf32>
    %370 = math.rsqrt %369 : vector<1x128xf32>
    %371 = vector.broadcast %370 : vector<1x128xf32> to vector<8x128xf32>
    %372 = arith.mulf %367, %371 : vector<8x128xf32>
    %373 = vector.broadcast %353 : vector<1x128xf32> to vector<8x128xf32>
    %374 = arith.mulf %372, %373 : vector<8x128xf32>
    %375 = vector.broadcast %354 : vector<1x128xf32> to vector<8x128xf32>
    %376 = arith.addf %374, %375 : vector<8x128xf32>
    %377 = math.tanh %376 : vector<8x128xf32>
    %c0_139 = arith.constant 0 : index
    %c0_140 = arith.constant 0 : index
    %378 = vector.load %arg16[%c0_139, %c0_140] : memref<128x4xf32, #tpu.memory_space<vmem>>, vector<128x4xf32>
    %cst_141 = arith.constant dense<0.000000e+00> : vector<8x4xf32>
    %379 = tpu.matmul %377, %378, %cst_141 {dimension_numbers = #tpu.dot_dimension_numbers<[1], [0], [0], [1], [0, 0, 1, 1], [], []>} : vector<8x128xf32>, vector<128x4xf32>, vector<8x4xf32> -> vector<8x4xf32>
    %c0_142 = arith.constant 0 : index
    %c0_143 = arith.constant 0 : index
    %380 = vector.load %arg17[%c0_142, %c0_143] : memref<1x4xf32, #tpu.memory_space<vmem>>, vector<1x4xf32>
    %381 = vector.broadcast %380 : vector<1x4xf32> to vector<8x4xf32>
    %382 = arith.addf %379, %381 : vector<8x4xf32>
    %c0_144 = arith.constant 0 : index
    %c0_145 = arith.constant 0 : index
    %383 = vector.load %arg18[%c0_144, %c0_145] : memref<8x4xf32, #tpu.memory_space<vmem>>, vector<8x4xf32>
    tpu.vector_store %arg18[%c0_144, %c0_145], %382 {strides = array<i32>} : memref<8x4xf32, #tpu.memory_space<vmem>>, vector<8x4xf32>,
    return
  }
}

</mosaic_0001>

<bundles_post_ra>
// kernel: lstm_classifier_forward.1
= control target key start
LH: loop header
LB: loop body
LE: loop exit
PB: predicated region body
PF: predicated region fallthrough
CT: control target
= control target key end

     0   :  { %s8688_s0 = inlined_call_operand.hbm [shape: f32[80,32], index: 0, kind: input, shape index: {}]   ;;  %s8689_s1 = inlined_call_operand.hbm [shape: f32[32,512], index: 1, kind: input, shape index: {}]   ;;  %s8690_s2 = inlined_call_operand.hbm [shape: f32[128,512], index: 2, kind: input, shape index: {}]   ;;  %s8691_s3 = inlined_call_operand.hbm [shape: f32[1,512], index: 3, kind: input, shape index: {}]   ;;  %s8692_s4 = inlined_call_operand.hbm [shape: f32[10,128,512], index: 4, kind: input, shape index: {}]   ;;  %s8693_s5 = inlined_call_operand.hbm [shape: f32[1,512], index: 5, kind: input, shape index: {}]   ;;  %s8694_s6 = inlined_call_operand.hbm [shape: f32[1,512], index: 6, kind: input, shape index: {}]   ;;  %s8695_s7 = inlined_call_operand.hbm [shape: f32[1,512], index: 7, kind: input, shape index: {}]   ;;  %s8696_s8 = inlined_call_operand.hbm [shape: f32[512,256], index: 8, kind: input, shape index: {}]   ;;  %s8697_s9 = inlined_call_operand.hbm [shape: f32[1,256], index: 9, kind: input, shape index: {}]   ;;  %s8698_s10 = inlined_call_operand.hbm [shape: f32[1,256], index: 10, kind: input, shape index: {}]   ;;  %s8699_s11 = inlined_call_operand.hbm [shape: f32[1,256], index: 11, kind: input, shape index: {}]   ;;  %s8700_s12 = inlined_call_operand.hbm [shape: f32[256,128], index: 12, kind: input, shape index: {}]   ;;  %s8701_s13 = inlined_call_operand.hbm [shape: f32[1,128], index: 13, kind: input, shape index: {}]   ;;  %s8702_s14 = inlined_call_operand.hbm [shape: f32[1,128], index: 14, kind: input, shape index: {}]   ;;  %s8703_s15 = inlined_call_operand.hbm [shape: f32[1,128], index: 15, kind: input, shape index: {}]   ;;  %s8704_s16 = inlined_call_operand.vmem [shape: f32[128,4], index: 16, kind: input, shape index: {}]   ;;  %s8705_s17 = inlined_call_operand.hbm [shape: f32[1,4], index: 17, kind: input, shape index: {}]   ;;  %s8706_s18 = inlined_call_operand.vmem [shape: f32[8,4], index: 18, kind: output, shape index: {}]  }
   0x1   :  { %8724 = sst [smem:[#allocation44_spill]] %s8688_s0 }
   0x2   :  { %8725 = sst [smem:[#allocation45_spill]] %s8689_s1 }
   0x3   :  { %8726 = sst [smem:[#allocation46_spill]] %s8690_s2 }
   0x4   :  { %8727 = sst [smem:[#allocation47_spill]] %s8704_s16 }
   0x5   :  { %8728 = sst [smem:[#allocation48_spill]] %s8706_s18 }
   0x6   :  { %23 = vsyncpa [#allocation4], 0 }
   0x7   :  { %24 = vsyncpa [#allocation6], 0 }
   0x8   :  { %25 = vsyncpa [#allocation9], 0 }
   0x9   :  { %26 = vsyncpa [#allocation12], 0 }
   0xa   :  { %27 = vsyncpa [#allocation15], 0 }
   0xb   :  { %28 = vsyncpa [#allocation18], 0 }
   0xc   :  { %29 = vsyncpa [#allocation21], 0 }
   0xd   :  { %30 = vsyncpa [#allocation24], 0 }
   0xe   :  { %31 = vsyncpa [#allocation27], 0  ;;  %s7689_s27 = smov [#allocation5]   ;;  %s8729_s0 = sld [smem:[#allocation45_spill]] }
   0xf   :  { %s49_s28 = sshll.u32 %s7689_s27, 4  ;;  %s50_s28 = int_to_ptr.vmem [resolvable:$true] %s49_s28 }
  0x14   :  { %s7297_s19 = scalar_lea.hbm %s8729_s0, 2048 }
  0x15   :  { %p7298_p0 = scmp.ne.s32.totalorder %s8729_s0, %s7297_s19  ;;  %p7301_p1 = scmp.lt.u32.totalorder %s7297_s19, %s8729_s0 }
  0x17   :  { %p7303_p2 = pnand %p7301_p1, %p7298_p0 }
  0x19   :  { %7306 = shalt.err (!%p7303_p2)
}
  0x1a   :  { %s7307_s2 = scalar_lea.vmem %s50_s28, 2048  ;;  %p7312_p4 = scmp.lt.s32.totalorder %s50_s28, %s50_s28 }
  0x1b   :  { %p7308_p3 = scmp.ne.s32.totalorder %s50_s28, %s7307_s2  ;;  %p7313_p5 = scmp.lt.s32.totalorder %s7307_s2, %s7307_s2 }
  0x1d   :  { %p7314_p6 = por %p7313_p5, %p7312_p4 }
  0x1f   :  { %p7315_p7 = pnand %p7314_p6, %p7308_p3 }
  0x21   :  { %7318 = shalt.err (!%p7315_p7)
}
  0x22   :  { %s7690_s23 = smov 512   ;;  %s7691_s24 = smov 32  }
  0x23   :  { %55 = dma.hbm_to_vmem [thread:$0]  %s8729_s0, 2048, %s50_s28, [#allocation6], %s7690_s23, %s7690_s23, %s7691_s24  }
  0x24   :  { %s7692_s27 = smov [#allocation8]   ;;  %s7693_s30 = smov [#allocation11]  }
  0x25   :  { %s74_s29 = sshll.u32 %s7692_s27, 4  ;;  %s96_s19 = sshll.u32 %s7693_s30, 4  ;;  %s75_s29 = int_to_ptr.vmem [resolvable:$true] %s74_s29  ;;  %s97_s19 = int_to_ptr.vmem [resolvable:$true] %s96_s19 }
  0x26   :  { %s7319_s21 = scalar_lea.hbm %s8691_s3, 64 }
  0x27   :  { %p7320_p8 = scmp.ne.s32.totalorder %s8691_s3, %s7319_s21  ;;  %p7323_p9 = scmp.lt.u32.totalorder %s7319_s21, %s8691_s3 }
  0x29   :  { %p7325_p10 = pnand %p7323_p9, %p7320_p8 }
  0x2b   :  { %7328 = shalt.err (!%p7325_p10)
}
  0x2c   :  { %s7329_s28 = scalar_lea.vmem %s75_s29, 64  ;;  %p7334_p12 = scmp.lt.s32.totalorder %s75_s29, %s75_s29 }
  0x2d   :  { %p7330_p11 = scmp.ne.s32.totalorder %s75_s29, %s7329_s28  ;;  %p7335_p13 = scmp.lt.s32.totalorder %s7329_s28, %s7329_s28 }
  0x2f   :  { %p7336_p0 = por %p7335_p13, %p7334_p12 }
  0x31   :  { %p7337_p1 = pnand %p7336_p0, %p7330_p11 }
  0x33   :  { %7340 = shalt.err (!%p7337_p1)
}
  0x34   :  { %77 = dma.hbm_to_vmem [thread:$0]  %s8691_s3, 64, %s75_s29, [#allocation9]  }
  0x35   :  { %s7341_s30 = scalar_lea.hbm %s8693_s5, 64 }
  0x36   :  { %p7342_p2 = scmp.ne.s32.totalorder %s8693_s5, %s7341_s30  ;;  %p7345_p3 = scmp.lt.u32.totalorder %s7341_s30, %s8693_s5 }
  0x38   :  { %p7347_p4 = pnand %p7345_p3, %p7342_p2 }
  0x3a   :  { %7350 = shalt.err (!%p7347_p4)
}
  0x3b   :  { %s7351_s21 = scalar_lea.vmem %s97_s19, 64  ;;  %p7356_p6 = scmp.lt.s32.totalorder %s97_s19, %s97_s19 }
  0x3c   :  { %p7352_p5 = scmp.ne.s32.totalorder %s97_s19, %s7351_s21  ;;  %p7357_p7 = scmp.lt.s32.totalorder %s7351_s21, %s7351_s21 }
  0x3e   :  { %p7358_p8 = por %p7357_p7, %p7356_p6 }
  0x40   :  { %p7359_p9 = pnand %p7358_p8, %p7352_p5 }
  0x42   :  { %7362 = shalt.err (!%p7359_p9)
}
  0x43   :  { %99 = dma.hbm_to_vmem [thread:$0]  %s8693_s5, 64, %s97_s19, [#allocation12]  }
  0x44   :  { %s7694_s22 = smov [#allocation14]   ;;  %s7695_s28 = smov [#allocation17]  }
  0x45   :  { %s116_s2 = sshll.u32 %s7694_s22, 4  ;;  %s138_s0 = sshll.u32 %s7695_s28, 4  ;;  %s117_s2 = int_to_ptr.vmem [resolvable:$true] %s116_s2  ;;  %s139_s0 = int_to_ptr.vmem [resolvable:$true] %s138_s0 }
  0x46   :  { %s7363_s27 = scalar_lea.hbm %s8695_s7, 64 }
  0x47   :  { %p7364_p10 = scmp.ne.s32.totalorder %s8695_s7, %s7363_s27  ;;  %p7367_p11 = scmp.lt.u32.totalorder %s7363_s27, %s8695_s7 }
  0x49   :  { %p7369_p12 = pnand %p7367_p11, %p7364_p10 }
  0x4b   :  { %7372 = shalt.err (!%p7369_p12)
}
  0x4c   :  { %s7373_s5 = scalar_lea.vmem %s117_s2, 64  ;;  %p7378_p0 = scmp.lt.s32.totalorder %s117_s2, %s117_s2 }
  0x4d   :  { %p7374_p13 = scmp.ne.s32.totalorder %s117_s2, %s7373_s5  ;;  %p7379_p1 = scmp.lt.s32.totalorder %s7373_s5, %s7373_s5 }
  0x4f   :  { %p7380_p2 = por %p7379_p1, %p7378_p0 }
  0x51   :  { %p7381_p3 = pnand %p7380_p2, %p7374_p13 }
  0x53   :  { %7384 = shalt.err (!%p7381_p3)
}
  0x54   :  { %119 = dma.hbm_to_vmem [thread:$0]  %s8695_s7, 64, %s117_s2, [#allocation15]  }
  0x55   :  { %s7385_s29 = scalar_lea.hbm %s8697_s9, 32 }
  0x56   :  { %p7386_p4 = scmp.ne.s32.totalorder %s8697_s9, %s7385_s29  ;;  %p7389_p5 = scmp.lt.u32.totalorder %s7385_s29, %s8697_s9 }
  0x58   :  { %p7391_p6 = pnand %p7389_p5, %p7386_p4 }
  0x5a   :  { %7394 = shalt.err (!%p7391_p6)
}
  0x5b   :  { %s7395_s27 = scalar_lea.vmem %s139_s0, 32  ;;  %p7400_p8 = scmp.lt.s32.totalorder %s139_s0, %s139_s0 }
  0x5c   :  { %p7396_p7 = scmp.ne.s32.totalorder %s139_s0, %s7395_s27  ;;  %p7401_p9 = scmp.lt.s32.totalorder %s7395_s27, %s7395_s27 }
  0x5e   :  { %p7402_p10 = por %p7401_p9, %p7400_p8 }
  0x60   :  { %p7403_p11 = pnand %p7402_p10, %p7396_p7 }
  0x62   :  { %7406 = shalt.err (!%p7403_p11)
}
  0x63   :  { %141 = dma.hbm_to_vmem [thread:$0]  %s8697_s9, 32, %s139_s0, [#allocation18]  }
  0x64   :  { %s7696_s30 = smov [#allocation20]   ;;  %s7697_s18 = smov [#allocation23]  }
  0x65   :  { %s158_s16 = sshll.u32 %s7696_s30, 4  ;;  %s180_s1 = sshll.u32 %s7697_s18, 4  ;;  %s159_s16 = int_to_ptr.vmem [resolvable:$true] %s158_s16  ;;  %s181_s1 = int_to_ptr.vmem [resolvable:$true] %s180_s1 }
  0x66   :  { %s7407_s20 = scalar_lea.hbm %s8699_s11, 32 }
  0x67   :  { %p7408_p12 = scmp.ne.s32.totalorder %s8699_s11, %s7407_s20  ;;  %p7411_p13 = scmp.lt.u32.totalorder %s7407_s20, %s8699_s11 }
  0x69   :  { %p7413_p0 = pnand %p7411_p13, %p7408_p12 }
  0x6b   :  { %7416 = shalt.err (!%p7413_p0)
}
  0x6c   :  { %s7417_s9 = scalar_lea.vmem %s159_s16, 32  ;;  %p7422_p2 = scmp.lt.s32.totalorder %s159_s16, %s159_s16 }
  0x6d   :  { %p7418_p1 = scmp.ne.s32.totalorder %s159_s16, %s7417_s9  ;;  %p7423_p3 = scmp.lt.s32.totalorder %s7417_s9, %s7417_s9 }
  0x6f   :  { %p7424_p4 = por %p7423_p3, %p7422_p2 }
  0x71   :  { %p7425_p5 = pnand %p7424_p4, %p7418_p1 }
  0x73   :  { %7428 = shalt.err (!%p7425_p5)
}
  0x74   :  { %161 = dma.hbm_to_vmem [thread:$0]  %s8699_s11, 32, %s159_s16, [#allocation21]  }
  0x75   :  { %s7429_s27 = scalar_lea.hbm %s8701_s13, 16 }
  0x76   :  { %p7430_p6 = scmp.ne.s32.totalorder %s8701_s13, %s7429_s27  ;;  %p7433_p7 = scmp.lt.u32.totalorder %s7429_s27, %s8701_s13 }
  0x78   :  { %p7435_p8 = pnand %p7433_p7, %p7430_p6 }
  0x7a   :  { %7438 = shalt.err (!%p7435_p8)
}
  0x7b   :  { %s7439_s5 = scalar_lea.vmem %s181_s1, 16  ;;  %s7443_s19 = scalar_lea.vmem %s181_s1, 32 }
  0x7c   :  { %p7440_p9 = scmp.ne.s32.totalorder %s181_s1, %s7439_s5  ;;  %p7444_p10 = scmp.lt.s32.totalorder %s181_s1, %s181_s1 }
  0x7d   :  { %p7445_p11 = scmp.lt.s32.totalorder %s7443_s19, %s7439_s5 }
  0x7f   :  { %p7446_p12 = por %p7445_p11, %p7444_p10 }
  0x81   :  { %p7447_p13 = pnand %p7446_p12, %p7440_p9 }
  0x83   :  { %7450 = shalt.err (!%p7447_p13)
}
  0x84   :  { %183 = dma.hbm_to_vmem [thread:$0]  %s8701_s13, 16, %s181_s1, [#allocation24]  }
  0x85   :  { %s7698_s20 = smov [#allocation26]   ;;  %s7699_s3 = smov [#allocation3]  }
  0x86   :  { %s200_s21 = sshll.u32 %s7698_s20, 4  ;;  %s37_s29 = sshll.u32 %s7699_s3, 4  ;;  %s201_s21 = int_to_ptr.vmem [resolvable:$true] %s200_s21  ;;  %s38_s29 = int_to_ptr.vmem [resolvable:$true] %s37_s29 }
  0x87   :  { %s7451_s0 = scalar_lea.hbm %s8703_s15, 16 }
  0x88   :  { %p7452_p0 = scmp.ne.s32.totalorder %s8703_s15, %s7451_s0  ;;  %p7455_p1 = scmp.lt.u32.totalorder %s7451_s0, %s8703_s15 }
  0x8a   :  { %p7457_p2 = pnand %p7455_p1, %p7452_p0 }
  0x8c   :  { %7460 = shalt.err (!%p7457_p2)
}
  0x8d   :  { %s7461_s13 = scalar_lea.vmem %s201_s21, 16  ;;  %s7465_s1 = scalar_lea.vmem %s201_s21, 32 }
  0x8e   :  { %p7462_p3 = scmp.ne.s32.totalorder %s201_s21, %s7461_s13  ;;  %p7466_p4 = scmp.lt.s32.totalorder %s201_s21, %s201_s21 }
  0x8f   :  { %p7467_p5 = scmp.lt.s32.totalorder %s7465_s1, %s7461_s13 }
  0x91   :  { %p7468_p6 = por %p7467_p5, %p7466_p4 }
  0x93   :  { %p7469_p7 = pnand %p7468_p6, %p7462_p3 }
  0x95   :  { %7472 = shalt.err (!%p7469_p7)
}
  0x96   :  { %203 = dma.hbm_to_vmem [thread:$0]  %s8703_s15, 16, %s201_s21, [#allocation27]  }
  0x97   :  { %s8730_s5 = sld [smem:[#allocation44_spill]] }
  0x9d   :  { %s7473_s19 = scalar_lea.hbm %s8730_s5, 1280 }
  0x9e   :  { %p7474_p8 = scmp.ne.s32.totalorder %s8730_s5, %s7473_s19  ;;  %p7477_p9 = scmp.lt.u32.totalorder %s7473_s19, %s8730_s5 }
  0xa0   :  { %p7479_p10 = pnand %p7477_p9, %p7474_p8 }
  0xa2   :  { %7482 = shalt.err (!%p7479_p10)
}
  0xa3   :  { %s7483_s22 = scalar_lea.vmem %s38_s29, 1280  ;;  %p7488_p12 = scmp.lt.s32.totalorder %s38_s29, %s38_s29 }
  0xa4   :  { %p7484_p11 = scmp.ne.s32.totalorder %s38_s29, %s7483_s22  ;;  %p7489_p13 = scmp.lt.s32.totalorder %s7483_s22, %s7483_s22 }
  0xa6   :  { %p7490_p0 = por %p7489_p13, %p7488_p12 }
  0xa8   :  { %p7491_p1 = pnand %p7490_p0, %p7484_p11 }
  0xaa   :  { %7494 = shalt.err (!%p7491_p1)
}
  0xab   :  { %s7700_s15 = smov 128   ;;  %s7701_s21 = smov 8  }
  0xac   :  { %43 = dma.hbm_to_vmem [thread:$0]  %s8730_s5, 1280, %s38_s29, [#allocation4], %s7700_s15, %s7700_s15, %s7701_s21  }
  0xad   :  { %s7702_s28 = smov [#allocation7]   ;;  %s7703_s26 = smov [#allocation10]  }
  0xae   :  { %s61_s25 = sshll.u32 %s7702_s28, 4  ;;  %s83_s27 = sshll.u32 %s7703_s26, 4  ;;  %s62_s25 = int_to_ptr.vmem [resolvable:$true] %s61_s25  ;;  %s84_s27 = int_to_ptr.vmem [resolvable:$true] %s83_s27 }
  0xaf   :  { %s8731_s7 = sld [smem:[#allocation46_spill]] }
  0xb5   :  { %s7495_s2 = scalar_lea.hbm %s8731_s7, 8192 }
  0xb6   :  { %p7496_p2 = scmp.ne.s32.totalorder %s8731_s7, %s7495_s2  ;;  %p7499_p3 = scmp.lt.u32.totalorder %s7495_s2, %s8731_s7 }
  0xb8   :  { %p7501_p4 = pnand %p7499_p3, %p7496_p2 }
  0xba   :  { %7504 = shalt.err (!%p7501_p4)
}
  0xbb   :  { %s7505_s29 = scalar_lea.vmem %s62_s25, 8192  ;;  %p7510_p6 = scmp.lt.s32.totalorder %s62_s25, %s62_s25 }
  0xbc   :  { %p7506_p5 = scmp.ne.s32.totalorder %s62_s25, %s7505_s29  ;;  %p7511_p7 = scmp.lt.s32.totalorder %s7505_s29, %s7505_s29 }
  0xbe   :  { %p7512_p8 = por %p7511_p7, %p7510_p6 }
  0xc0   :  { %p7513_p9 = pnand %p7512_p8, %p7506_p5 }
  0xc2   :  { %7516 = shalt.err (!%p7513_p9)
}
  0xc3   :  { %67 = dma.hbm_to_vmem [thread:$0]  %s8731_s7, 8192, %s62_s25, [#allocation6], %s7690_s23, %s7690_s23, %s7691_s24  }
  0xc4   :  { %s7517_s22 = scalar_lea.hbm %s8692_s4, 81920 }
  0xc5   :  { %p7518_p10 = scmp.ne.s32.totalorder %s8692_s4, %s7517_s22  ;;  %p7521_p11 = scmp.lt.u32.totalorder %s7517_s22, %s8692_s4 }
  0xc7   :  { %p7523_p12 = pnand %p7521_p11, %p7518_p10 }
  0xc9   :  { %7526 = shalt.err (!%p7523_p12)
}
  0xca   :  { %s7527_s13 = scalar_lea.vmem %s84_s27, 81920  ;;  %p7532_p0 = scmp.lt.s32.totalorder %s84_s27, %s84_s27 }
  0xcb   :  { %p7528_p13 = scmp.ne.s32.totalorder %s84_s27, %s7527_s13  ;;  %p7533_p1 = scmp.lt.s32.totalorder %s7527_s13, %s7527_s13 }
  0xcd   :  { %p7534_p2 = por %p7533_p1, %p7532_p0 }
  0xcf   :  { %p7535_p3 = pnand %p7534_p2, %p7528_p13 }
  0xd1   :  { %7538 = shalt.err (!%p7535_p3)
}
  0xd2   :  { %89 = dma.hbm_to_vmem [thread:$0]  %s8692_s4, 81920, %s84_s27, [#allocation9], %s7690_s23, %s7690_s23, %s7691_s24  }
  0xd3   :  { %s7704_s7 = smov [#allocation13]   ;;  %s7705_s30 = smov [#allocation16]  }
  0xd4   :  { %s106_s2 = sshll.u32 %s7704_s7, 4  ;;  %s125_s18 = sshll.u32 %s7705_s30, 4  ;;  %s107_s2 = int_to_ptr.vmem [resolvable:$true] %s106_s2  ;;  %s126_s18 = int_to_ptr.vmem [resolvable:$true] %s125_s18 }
  0xd5   :  { %s7539_s29 = scalar_lea.hbm %s8694_s6, 64 }
  0xd6   :  { %p7540_p4 = scmp.ne.s32.totalorder %s8694_s6, %s7539_s29  ;;  %p7543_p5 = scmp.lt.u32.totalorder %s7539_s29, %s8694_s6 }
  0xd8   :  { %p7545_p6 = pnand %p7543_p5, %p7540_p4 }
  0xda   :  { %7548 = shalt.err (!%p7545_p6)
}
  0xdb   :  { %s7549_s4 = scalar_lea.vmem %s107_s2, 64  ;;  %p7554_p8 = scmp.lt.s32.totalorder %s107_s2, %s107_s2 }
  0xdc   :  { %p7550_p7 = scmp.ne.s32.totalorder %s107_s2, %s7549_s4  ;;  %p7555_p9 = scmp.lt.s32.totalorder %s7549_s4, %s7549_s4 }
  0xde   :  { %p7556_p10 = por %p7555_p9, %p7554_p8 }
  0xe0   :  { %p7557_p11 = pnand %p7556_p10, %p7550_p7 }
  0xe2   :  { %7560 = shalt.err (!%p7557_p11)
}
  0xe3   :  { %109 = dma.hbm_to_vmem [thread:$0]  %s8694_s6, 64, %s107_s2, [#allocation12]  }
  0xe4   :  { %s7561_s9 = scalar_lea.hbm %s8696_s8, 16384 }
  0xe5   :  { %p7562_p12 = scmp.ne.s32.totalorder %s8696_s8, %s7561_s9  ;;  %p7565_p13 = scmp.lt.u32.totalorder %s7561_s9, %s8696_s8 }
  0xe7   :  { %p7567_p0 = pnand %p7565_p13, %p7562_p12 }
  0xe9   :  { %7570 = shalt.err (!%p7567_p0)
}
  0xea   :  { %s7571_s25 = scalar_lea.vmem %s126_s18, 16384  ;;  %p7576_p2 = scmp.lt.s32.totalorder %s126_s18, %s126_s18 }
  0xeb   :  { %p7572_p1 = scmp.ne.s32.totalorder %s126_s18, %s7571_s25  ;;  %p7577_p3 = scmp.lt.s32.totalorder %s7571_s25, %s7571_s25 }
  0xed   :  { %p7578_p4 = por %p7577_p3, %p7576_p2 }
  0xef   :  { %p7579_p5 = pnand %p7578_p4, %p7572_p1 }
  0xf1   :  { %7582 = shalt.err (!%p7579_p5)
}
  0xf2   :  { %s7706_s6 = smov 256   ;;  %s7707_s1 = smov 16  }
  0xf3   :  { %131 = dma.hbm_to_vmem [thread:$0]  %s8696_s8, 16384, %s126_s18, [#allocation15], %s7706_s6, %s7706_s6, %s7707_s1  }
  0xf4   :  { %s7708_s30 = smov [#allocation19]   ;;  %s7709_s11 = smov [#allocation22]  }
  0xf5   :  { %s148_s19 = sshll.u32 %s7708_s30, 4  ;;  %s167_s29 = sshll.u32 %s7709_s11, 4  ;;  %s149_s19 = int_to_ptr.vmem [resolvable:$true] %s148_s19  ;;  %s168_s29 = int_to_ptr.vmem [resolvable:$true] %s167_s29 }
  0xf6   :  { %s7583_s20 = scalar_lea.hbm %s8698_s10, 32 }
  0xf7   :  { %p7584_p6 = scmp.ne.s32.totalorder %s8698_s10, %s7583_s20  ;;  %p7587_p7 = scmp.lt.u32.totalorder %s7583_s20, %s8698_s10 }
  0xf9   :  { %p7589_p8 = pnand %p7587_p7, %p7584_p6 }
  0xfb   :  { %7592 = shalt.err (!%p7589_p8)
}
  0xfc   :  { %s7593_s8 = scalar_lea.vmem %s149_s19, 32  ;;  %p7598_p10 = scmp.lt.s32.totalorder %s149_s19, %s149_s19 }
  0xfd   :  { %p7594_p9 = scmp.ne.s32.totalorder %s149_s19, %s7593_s8  ;;  %p7599_p11 = scmp.lt.s32.totalorder %s7593_s8, %s7593_s8 }
  0xff   :  { %p7600_p12 = por %p7599_p11, %p7598_p10 }
 0x101   :  { %p7601_p13 = pnand %p7600_p12, %p7594_p9 }
 0x103   :  { %7604 = shalt.err (!%p7601_p13)
}
 0x104   :  { %151 = dma.hbm_to_vmem [thread:$0]  %s8698_s10, 32, %s149_s19, [#allocation18]  }
 0x105   :  { %s7605_s0 = scalar_lea.hbm %s8700_s12, 4096 }
 0x106   :  { %p7606_p0 = scmp.ne.s32.totalorder %s8700_s12, %s7605_s0  ;;  %p7609_p1 = scmp.lt.u32.totalorder %s7605_s0, %s8700_s12 }
 0x108   :  { %p7611_p2 = pnand %p7609_p1, %p7606_p0 }
 0x10a   :  { %7614 = shalt.err (!%p7611_p2)
}
 0x10b   :  { %s7615_s6 = scalar_lea.vmem %s168_s29, 4096  ;;  %p7620_p4 = scmp.lt.s32.totalorder %s168_s29, %s168_s29 }
 0x10c   :  { %p7616_p3 = scmp.ne.s32.totalorder %s168_s29, %s7615_s6  ;;  %p7621_p5 = scmp.lt.s32.totalorder %s7615_s6, %s7615_s6 }
 0x10e   :  { %p7622_p6 = por %p7621_p5, %p7620_p4 }
 0x110   :  { %p7623_p7 = pnand %p7622_p6, %p7616_p3 }
 0x112   :  { %7626 = shalt.err (!%p7623_p7)
}
 0x113   :  { %173 = dma.hbm_to_vmem [thread:$0]  %s8700_s12, 4096, %s168_s29, [#allocation21], %s7700_s15, %s7700_s15, %s7701_s21  }
 0x114   :  { %s7710_s7 = smov [#allocation25]   ;;  %s7711_s30 = smov [#allocation28]  }
 0x115   :  { %s190_s2 = sshll.u32 %s7710_s7, 4  ;;  %s212_s19 = sshll.u32 %s7711_s30, 4  ;;  %s191_s2 = int_to_ptr.vmem [resolvable:$true] %s190_s2  ;;  %s213_s19 = int_to_ptr.vmem [resolvable:$true] %s212_s19 }
 0x116   :  { %s7627_s16 = scalar_lea.hbm %s8702_s14, 16 }
 0x117   :  { %p7628_p8 = scmp.ne.s32.totalorder %s8702_s14, %s7627_s16  ;;  %p7631_p9 = scmp.lt.u32.totalorder %s7627_s16, %s8702_s14 }
 0x119   :  { %p7633_p10 = pnand %p7631_p9, %p7628_p8 }
 0x11b   :  { %7636 = shalt.err (!%p7633_p10)
}
 0x11c   :  { %s7637_s12 = scalar_lea.vmem %s191_s2, 16  ;;  %s7641_s15 = scalar_lea.vmem %s191_s2, 32 }
 0x11d   :  { %p7638_p11 = scmp.ne.s32.totalorder %s191_s2, %s7637_s12  ;;  %p7642_p12 = scmp.lt.s32.totalorder %s191_s2, %s191_s2 }
 0x11e   :  { %p7643_p13 = scmp.lt.s32.totalorder %s7641_s15, %s7637_s12 }
 0x120   :  { %p7644_p0 = por %p7643_p13, %p7642_p12 }
 0x122   :  { %p7645_p1 = pnand %p7644_p0, %p7638_p11 }
 0x124   :  { %7648 = shalt.err (!%p7645_p1)
}
 0x125   :  { %193 = dma.hbm_to_vmem [thread:$0]  %s8702_s14, 16, %s191_s2, [#allocation24]  }
 0x126   :  { %s7649_s18 = scalar_lea.hbm %s8705_s17, 16 }
 0x127   :  { %p7650_p2 = scmp.ne.s32.totalorder %s8705_s17, %s7649_s18  ;;  %p7653_p3 = scmp.lt.u32.totalorder %s7649_s18, %s8705_s17 }
 0x129   :  { %p7655_p4 = pnand %p7653_p3, %p7650_p2 }
 0x12b   :  { %7658 = shalt.err (!%p7655_p4)
}
 0x12c   :  { %s7659_s28 = scalar_lea.vmem %s213_s19, 16  ;;  %s7663_s26 = scalar_lea.vmem %s213_s19, 32 }
 0x12d   :  { %p7660_p5 = scmp.ne.s32.totalorder %s213_s19, %s7659_s28  ;;  %p7664_p6 = scmp.lt.s32.totalorder %s213_s19, %s213_s19 }
 0x12e   :  { %p7665_p7 = scmp.lt.s32.totalorder %s7663_s26, %s7659_s28 }
 0x130   :  { %p7666_p8 = por %p7665_p7, %p7664_p6 }
 0x132   :  { %p7667_p9 = pnand %p7666_p8, %p7660_p5 }
 0x134   :  { %7670 = shalt.err (!%p7667_p9)
}
 0x135   :  { %215 = dma.hbm_to_vmem [thread:$0]  %s8705_s17, 16, %s213_s19, [#allocation27]  }
 0x136   :  { %7671 = dma.done.wait [#allocation4], 1280  }
 0x137   :  { %7672 = vsyncadd [#allocation4], 4294966016 }
 0x138   :  { %7673 = dma.done.wait [#allocation6], 10240  }
 0x139   :  { %7674 = vsyncadd [#allocation6], 4294957056 }
 0x13a   :  { %7675 = dma.done.wait [#allocation9], 81984  }
 0x13b   :  { %7676 = vsyncadd [#allocation9], 4294885312 }
 0x13c   :  { %7677 = dma.done.wait [#allocation12], 128  }
 0x13d   :  { %7678 = vsyncadd [#allocation12], 4294967168 }
 0x13e   :  { %7679 = dma.done.wait [#allocation15], 16448  }
 0x13f   :  { %7680 = vsyncadd [#allocation15], 4294950848 }
 0x140   :  { %7681 = dma.done.wait [#allocation18], 64  }
 0x141   :  { %7682 = vsyncadd [#allocation18], 4294967232 }
 0x142   :  { %7683 = dma.done.wait [#allocation21], 4128  }
 0x143   :  { %7684 = vsyncadd [#allocation21], 4294963168 }
 0x144   :  { %7685 = dma.done.wait [#allocation24], 32  }
 0x145   :  { %7686 = vsyncadd [#allocation24], 4294967264 }
 0x146   :  { %7687 = dma.done.wait [#allocation27], 32  }
 0x147   :  { %7688 = vsyncadd [#allocation27], 4294967264  ;;  %v8711_v0 = vmov 0.0   ;;  %v280_v1 = vld [vmem:[#allocation5 + $0x18] sm:$0xff]  ;;  %v279_v3 = vld [vmem:[#allocation5 + $0x10] sm:$0xff]  ;;  %vm315_vm0 = vcmask 261120  }
 0x148   :  { %535 = vmatprep.mubr.f32.mxu1 %v8711_v0  ;;  %410 = vmatprep.mubr.f32.mxu0 %v8711_v0  ;;  %v284_v2 = vld [vmem:[#allocation5 + $0x38] sm:$0xff]  ;;  %v283_v5 = vld [vmem:[#allocation5 + $0x30] sm:$0xff]  ;;  %v644_v12 = vld [vmem:[#allocation7 + $0x8] sm:$0xff]  ;;  %s8745_s6 = sld [smem:[#allocation47_spill]]  ;;  %vm7714_vm1 = vmmov 0   ;;  %vm5318_vm2 = vcmask 31744  }
 0x149   :  { %v5491_v4 = vpack.c.bf16 %v284_v2, %v280_v1  ;;  %v288_v6 = vld [vmem:[#allocation5 + $0x58] sm:$0xff]  ;;  %v5493_v8 = vpack.c.bf16 %v283_v5, %v279_v3  ;;  %v287_v10 = vld [vmem:[#allocation5 + $0x50] sm:$0xff]  ;;  %v648_v13 = vld [vmem:[#allocation7 + $0x28] sm:$0xff]  ;;  %s8746_s1 = sld [smem:[#allocation48_spill]] }
 0x14a   :  { %v292_v7 = vld [vmem:[#allocation5 + $0x78] sm:$0xff]  ;;  %v291_v11 = vld [vmem:[#allocation5 + $0x70] sm:$0xff]  ;;  %v8031_v15 = vpack.c.bf16 %v648_v13, %v644_v12  ;;  %v643_v16 = vld [vmem:[#allocation7] sm:$0xff] }
 0x14b   :  { %v5495_v9 = vpack.c.bf16 %v292_v7, %v288_v6  ;;  %5492 = vmatprep.subr.bf16.mxu1 %v5491_v4  ;;  %v5497_v14 = vpack.c.bf16 %v291_v11, %v287_v10  ;;  %v647_v17 = vld [vmem:[#allocation7 + $0x20] sm:$0xff]  ;;  %v652_v18 = vld [vmem:[#allocation7 + $0x48] sm:$0xff]  ;;  %v8033_v20 = vld [vmem:[#allocation3] sm:$0xff] }
 0x14c   :  { %5494 = vmatpush1.bf16.msra.mxu1 %v5493_v8  ;;  %v656_v19 = vld [vmem:[#allocation7 + $0x68] sm:$0xff]  ;;  %v8035_v21 = vpack.c.bf16 %v647_v17, %v643_v16  ;;  %v651_v23 = vld [vmem:[#allocation7 + $0x40] sm:$0xff]  ;;  %v8044_v27 = vld [vmem:[#allocation3 + $0x8] sm:$0xff] }
 0x14d   :  { %5496 = vmatprep.subr.bf16.mxu1 %v5495_v9  ;;  %v8038_v22 = vpack.c.bf16 %v656_v19, %v652_v18  ;;  %v655_v24 = vld [vmem:[#allocation7 + $0x60] sm:$0xff]  ;;  %v660_v25 = vld [vmem:[#allocation7 + $0x88] sm:$0xff]  ;;  %v271_v60 = vld [vmem:[#allocation3 + $0x20] sm:$0xff] }
 0x14e   :  { %v664_v26 = vld [vmem:[#allocation7 + $0xa8] sm:$0xff]  ;;  %v8046_v28 = vpack.c.bf16 %v655_v24, %v651_v23  ;;  %v659_v29 = vld [vmem:[#allocation7 + $0x80] sm:$0xff]  ;;  %v272_v4 = vld [vmem:[#allocation3 + $0x28] sm:$0xff] }
 0x14f   :  { %v8049_v30 = vpack.c.bf16 %v664_v26, %v660_v25  ;;  %v663_v31 = vld [vmem:[#allocation7 + $0xa0] sm:$0xff]  ;;  %v278_v32 = vld [vmem:[#allocation5 + $0x8] sm:$0xff]  ;;  %v646_v17 = vld [vmem:[#allocation7 + $0x18] sm:$0xff] }
 0x150   :  { %5498 = vmatpush1.bf16.msra.mxu1 %v5497_v14  ;;  %v282_v33 = vld [vmem:[#allocation5 + $0x28] sm:$0xff]  ;;  %v277_v37 = vld [vmem:[#allocation5] sm:$0xff]  ;;  %v8057_v40 = vpack.c.bf16 %v663_v31, %v659_v29  ;;  %v650_v18 = vld [vmem:[#allocation7 + $0x38] sm:$0xff] }
 0x151   :  { %5500 = vmatprep.subr.bf16.mxu1 %v8031_v15  ;;  %v668_v34 = vld [vmem:[#allocation7 + $0xc8] sm:$0xff]  ;;  %v5483_v36 = vpack.c.bf16 %v282_v33, %v278_v32  ;;  %v8053_v38 = vld [vmem:[#allocation3 + $0x10] sm:$0xff]  ;;  %v8117_v23 = vpack.c.bf16 %v650_v18, %v646_v17  ;;  %v275_v24 = vld [vmem:[#allocation3 + $0x40] sm:$0xff] }
 0x152   :  { %v672_v35 = vld [vmem:[#allocation7 + $0xe8] sm:$0xff]  ;;  %v281_v39 = vld [vmem:[#allocation5 + $0x20] sm:$0xff]  ;;  %v276_v25 = vld [vmem:[#allocation3 + $0x48] sm:$0xff] }
 0x153   :  { %5352 = vmatmul.mubr.msk.f32.vlgmr.msra.gmra.mrb[0].mxu1 %vm315_vm0, %v8033_v20  ;;  %v667_v41 = vld [vmem:[#allocation7 + $0xc0] sm:$0xff]  ;;  %v5485_v42 = vpack.c.bf16 %v281_v39, %v277_v37  ;;  %v286_v43 = vld [vmem:[#allocation5 + $0x48] sm:$0xff]  ;;  %v8060_v45 = vpack.c.bf16 %v672_v35, %v668_v34  ;;  %5484 = vmatprep.subr.bf16.mxu0 %v5483_v36  ;;  %v645_v26 = vld [vmem:[#allocation7 + $0x10] sm:$0xff] }
 0x154   :  { %5502 = vmatpush1.bf16.msra.mxu1 %v8035_v21  ;;  %541 = vmatprep.mubr.f32.mxu1 %v8711_v0  ;;  %v290_v44 = vld [vmem:[#allocation5 + $0x68] sm:$0xff]  ;;  %v671_v46 = vld [vmem:[#allocation7 + $0xe0] sm:$0xff]  ;;  %v654_v29 = vld [vmem:[#allocation7 + $0x58] sm:$0xff] }
 0x155   :  { %5504 = vmatprep.subr.bf16.mxu1 %v8038_v22  ;;  %v5487_v47 = vpack.c.bf16 %v290_v44, %v286_v43  ;;  %v285_v48 = vld [vmem:[#allocation5 + $0x40] sm:$0xff]  ;;  %v676_v50 = vld [vmem:[#allocation7 + $0x108] sm:$0xff]  ;;  %5486 = vmatpush1.bf16.msra.mxu0 %v5485_v42  ;;  %v8066_v54 = vpack.c.bf16 %v671_v46, %v667_v41  ;;  %v658_v31 = vld [vmem:[#allocation7 + $0x78] sm:$0xff] }
 0x156   :  { %v289_v49 = vld [vmem:[#allocation5 + $0x60] sm:$0xff]  ;;  %v680_v51 = vld [vmem:[#allocation7 + $0x128] sm:$0xff]  ;;  %v8141_v33 = vpack.c.bf16 %v658_v31, %v654_v29  ;;  %v653_v34 = vld [vmem:[#allocation7 + $0x50] sm:$0xff] }
 0x157   :  { %5353 = vmatmul.mubr.msk.f32.gmra.mrb[2].mxu1 %vm315_vm0, %v8044_v27  ;;  %v5489_v52 = vpack.c.bf16 %v289_v49, %v285_v48  ;;  %5488 = vmatprep.subr.bf16.mxu0 %v5487_v47  ;;  %v270_v53 = vld [vmem:[#allocation3 + $0x18] sm:$0xff]  ;;  %v8069_v55 = vpack.c.bf16 %v680_v51, %v676_v50  ;;  %v675_v56 = vld [vmem:[#allocation7 + $0x100] sm:$0xff]  ;;  %v657_v35 = vld [vmem:[#allocation7 + $0x70] sm:$0xff] }
 0x158   :  { %5506 = vmatpush1.bf16.msra.mxu1 %v8046_v28  ;;  %547 = vmatprep.mubr.f32.mxu1 %v8711_v0  ;;  %v679_v57 = vld [vmem:[#allocation7 + $0x120] sm:$0xff]  ;;  %v684_v58 = vld [vmem:[#allocation7 + $0x148] sm:$0xff]  ;;  %v662_v36 = vld [vmem:[#allocation7 + $0x98] sm:$0xff] }
 0x159   :  { %5508 = vmatprep.subr.bf16.mxu1 %v8049_v30  ;;  %v688_v59 = vld [vmem:[#allocation7 + $0x168] sm:$0xff]  ;;  %5490 = vmatpush1.bf16.msra.mxu0 %v5489_v52  ;;  %v8075_v61 = vpack.c.bf16 %v679_v57, %v675_v56  ;;  %v683_v63 = vld [vmem:[#allocation7 + $0x140] sm:$0xff]  ;;  %v666_v37 = vld [vmem:[#allocation7 + $0xb8] sm:$0xff] }
 0x15a   :  { %5564 = vmatprep.subr.bf16.mxu0 %v8031_v15  ;;  %v8078_v62 = vpack.c.bf16 %v688_v59, %v684_v58  ;;  %v687_v1 = vld [vmem:[#allocation7 + $0x160] sm:$0xff]  ;;  %v692_v2 = vld [vmem:[#allocation7 + $0x188] sm:$0xff]  ;;  %v8153_v39 = vpack.c.bf16 %v666_v37, %v662_v36  ;;  %v661_v41 = vld [vmem:[#allocation7 + $0x90] sm:$0xff] }
 0x15b   :  { %5354 = vmatmul.mubr.msk.f32.gmra.mrb[4].mxu1 %vm315_vm0, %v8053_v38  ;;  %v696_v3 = vld [vmem:[#allocation7 + $0x1a8] sm:$0xff]  ;;  %v8088_v5 = vpack.c.bf16 %v687_v1, %v683_v63  ;;  %v691_v7 = vld [vmem:[#allocation7 + $0x180] sm:$0xff]  ;;  %v665_v42 = vld [vmem:[#allocation7 + $0xb0] sm:$0xff] }
 0x15c   :  { %553 = vmatprep.mubr.f32.mxu1 %v8711_v0  ;;  %5510 = vmatpush1.bf16.msra.mxu1 %v8057_v40  ;;  %v8091_v6 = vpack.c.bf16 %v696_v3, %v692_v2  ;;  %v695_v8 = vld [vmem:[#allocation7 + $0x1a0] sm:$0xff]  ;;  %v700_v9 = vld [vmem:[#allocation7 + $0x1c8] sm:$0xff]  ;;  %v670_v43 = vld [vmem:[#allocation7 + $0xd8] sm:$0xff]  ;;  %v8159_v46 = vpack.c.bf16 %v665_v42, %v661_v41 }
 0x15d   :  { %5512 = vmatprep.subr.bf16.mxu1 %v8060_v45  ;;  %5342 = vmatmul.mubr.msk.f32.vlgmr.msra.gmra.mrb[0].mxu0 %vm315_vm0, %v8033_v20  ;;  %v704_v10 = vld [vmem:[#allocation7 + $0x1e8] sm:$0xff]  ;;  %v273_v11 = vld [vmem:[#allocation3 + $0x30] sm:$0xff]  ;;  %v8101_v12 = vpack.c.bf16 %v695_v8, %v691_v7  ;;  %v674_v44 = vld [vmem:[#allocation7 + $0xf8] sm:$0xff] }
 0x15e   :  { %5566 = vmatpush1.bf16.msra.mxu0 %v8035_v21  ;;  %416 = vmatprep.mubr.f32.mxu0 %v8711_v0  ;;  %v8104_v13 = vpack.c.bf16 %v704_v10, %v700_v9  ;;  %v699_v14 = vld [vmem:[#allocation7 + $0x1c0] sm:$0xff]  ;;  %v274_v19 = vld [vmem:[#allocation3 + $0x38] sm:$0xff]  ;;  %v8162_v47 = vpack.c.bf16 %v674_v44, %v670_v43  ;;  %v669_v48 = vld [vmem:[#allocation7 + $0xd0] sm:$0xff] }
 0x15f   :  { %5355 = vmatmul.mubr.msk.f32.gmra.mrb[6].mxu1 %vm315_vm0, %v270_v53  ;;  %5568 = vmatprep.subr.bf16.mxu0 %v8038_v22  ;;  %v703_v16 = vld [vmem:[#allocation7 + $0x1e0] sm:$0xff]  ;;  %v673_v49 = vld [vmem:[#allocation7 + $0xf0] sm:$0xff]  ;;  %v678_v50 = vld [vmem:[#allocation7 + $0x118] sm:$0xff] }
 0x160   :  { %559 = vmatprep.mubr.f32.mxu1 %v8711_v0  ;;  %5514 = vmatpush1.bf16.msra.mxu1 %v8066_v54  ;;  %v8114_v20 = vpack.c.bf16 %v703_v16, %v699_v14  ;;  %v682_v51 = vld [vmem:[#allocation7 + $0x138] sm:$0xff]  ;;  %v8167_v52 = vpack.c.bf16 %v673_v49, %v669_v48  ;;  %v677_v56 = vld [vmem:[#allocation7 + $0x110] sm:$0xff] }
 0x161   :  { %5516 = vmatprep.subr.bf16.mxu1 %v8069_v55  ;;  %5343 = vmatmul.mubr.msk.f32.gmra.mrb[2].mxu0 %vm315_vm0, %v8044_v27  ;;  %v649_v27 = vld [vmem:[#allocation7 + $0x30] sm:$0xff]  ;;  %v686_v58 = vld [vmem:[#allocation7 + $0x158] sm:$0xff] }
 0x162   :  { %5570 = vmatpush1.bf16.msra.mxu0 %v8046_v28  ;;  %422 = vmatprep.mubr.f32.mxu0 %v8711_v0  ;;  %v8139_v32 = vpack.c.bf16 %v649_v27, %v645_v26  ;;  %v681_v57 = vld [vmem:[#allocation7 + $0x130] sm:$0xff]  ;;  %v690_v59 = vld [vmem:[#allocation7 + $0x178] sm:$0xff]  ;;  %v295_v27 = vlaneseq }
 0x163   :  { %5356 = vmatmul.mubr.msk.f32.gmra.mrb[8].mxu1 %vm315_vm0, %v271_v60  ;;  %5572 = vmatprep.subr.bf16.mxu0 %v8049_v30  ;;  %v8178_v63 = vpack.c.bf16 %v690_v59, %v686_v58  ;;  %v685_v1 = vld [vmem:[#allocation7 + $0x150] sm:$0xff]  ;;  %v694_v3 = vld [vmem:[#allocation7 + $0x198] sm:$0xff] }
 0x164   :  { %565 = vmatprep.mubr.f32.mxu1 %v8711_v0  ;;  %5518 = vmatpush1.bf16.msra.mxu1 %v8075_v61  ;;  %v689_v2 = vld [vmem:[#allocation7 + $0x170] sm:$0xff]  ;;  %v706_v14 = vld [vmem:[#allocation7 + $0x1f8] sm:$0xff]  ;;  %v296_v29 = vshrl.u32 %v295_v27, 7 }
 0x165   :  { %5520 = vmatprep.subr.bf16.mxu1 %v8078_v62  ;;  %5344 = vmatmul.mubr.msk.f32.gmra.mrb[4].mxu0 %vm315_vm0, %v8053_v38  ;;  %v8149_v38 = vpack.c.bf16 %v657_v35, %v653_v34  ;;  %v8181_v7 = vpack.c.bf16 %v689_v2, %v685_v1  ;;  %v693_v9 = vld [vmem:[#allocation7 + $0x190] sm:$0xff]  ;;  %v293_v34 = vld [vmem:[#allocation8] sm:$0xf] }
 0x166   :  { %428 = vmatprep.mubr.f32.mxu0 %v8711_v0  ;;  %5574 = vmatpush1.bf16.msra.mxu0 %v8057_v40  ;;  %v697_v10 = vld [vmem:[#allocation7 + $0x1b0] sm:$0xff]  ;;  %v8215_v31 = vsub.s32 0, %v296_v29  ;;  %v8217_v35 = vsub.s32 1, %v296_v29 }
 0x167   :  { %5357 = vmatmul.mubr.msk.f32.gmra.mrb[10].mxu1 %vm315_vm0, %v272_v4  ;;  %5576 = vmatprep.subr.bf16.mxu0 %v8060_v45  ;;  %v8187_v16 = vpack.c.bf16 %v697_v10, %v693_v9  ;;  %v701_v18 = vld [vmem:[#allocation7 + $0x1d0] sm:$0xff] }
 0x168   :  { %571 = vmatprep.mubr.f32.mxu1 %v8711_v0  ;;  %5522 = vmatpush1.bf16.msra.mxu1 %v8088_v5  ;;  %8732 = vst [vmem:[#allocation38_spill] sm:$0xff] %v8215_v31  ;;  %8733 = vst [vmem:[#allocation39_spill] sm:$0xff] %v8217_v35  ;;  %v8220_v36 = vrot.slane %v293_v34, %v8215_v31  ;;  %v8223_v37 = vrot.slane %v293_v34, %v8217_v35  ;;  %v904_v35 = vld [vmem:[#allocation10 + $0xd8] sm:$0xff]  ;;  %v8738_v31 = vmov 0.0  }
 0x169   :  { %5524 = vmatprep.subr.bf16.mxu1 %v8091_v6  ;;  %5345 = vmatmul.mubr.msk.f32.gmra.mrb[6].mxu0 %vm315_vm0, %v270_v53  ;;  %v8170_v53 = vpack.c.bf16 %v682_v51, %v678_v50 }
 0x16a   :  { %434 = vmatprep.mubr.f32.mxu0 %v8711_v0  ;;  %5578 = vmatpush1.bf16.msra.mxu0 %v8066_v54 }
 0x16b   :  { %5358 = vmatmul.mubr.msk.f32.gmra.mrb[12].mxu1 %vm315_vm0, %v273_v11  ;;  %5580 = vmatprep.subr.bf16.mxu0 %v8069_v55 }
 0x16c   :  { %577 = vmatprep.mubr.f32.mxu1 %v8711_v0  ;;  %5526 = vmatpush1.bf16.msra.mxu1 %v8101_v12 }
 0x16d   :  { %5528 = vmatprep.subr.bf16.mxu1 %v8104_v13  ;;  %5346 = vmatmul.mubr.msk.f32.gmra.mrb[8].mxu0 %vm315_vm0, %v271_v60  ;;  %v8175_v60 = vpack.c.bf16 %v681_v57, %v677_v56  ;;  %v8227_v56 = vsub.s32 2, %v296_v29  ;;  %v8229_v57 = vsub.s32 3, %v296_v29 }
 0x16e   :  { %440 = vmatprep.mubr.f32.mxu0 %v8711_v0  ;;  %5582 = vmatpush1.bf16.msra.mxu0 %v8075_v61 }
 0x16f   :  { %5359 = vmatmul.mubr.msk.f32.gmra.mrb[14].mxu1 %vm315_vm0, %v274_v19  ;;  %5584 = vmatprep.subr.bf16.mxu0 %v8078_v62  ;;  %8734 = vst [vmem:[#allocation40_spill] sm:$0xff] %v8227_v56  ;;  %8735 = vst [vmem:[#allocation41_spill] sm:$0xff] %v8229_v57  ;;  %v8232_v1 = vrot.slane %v293_v34, %v8227_v56  ;;  %v908_v56 = vld [vmem:[#allocation10 + $0xf8] sm:$0xff] }
 0x170   :  { %583 = vmatprep.mubr.f32.mxu1 %v8711_v0  ;;  %5530 = vmatpush1.bf16.msra.mxu1 %v8114_v20 }
 0x171   :  { %5532 = vmatprep.subr.bf16.mxu1 %v8117_v23  ;;  %5347 = vmatmul.mubr.msk.f32.gmra.mrb[10].mxu0 %vm315_vm0, %v272_v4  ;;  %v698_v4 = vld [vmem:[#allocation7 + $0x1b8] sm:$0xff] }
 0x172   :  { %446 = vmatprep.mubr.f32.mxu0 %v8711_v0  ;;  %5586 = vmatpush1.bf16.msra.mxu0 %v8088_v5  ;;  %v8184_v8 = vpack.c.bf16 %v698_v4, %v694_v3  ;;  %v8235_v3 = vrot.slane %v293_v34, %v8229_v57  ;;  %v900_v57 = vld [vmem:[#allocation10 + $0xb8] sm:$0xff] }
 0x173   :  { %5360 = vmatmul.mubr.msk.f32.gmra.mrb[16].mxu1 %vm315_vm0, %v275_v24  ;;  %5588 = vmatprep.subr.bf16.mxu0 %v8091_v6 }
 0x174   :  { %589 = vmatprep.mubr.f32.mxu1 %v8711_v0  ;;  %8736 = vst [vmem:[#allocation42_spill] sm:$0xff] %v8235_v3 }
 0x175   :  { %5348 = vmatmul.mubr.msk.f32.gmra.mrb[12].mxu0 %vm315_vm0, %v273_v11  ;;  %v702_v11 = vld [vmem:[#allocation7 + $0x1d8] sm:$0xff] }
 0x176   :  { %452 = vmatprep.mubr.f32.mxu0 %v8711_v0  ;;  %5590 = vmatpush1.bf16.msra.mxu0 %v8101_v12  ;;  %v8190_v17 = vpack.c.bf16 %v706_v14, %v702_v11 }
 0x177   :  { %5361 = vmatmul.mubr.msk.f32.gmra.mrb[18].mxu1 %vm315_vm0, %v276_v25  ;;  %5592 = vmatprep.subr.bf16.mxu0 %v8104_v13 }
 0x178   :  { %771 = vmatprep.mubr.f32.mxu1 %v8711_v0 }
 0x179   :  { %5349 = vmatmul.mubr.msk.f32.gmra.mrb[14].mxu0 %vm315_vm0, %v274_v19  ;;  %v705_v19 = vld [vmem:[#allocation7 + $0x1f0] sm:$0xff] }
 0x17a   :  { %458 = vmatprep.mubr.f32.mxu0 %v8711_v0  ;;  %5594 = vmatpush1.bf16.msra.mxu0 %v8114_v20 }
 0x17b   :  { %772 = vmatmul.mubr.f32.vlgmr.msra.gmra.mrb[20].mxu1 %v8711_v0 }
 0x17c   :  { %5534 = vmatpush1.bf16.msra.mxu1 %v8139_v32  ;;  %842 = vmatprep.mubr.f32.mxu1 %v8711_v0 }
 0x17d   :  { %5536 = vmatprep.subr.bf16.mxu1 %v8141_v33  ;;  %5350 = vmatmul.mubr.msk.f32.gmra.mrb[16].mxu0 %vm315_vm0, %v275_v24  ;;  %v8193_v24 = vpack.c.bf16 %v705_v19, %v701_v18 }
 0x17e   :  { %464 = vmatprep.mubr.f32.mxu0 %v8711_v0 }
 0x180   :  { %5538 = vmatpush1.bf16.msra.mxu1 %v8149_v38 }
 0x181   :  { %5540 = vmatprep.subr.bf16.mxu1 %v8153_v39  ;;  %5351 = vmatmul.mubr.msk.f32.gmra.mrb[18].mxu0 %vm315_vm0, %v276_v25 }
 0x182   :  { %1012 = vmatprep.mubr.f32.mxu0 %v8711_v0 }
 0x184   :  { %5542 = vmatpush1.bf16.msra.mxu1 %v8159_v46 }
 0x185   :  { %5544 = vmatprep.subr.bf16.mxu1 %v8162_v47 }
 0x188   :  { %5546 = vmatpush1.bf16.msra.mxu1 %v8167_v52 }
 0x189   :  { %5548 = vmatprep.subr.bf16.mxu1 %v8170_v53 }
 0x18c   :  { %5550 = vmatpush1.bf16.msra.mxu1 %v8175_v60 }
 0x18d   :  { %5552 = vmatprep.subr.bf16.mxu1 %v8178_v63 }
 0x190   :  { %5554 = vmatpush1.bf16.msra.mxu1 %v8181_v7 }
 0x191   :  { %5556 = vmatprep.subr.bf16.mxu1 %v8184_v8 }
 0x194   :  { %5558 = vmatpush1.bf16.msra.mxu1 %v8187_v16 }
 0x195   :  { %5560 = vmatprep.subr.bf16.mxu1 %v8190_v17 }
 0x198   :  { %5562 = vmatpush1.bf16.msra.mxu1 %v8193_v24 }
 0x199   :  { %5596 = vmatprep.subr.bf16.mxu1 %v8117_v23 }
 0x19b   :  { %843 = vmatmul.mubr.f32.vlgmr.msra.gmra.mrb[0].mxu1 %v8711_v0 }
 0x19c   :  { %5598 = vmatpush1.bf16.msra.mxu1 %v8139_v32  ;;  %1083 = vmatprep.mubr.f32.mxu1 %v8711_v0 }
 0x19d   :  { %5600 = vmatprep.subr.bf16.mxu1 %v8141_v33 }
 0x1a0   :  { %5602 = vmatpush1.bf16.msra.mxu1 %v8149_v38 }
 0x1a1   :  { %5604 = vmatprep.subr.bf16.mxu1 %v8153_v39 }
 0x1a4   :  { %5606 = vmatpush1.bf16.msra.mxu1 %v8159_v46 }
 0x1a5   :  { %5608 = vmatprep.subr.bf16.mxu1 %v8162_v47 }
 0x1a8   :  { %5610 = vmatpush1.bf16.msra.mxu1 %v8167_v52 }
 0x1a9   :  { %5612 = vmatprep.subr.bf16.mxu1 %v8170_v53 }
 0x1ac   :  { %5614 = vmatpush1.bf16.msra.mxu1 %v8175_v60 }
 0x1ad   :  { %5616 = vmatprep.subr.bf16.mxu1 %v8178_v63 }
 0x1b0   :  { %5618 = vmatpush1.bf16.msra.mxu1 %v8181_v7 }
 0x1b1   :  { %5620 = vmatprep.subr.bf16.mxu1 %v8184_v8 }
 0x1b4   :  { %5622 = vmatpush1.bf16.msra.mxu1 %v8187_v16 }
 0x1b5   :  { %5624 = vmatprep.subr.bf16.mxu1 %v8190_v17 }
 0x1b8   :  { %5626 = vmatpush1.bf16.msra.mxu1 %v8193_v24 }
 0x230   :  { %v412_v25 = vpop.f32.mrb[0].mxu0 }
 0x231   :  { %v414_v26 = vpop.f32.mrb[1].mxu0  ;;  %v413_v41 = vadd.f32 %v412_v25, %v8220_v36 }
 0x232   :  { %v415_v42 = vadd.f32 %v414_v26, %v8223_v37 }
 0x24e   :  { %v773_v43 = vpop.f32.mrb[20].mxu1 }
 0x24f   :  { %v849_v44 = vadd.f32 %v773_v43, %v413_v41  ;;  %v775_v48 = vpop.f32.mrb[21].mxu1 }
 0x250   :  { %v850_v49 = vadd.f32 %v775_v48, %v415_v42 }
 0x251   :  { %v5362_v51 = vmul.f32 -1.442695, %v849_v44 }
 0x252   :  { %v5363_v50 = vmul.f32 -1.442695, %v850_v49  ;;  %v1120_v49 = vld [vmem:[#allocation10 + $0x208] sm:$0xff] }
 0x254   :  { %7109 = vpow2.f32 %v5363_v50  ;;  %v1124_v50 = vld [vmem:[#allocation10 + $0x228] sm:$0xff] }
 0x255   :  { %7111 = vpow2.f32 %v5362_v51  ;;  %v1122_v51 = vld [vmem:[#allocation10 + $0x218] sm:$0xff] }
 0x25e   :  { %v7110_v58 = vpop.eup %7109 }
 0x25f   :  { %v7112_v59 = vpop.eup %7111  ;;  %v863_v2 = vadd.f32 1.0, %v7110_v58  ;;  %v5627_v58 = vpack.c.bf16 %v1124_v50, %v1120_v49  ;;  %v1129_v49 = vld [vmem:[#allocation10 + $0x250] sm:$0xff] }
 0x260   :  { %v862_v4 = vadd.f32 1.0, %v7112_v59  ;;  %v1126_v59 = vld [vmem:[#allocation10 + $0x238] sm:$0xff]  ;;  %v1133_v50 = vld [vmem:[#allocation10 + $0x270] sm:$0xff] }
 0x261   :  { %7113 = vrcp.f32 %v863_v2  ;;  %v1119_v2 = vld [vmem:[#allocation10 + $0x200] sm:$0xff]  ;;  %5628 = vmatprep.subr.bf16.mxu0 %v5627_v58  ;;  %v1136_v58 = vld [vmem:[#allocation10 + $0x288] sm:$0xff] }
 0x262   :  { %7115 = vrcp.f32 %v862_v4  ;;  %v1123_v4 = vld [vmem:[#allocation10 + $0x220] sm:$0xff] }
 0x26b   :  { %v7114_v19 = vpop.eup %7113 }
 0x26c   :  { %v7116_v25 = vpop.eup %7115  ;;  %v872_v29 = vmul.f32 0.0, %v7114_v19  ;;  %v1128_v19 = vld [vmem:[#allocation10 + $0x248] sm:$0xff] }
 0x26e   :  { %v844_v9 = vpop.f32.mrb[0].mxu1 }
 0x26f   :  { %v6985_v10 = vadd.f32 %v844_v9, %v8232_v1  ;;  %v846_v11 = vpop.f32.mrb[1].mxu1  ;;  %v5659_v9 = vpack.c.bf16 %v1126_v59, %v1122_v51  ;;  %v5665_v51 = vpack.c.bf16 %v1133_v50, %v1129_v49  ;;  %v1140_v59 = vld [vmem:[#allocation10 + $0x2a8] sm:$0xff]  ;;  %v1147_v49 = vld [vmem:[#allocation10 + $0x2e0] sm:$0xff] }
 0x270   :  { %v6986_v14 = vadd.f32 %v846_v11, %v8235_v3  ;;  %v1121_v11 = vld [vmem:[#allocation10 + $0x210] sm:$0xff] }
 0x271   :  { %v5364_v18 = vmul.f32 -1.442695, %v6985_v10  ;;  %v5629_v10 = vpack.c.bf16 %v1123_v4, %v1119_v2  ;;  %5660 = vmatprep.subr.bf16.mxu1 %v5659_v9  ;;  %v1138_v2 = vld [vmem:[#allocation10 + $0x298] sm:$0xff]  ;;  %v5635_v4 = vpack.c.bf16 %v1140_v59, %v1136_v58  ;;  %v1145_v58 = vld [vmem:[#allocation10 + $0x2d0] sm:$0xff] }
 0x272   :  { %7117 = vtanh.f32 %v6986_v14  ;;  %v1125_v14 = vld [vmem:[#allocation10 + $0x230] sm:$0xff]  ;;  %v1142_v9 = vld [vmem:[#allocation10 + $0x2b8] sm:$0xff] }
 0x273   :  { %7119 = vpow2.f32 %v5364_v18  ;;  %v5661_v18 = vpack.c.bf16 %v1125_v14, %v1121_v11  ;;  %v1139_v11 = vld [vmem:[#allocation10 + $0x2a0] sm:$0xff]  ;;  %v5667_v14 = vpack.c.bf16 %v1142_v9, %v1138_v2  ;;  %v1149_v59 = vld [vmem:[#allocation10 + $0x2f0] sm:$0xff]  ;;  %v1156_v9 = vld [vmem:[#allocation10 + $0x328] sm:$0xff] }
 0x274   :  { %v5673_v2 = vpack.c.bf16 %v1149_v59, %v1145_v58  ;;  %v1163_v58 = vld [vmem:[#allocation10 + $0x360] sm:$0xff] }
 0x27c   :  { %v7118_v26 = vpop.eup %7117 }
 0x27d   :  { %v7120_v27 = vpop.eup %7119  ;;  %v873_v41 = vmul.f32 %v7118_v26, %v7116_v25  ;;  %v1132_v25 = vld [vmem:[#allocation10 + $0x268] sm:$0xff]  ;;  %v1130_v26 = vld [vmem:[#allocation10 + $0x258] sm:$0xff] }
 0x27e   :  { %v864_v34 = vadd.f32 1.0, %v7120_v27  ;;  %v5631_v27 = vpack.c.bf16 %v1132_v25, %v1128_v19  ;;  %v1137_v19 = vld [vmem:[#allocation10 + $0x290] sm:$0xff] }
 0x27f   :  { %v8239_v42 = vadd.f32 %v873_v41, %v872_v29  ;;  %v1134_v29 = vld [vmem:[#allocation10 + $0x278] sm:$0xff]  ;;  %v1127_v41 = vld [vmem:[#allocation10 + $0x240] sm:$0xff]  ;;  %v1141_v25 = vld [vmem:[#allocation10 + $0x2b0] sm:$0xff] }
 0x280   :  { %7121 = vrcp.f32 %v864_v34  ;;  %v1131_v34 = vld [vmem:[#allocation10 + $0x260] sm:$0xff] }
 0x281   :  { %7123 = vtanh.f32 %v8239_v42 }
 0x28a   :  { %v7122_v43 = vpop.eup %7121 }
 0x28b   :  { %v7124_v44 = vpop.eup %7123 }
 0x28c   :  { %v8242_v48 = vmul.f32 %v7124_v44, %v7122_v43  ;;  %v5663_v43 = vpack.c.bf16 %v1134_v29, %v1130_v26  ;;  %v5633_v44 = vpack.c.bf16 %v1131_v34, %v1127_v41  ;;  %v5669_v26 = vpack.c.bf16 %v1141_v25, %v1137_v19  ;;  %v1148_v29 = vld [vmem:[#allocation10 + $0x2e8] sm:$0xff]  ;;  %v1146_v41 = vld [vmem:[#allocation10 + $0x2d8] sm:$0xff]  ;;  %v1155_v19 = vld [vmem:[#allocation10 + $0x320] sm:$0xff] }
 0x28e   :  { %1013 = vmatmul.mubr.f32.vlgmr.msra.gmra.mrb[2].mxu0 %v8242_v48  ;;  %1084 = vmatmul.mubr.f32.vlgmr.msra.gmra.mrb[2].mxu1 %v8242_v48 }
 0x28f   :  { %1247 = vmatprep.mubr.f32.mxu0 %v8711_v0  ;;  %1318 = vmatprep.mubr.f32.mxu1 %v8711_v0  ;;  %v1181_v0 = vld [vmem:[#allocation10 + $0x3f0] sm:$0xff] }
 0x290   :  { %5630 = vmatpush1.bf16.msra.mxu0 %v5629_v10  ;;  %5662 = vmatpush1.bf16.msra.mxu1 %v5661_v18  ;;  %v1135_v10 = vld [vmem:[#allocation10 + $0x280] sm:$0xff] }
 0x291   :  { %5632 = vmatprep.subr.bf16.mxu0 %v5631_v27  ;;  %5664 = vmatprep.subr.bf16.mxu1 %v5663_v43  ;;  %v5637_v18 = vpack.c.bf16 %v1139_v11, %v1135_v10  ;;  %v1144_v27 = vld [vmem:[#allocation10 + $0x2c8] sm:$0xff]  ;;  %v1150_v43 = vld [vmem:[#allocation10 + $0x2f8] sm:$0xff] }
 0x292   :  { %v5639_v34 = vpack.c.bf16 %v1148_v29, %v1144_v27  ;;  %v5671_v50 = vpack.c.bf16 %v1150_v43, %v1146_v41  ;;  %v1154_v10 = vld [vmem:[#allocation10 + $0x318] sm:$0xff]  ;;  %v1153_v27 = vld [vmem:[#allocation10 + $0x310] sm:$0xff]  ;;  %v1164_v43 = vld [vmem:[#allocation10 + $0x368] sm:$0xff] }
 0x293   :  { %v1157_v29 = vld [vmem:[#allocation10 + $0x330] sm:$0xff] }
 0x294   :  { %5634 = vmatpush1.bf16.msra.mxu0 %v5633_v44  ;;  %5666 = vmatpush1.bf16.msra.mxu1 %v5665_v51  ;;  %v1143_v44 = vld [vmem:[#allocation10 + $0x2c0] sm:$0xff]  ;;  %v5677_v41 = vpack.c.bf16 %v1157_v29, %v1153_v27 }
 0x295   :  { %5636 = vmatprep.subr.bf16.mxu0 %v5635_v4  ;;  %5668 = vmatprep.subr.bf16.mxu1 %v5667_v14  ;;  %v5641_v51 = vpack.c.bf16 %v1147_v49, %v1143_v44  ;;  %v1152_v4 = vld [vmem:[#allocation10 + $0x308] sm:$0xff]  ;;  %v1158_v14 = vld [vmem:[#allocation10 + $0x338] sm:$0xff]  ;;  %v1171_v27 = vld [vmem:[#allocation10 + $0x3a0] sm:$0xff] }
 0x296   :  { %v5643_v11 = vpack.c.bf16 %v1156_v9, %v1152_v4  ;;  %v5675_v25 = vpack.c.bf16 %v1158_v14, %v1154_v10  ;;  %v1162_v44 = vld [vmem:[#allocation10 + $0x358] sm:$0xff]  ;;  %v1161_v4 = vld [vmem:[#allocation10 + $0x350] sm:$0xff]  ;;  %v1168_v14 = vld [vmem:[#allocation10 + $0x388] sm:$0xff] }
 0x297   :  { %v1165_v9 = vld [vmem:[#allocation10 + $0x370] sm:$0xff] }
 0x298   :  { %5638 = vmatpush1.bf16.msra.mxu0 %v5637_v18  ;;  %5670 = vmatpush1.bf16.msra.mxu1 %v5669_v26  ;;  %v1151_v18 = vld [vmem:[#allocation10 + $0x300] sm:$0xff]  ;;  %v5681_v10 = vpack.c.bf16 %v1165_v9, %v1161_v4 }
 0x299   :  { %5640 = vmatprep.subr.bf16.mxu0 %v5639_v34  ;;  %5672 = vmatprep.subr.bf16.mxu1 %v5671_v50  ;;  %v5645_v26 = vpack.c.bf16 %v1155_v19, %v1151_v18  ;;  %v1160_v34 = vld [vmem:[#allocation10 + $0x348] sm:$0xff]  ;;  %v1166_v50 = vld [vmem:[#allocation10 + $0x378] sm:$0xff] }
 0x29a   :  { %v5647_v49 = vpack.c.bf16 %v1164_v43, %v1160_v34  ;;  %v5679_v59 = vpack.c.bf16 %v1166_v50, %v1162_v44  ;;  %v1172_v18 = vld [vmem:[#allocation10 + $0x3a8] sm:$0xff]  ;;  %v1169_v34 = vld [vmem:[#allocation10 + $0x390] sm:$0xff] }
 0x29b   :  { %v5651_v19 = vpack.c.bf16 %v1172_v18, %v1168_v14  ;;  %v1173_v43 = vld [vmem:[#allocation10 + $0x3b0] sm:$0xff]  ;;  %v1176_v44 = vld [vmem:[#allocation10 + $0x3c8] sm:$0xff] }
 0x29c   :  { %5642 = vmatpush1.bf16.msra.mxu0 %v5641_v51  ;;  %5674 = vmatpush1.bf16.msra.mxu1 %v5673_v2  ;;  %v1159_v51 = vld [vmem:[#allocation10 + $0x340] sm:$0xff]  ;;  %v5685_v50 = vpack.c.bf16 %v1173_v43, %v1169_v34  ;;  %v1177_v14 = vld [vmem:[#allocation10 + $0x3d0] sm:$0xff] }
 0x29d   :  { %5644 = vmatprep.subr.bf16.mxu0 %v5643_v11  ;;  %5676 = vmatprep.subr.bf16.mxu1 %v5675_v25  ;;  %v5649_v2 = vpack.c.bf16 %v1163_v58, %v1159_v51  ;;  %v1170_v11 = vld [vmem:[#allocation10 + $0x398] sm:$0xff]  ;;  %v1180_v51 = vld [vmem:[#allocation10 + $0x3e8] sm:$0xff] }
 0x29e   :  { %v1174_v25 = vld [vmem:[#allocation10 + $0x3b8] sm:$0xff]  ;;  %v5655_v4 = vpack.c.bf16 %v1180_v51, %v1176_v44 }
 0x29f   :  { %v5683_v29 = vpack.c.bf16 %v1174_v25, %v1170_v11  ;;  %v1182_v58 = vld [vmem:[#allocation10 + $0x3f8] sm:$0xff]  ;;  %v882_v11 = vld [vmem:[#allocation10 + $0x28] sm:$0xff]  ;;  %v5689_v25 = vpack.c.bf16 %v1181_v0, %v1177_v14 }
 0x2a0   :  { %5646 = vmatpush1.bf16.msra.mxu0 %v5645_v26  ;;  %5678 = vmatpush1.bf16.msra.mxu1 %v5677_v41  ;;  %v1167_v26 = vld [vmem:[#allocation10 + $0x380] sm:$0xff] }
 0x2a1   :  { %5648 = vmatprep.subr.bf16.mxu0 %v5647_v49  ;;  %5680 = vmatprep.subr.bf16.mxu1 %v5679_v59  ;;  %v5653_v41 = vpack.c.bf16 %v1171_v27, %v1167_v26  ;;  %v1178_v49 = vld [vmem:[#allocation10 + $0x3d8] sm:$0xff]  ;;  %v1175_v59 = vld [vmem:[#allocation10 + $0x3c0] sm:$0xff] }
 0x2a2   :  { %v5687_v9 = vpack.c.bf16 %v1182_v58, %v1178_v49  ;;  %v884_v27 = vld [vmem:[#allocation10 + $0x38] sm:$0xff] }
 0x2a4   :  { %5650 = vmatpush1.bf16.msra.mxu0 %v5649_v2  ;;  %5682 = vmatpush1.bf16.msra.mxu1 %v5681_v10  ;;  %v1179_v2 = vld [vmem:[#allocation10 + $0x3e0] sm:$0xff]  ;;  %v878_v10 = vld [vmem:[#allocation10 + $0x8] sm:$0xff] }
 0x2a5   :  { %5652 = vmatprep.subr.bf16.mxu0 %v5651_v19  ;;  %5684 = vmatprep.subr.bf16.mxu1 %v5683_v29  ;;  %v5657_v18 = vpack.c.bf16 %v1179_v2, %v1175_v59  ;;  %v5691_v26 = vpack.c.bf16 %v882_v11, %v878_v10  ;;  %v880_v19 = vld [vmem:[#allocation10 + $0x18] sm:$0xff] }
 0x2a6   :  { %v5723_v34 = vpack.c.bf16 %v884_v27, %v880_v19 }
 0x2a8   :  { %5654 = vmatpush1.bf16.msra.mxu0 %v5653_v41  ;;  %5686 = vmatpush1.bf16.msra.mxu1 %v5685_v50 }
 0x2a9   :  { %5656 = vmatprep.subr.bf16.mxu0 %v5655_v4  ;;  %5688 = vmatprep.subr.bf16.mxu1 %v5687_v9 }
 0x2ac   :  { %5658 = vmatpush1.bf16.msra.mxu0 %v5657_v18  ;;  %5690 = vmatpush1.bf16.msra.mxu1 %v5689_v25 }
 0x2ad   :  { %5692 = vmatprep.subr.bf16.mxu0 %v5691_v26  ;;  %5724 = vmatprep.subr.bf16.mxu1 %v5723_v34 }
 0x361   :  { %v1014_v29 = vpop.f32.mrb[2].mxu0  ;;  %v1085_v43 = vpop.f32.mrb[2].mxu1 }
 0x362   :  { %v6967_v41 = vadd.f32 %v1014_v29, %v8220_v36  ;;  %v1016_v44 = vpop.f32.mrb[3].mxu0  ;;  %v1087_v51 = vpop.f32.mrb[3].mxu1  ;;  %v6987_v0 = vadd.f32 %v1085_v43, %v8232_v1  ;;  %v877_v43 = vld [vmem:[#allocation10] sm:$0xff] }
 0x363   :  { %v6968_v49 = vadd.f32 %v1016_v44, %v8223_v37  ;;  %v6988_v4 = vadd.f32 %v1087_v51, %v8235_v3  ;;  %v879_v44 = vld [vmem:[#allocation10 + $0x10] sm:$0xff] }
 0x364   :  { %v5365_v50 = vmul.f32 -1.442695, %v6967_v41  ;;  %v5367_v9 = vmul.f32 -1.442695, %v6987_v0  ;;  %v881_v41 = vld [vmem:[#allocation10 + $0x20] sm:$0xff]  ;;  %v883_v51 = vld [vmem:[#allocation10 + $0x30] sm:$0xff] }
 0x365   :  { %v5366_v58 = vmul.f32 -1.442695, %v6968_v49  ;;  %v886_v49 = vld [vmem:[#allocation10 + $0x48] sm:$0xff]  ;;  %v892_v0 = vld [vmem:[#allocation10 + $0x78] sm:$0xff] }
 0x366   :  { %7125 = vpow2.f32 %v5365_v50  ;;  %v890_v50 = vld [vmem:[#allocation10 + $0x68] sm:$0xff] }
 0x367   :  { %7127 = vpow2.f32 %v5366_v58  ;;  %v888_v58 = vld [vmem:[#allocation10 + $0x58] sm:$0xff] }
 0x368   :  { %7129 = vtanh.f32 %v6988_v4 }
 0x369   :  { %7131 = vpow2.f32 %v5367_v9 }
 0x370   :  { %v7126_v59 = vpop.eup %7125 }
 0x371   :  { %v1103_v2 = vadd.f32 1.0, %v7126_v59  ;;  %v7128_v14 = vpop.eup %7127  ;;  %v5693_v59 = vpack.c.bf16 %v881_v41, %v877_v43 }
 0x372   :  { %v1104_v18 = vadd.f32 1.0, %v7128_v14  ;;  %v7130_v10 = vpop.eup %7129  ;;  %v885_v14 = vld [vmem:[#allocation10 + $0x40] sm:$0xff] }
 0x373   :  { %7133 = vrcp.f32 %v1103_v2  ;;  %v7132_v11 = vpop.eup %7131  ;;  %v5725_v2 = vpack.c.bf16 %v883_v51, %v879_v44  ;;  %v893_v44 = vld [vmem:[#allocation10 + $0x80] sm:$0xff] }
 0x374   :  { %7135 = vrcp.f32 %v1104_v18  ;;  %v1105_v27 = vadd.f32 1.0, %v7132_v11  ;;  %v889_v18 = vld [vmem:[#allocation10 + $0x60] sm:$0xff]  ;;  %v5727_v11 = vpack.c.bf16 %v892_v0, %v888_v58  ;;  %v895_v58 = vld [vmem:[#allocation10 + $0x90] sm:$0xff] }
 0x375   :  { %v5697_v43 = vpack.c.bf16 %v889_v18, %v885_v14  ;;  %v897_v51 = vld [vmem:[#allocation10 + $0xa0] sm:$0xff]  ;;  %v899_v0 = vld [vmem:[#allocation10 + $0xb0] sm:$0xff] }
 0x376   :  { %7137 = vrcp.f32 %v1105_v27  ;;  %v898_v27 = vld [vmem:[#allocation10 + $0xa8] sm:$0xff]  ;;  %v901_v14 = vld [vmem:[#allocation10 + $0xc0] sm:$0xff] }
 0x377   :  { %v905_v18 = vld [vmem:[#allocation10 + $0xe0] sm:$0xff] }
 0x37d   :  { %v7134_v25 = vpop.eup %7133 }
 0x37e   :  { %v1114_v26 = vmul.f32 %v7134_v25, %v7130_v10  ;;  %v7136_v19 = vpop.eup %7135  ;;  %v5695_v10 = vpack.c.bf16 %v890_v50, %v886_v49  ;;  %v887_v25 = vld [vmem:[#allocation10 + $0x50] sm:$0xff] }
 0x37f   :  { %v1113_v34 = vmul.f32 %v7136_v19, %v8239_v42  ;;  %v894_v19 = vld [vmem:[#allocation10 + $0x88] sm:$0xff] }
 0x380   :  { %v7138_v4 = vpop.eup %7137  ;;  %v5699_v49 = vpack.c.bf16 %v898_v27, %v894_v19  ;;  %v914_v19 = vld [vmem:[#allocation10 + $0x128] sm:$0xff]  ;;  %v912_v27 = vld [vmem:[#allocation10 + $0x118] sm:$0xff] }
 0x381   :  { %v8253_v29 = vadd.f32 %v1114_v26, %v1113_v34  ;;  %v891_v26 = vld [vmem:[#allocation10 + $0x70] sm:$0xff]  ;;  %v896_v34 = vld [vmem:[#allocation10 + $0x98] sm:$0xff] }
 0x382   :  { %v5729_v41 = vpack.c.bf16 %v891_v26, %v887_v25  ;;  %v5731_v50 = vpack.c.bf16 %v900_v57, %v896_v34  ;;  %v5735_v57 = vpack.c.bf16 %v908_v56, %v904_v35  ;;  %v907_v25 = vld [vmem:[#allocation10 + $0xf0] sm:$0xff]  ;;  %v910_v26 = vld [vmem:[#allocation10 + $0x108] sm:$0xff]  ;;  %v916_v34 = vld [vmem:[#allocation10 + $0x138] sm:$0xff] }
 0x383   :  { %8737 = vst [vmem:[#allocation43_spill] sm:$0xff] %v8253_v29  ;;  %7139 = vtanh.f32 %v8253_v29  ;;  %v5705_v29 = vpack.c.bf16 %v905_v18, %v901_v14  ;;  %v922_v35 = vld [vmem:[#allocation10 + $0x168] sm:$0xff]  ;;  %v920_v56 = vld [vmem:[#allocation10 + $0x158] sm:$0xff] }
 0x38d   :  { %v7140_v9 = vpop.eup %7139 }
 0x38e   :  { %v8256_v42 = vmul.f32 %v7140_v9, %v7138_v4  ;;  %v902_v4 = vld [vmem:[#allocation10 + $0xc8] sm:$0xff] }
 0x38f   :  { %v906_v9 = vld [vmem:[#allocation10 + $0xe8] sm:$0xff] }
 0x390   :  { %1248 = vmatmul.mubr.f32.vlgmr.msra.gmra.mrb[20].mxu0 %v8256_v42  ;;  %1319 = vmatmul.mubr.f32.vlgmr.msra.gmra.mrb[22].mxu1 %v8256_v42 }
 0x391   :  { %5694 = vmatpush1.bf16.msra.mxu0 %v5693_v59  ;;  %5726 = vmatpush1.bf16.msra.mxu1 %v5725_v2  ;;  %v5701_v59 = vpack.c.bf16 %v897_v51, %v893_v44  ;;  %v5733_v2 = vpack.c.bf16 %v899_v0, %v895_v58  ;;  %v5707_v44 = vpack.c.bf16 %v914_v19, %v910_v26  ;;  %v918_v58 = vld [vmem:[#allocation10 + $0x148] sm:$0xff]  ;;  %v924_v0 = vld [vmem:[#allocation10 + $0x178] sm:$0xff] }
 0x392   :  { %5696 = vmatprep.subr.bf16.mxu0 %v5695_v10  ;;  %5728 = vmatprep.subr.bf16.mxu1 %v5727_v11  ;;  %v5703_v10 = vpack.c.bf16 %v906_v9, %v902_v4  ;;  %v903_v11 = vld [vmem:[#allocation10 + $0xd0] sm:$0xff]  ;;  %v5739_v51 = vpack.c.bf16 %v916_v34, %v912_v27  ;;  %v5711_v14 = vpack.c.bf16 %v922_v35, %v918_v58  ;;  %v928_v26 = vld [vmem:[#allocation10 + $0x198] sm:$0xff] }
 0x393   :  { %1389 = vmatprep.mubr.f32.mxu0 %v8738_v31  ;;  %1460 = vmatprep.mubr.f32.mxu1 %v8738_v31  ;;  %v5737_v3 = vpack.c.bf16 %v907_v25, %v903_v11  ;;  %v5743_v18 = vpack.c.bf16 %v924_v0, %v920_v56  ;;  %v926_v11 = vld [vmem:[#allocation10 + $0x188] sm:$0xff]  ;;  %v932_v19 = vld [vmem:[#allocation10 + $0x1b8] sm:$0xff] }
 0x394   :  { %v930_v25 = vld [vmem:[#allocation10 + $0x1a8] sm:$0xff]  ;;  %v936_v58 = vld [vmem:[#allocation10 + $0x1d8] sm:$0xff] }
 0x395   :  { %5698 = vmatpush1.bf16.msra.mxu0 %v5697_v43  ;;  %5730 = vmatpush1.bf16.msra.mxu1 %v5729_v41  ;;  %v909_v43 = vld [vmem:[#allocation10 + $0x100] sm:$0xff]  ;;  %v940_v35 = vld [vmem:[#allocation10 + $0x1f8] sm:$0xff] }
 0x396   :  { %5700 = vmatprep.subr.bf16.mxu0 %v5699_v49  ;;  %5732 = vmatprep.subr.bf16.mxu1 %v5731_v50  ;;  %v913_v41 = vld [vmem:[#allocation10 + $0x120] sm:$0xff]  ;;  %v911_v49 = vld [vmem:[#allocation10 + $0x110] sm:$0xff] }
 0x397   :  { %v915_v50 = vld [vmem:[#allocation10 + $0x130] sm:$0xff]  ;;  %v5709_v4 = vpack.c.bf16 %v913_v41, %v909_v43  ;;  %v5715_v43 = vpack.c.bf16 %v930_v25, %v926_v11  ;;  %v5747_v41 = vpack.c.bf16 %v932_v19, %v928_v26  ;;  %v1650_v11 = vld [vmem:[#allocation10 + $0x428] sm:$0xff]  ;;  %v1648_v25 = vld [vmem:[#allocation10 + $0x418] sm:$0xff] }
 0x398   :  { %v5741_v9 = vpack.c.bf16 %v915_v50, %v911_v49  ;;  %v934_v49 = vld [vmem:[#allocation10 + $0x1c8] sm:$0xff]  ;;  %v1652_v19 = vld [vmem:[#allocation10 + $0x438] sm:$0xff] }
 0x399   :  { %5702 = vmatpush1.bf16.msra.mxu0 %v5701_v59  ;;  %5734 = vmatpush1.bf16.msra.mxu1 %v5733_v2  ;;  %v917_v59 = vld [vmem:[#allocation10 + $0x140] sm:$0xff]  ;;  %v938_v50 = vld [vmem:[#allocation10 + $0x1e8] sm:$0xff] }
 0x39a   :  { %5704 = vmatprep.subr.bf16.mxu0 %v5703_v10  ;;  %5736 = vmatprep.subr.bf16.mxu1 %v5735_v57  ;;  %v921_v2 = vld [vmem:[#allocation10 + $0x160] sm:$0xff]  ;;  %v919_v10 = vld [vmem:[#allocation10 + $0x150] sm:$0xff] }
 0x39b   :  { %v923_v57 = vld [vmem:[#allocation10 + $0x170] sm:$0xff]  ;;  %v5713_v27 = vpack.c.bf16 %v921_v2, %v917_v59  ;;  %v5751_v59 = vpack.c.bf16 %v940_v35, %v936_v58  ;;  %v937_v2 = vld [vmem:[#allocation10 + $0x1e0] sm:$0xff]  ;;  %v1660_v58 = vld [vmem:[#allocation10 + $0x478] sm:$0xff] }
 0x39c   :  { %v5745_v34 = vpack.c.bf16 %v923_v57, %v919_v10  ;;  %v1653_v35 = vld [vmem:[#allocation10 + $0x440] sm:$0xff] }
 0x39d   :  { %5706 = vmatpush1.bf16.msra.mxu0 %v5705_v29  ;;  %5738 = vmatpush1.bf16.msra.mxu1 %v5737_v3  ;;  %v925_v29 = vld [vmem:[#allocation10 + $0x180] sm:$0xff] }
 0x39e   :  { %5708 = vmatprep.subr.bf16.mxu0 %v5707_v44  ;;  %5740 = vmatprep.subr.bf16.mxu1 %v5739_v51  ;;  %v929_v3 = vld [vmem:[#allocation10 + $0x1a0] sm:$0xff]  ;;  %v927_v44 = vld [vmem:[#allocation10 + $0x190] sm:$0xff] }
 0x39f   :  { %v931_v51 = vld [vmem:[#allocation10 + $0x1b0] sm:$0xff]  ;;  %v5717_v56 = vpack.c.bf16 %v929_v3, %v925_v29  ;;  %v5851_v29 = vpack.c.bf16 %v1652_v19, %v1648_v25  ;;  %v1665_v25 = vld [vmem:[#allocation10 + $0x4a0] sm:$0xff] }
 0x3a0   :  { %v5749_v0 = vpack.c.bf16 %v931_v51, %v927_v44  ;;  %v1658_v51 = vld [vmem:[#allocation10 + $0x468] sm:$0xff] }
 0x3a1   :  { %5710 = vmatpush1.bf16.msra.mxu0 %v5709_v4  ;;  %5742 = vmatpush1.bf16.msra.mxu1 %v5741_v9  ;;  %v933_v4 = vld [vmem:[#allocation10 + $0x1c0] sm:$0xff]  ;;  %v5719_v9 = vpack.c.bf16 %v938_v50, %v934_v49  ;;  %v1656_v49 = vld [vmem:[#allocation10 + $0x458] sm:$0xff] }
 0x3a2   :  { %5712 = vmatprep.subr.bf16.mxu0 %v5711_v14  ;;  %5744 = vmatprep.subr.bf16.mxu1 %v5743_v18  ;;  %v935_v14 = vld [vmem:[#allocation10 + $0x1d0] sm:$0xff]  ;;  %v5721_v10 = vpack.c.bf16 %v937_v2, %v933_v4 }
 0x3a3   :  { %v939_v18 = vld [vmem:[#allocation10 + $0x1f0] sm:$0xff] }
 0x3a4   :  { %v5753_v57 = vpack.c.bf16 %v939_v18, %v935_v14  ;;  %v1662_v14 = vld [vmem:[#allocation10 + $0x488] sm:$0xff] }
 0x3a5   :  { %5714 = vmatpush1.bf16.msra.mxu0 %v5713_v27  ;;  %5746 = vmatpush1.bf16.msra.mxu1 %v5745_v34  ;;  %v1645_v27 = vld [vmem:[#allocation10 + $0x400] sm:$0xff]  ;;  %v1666_v18 = vld [vmem:[#allocation10 + $0x4a8] sm:$0xff] }
 0x3a6   :  { %5716 = vmatprep.subr.bf16.mxu0 %v5715_v43  ;;  %5748 = vmatprep.subr.bf16.mxu1 %v5747_v41  ;;  %v1649_v34 = vld [vmem:[#allocation10 + $0x420] sm:$0xff]  ;;  %v1647_v43 = vld [vmem:[#allocation10 + $0x410] sm:$0xff] }
 0x3a7   :  { %v5821_v3 = vpack.c.bf16 %v1649_v34, %v1645_v27  ;;  %v1651_v41 = vld [vmem:[#allocation10 + $0x430] sm:$0xff] }
 0x3a8   :  { %v5853_v44 = vpack.c.bf16 %v1651_v41, %v1647_v43  ;;  %v1663_v27 = vld [vmem:[#allocation10 + $0x490] sm:$0xff]  ;;  %v1674_v43 = vld [vmem:[#allocation10 + $0x4e8] sm:$0xff]  ;;  %v1672_v41 = vld [vmem:[#allocation10 + $0x4d8] sm:$0xff] }
 0x3a9   :  { %5718 = vmatpush1.bf16.msra.mxu0 %v5717_v56  ;;  %5750 = vmatpush1.bf16.msra.mxu1 %v5749_v0  ;;  %v1657_v56 = vld [vmem:[#allocation10 + $0x460] sm:$0xff]  ;;  %v5855_v0 = vpack.c.bf16 %v1660_v58, %v1656_v49  ;;  %v1667_v34 = vld [vmem:[#allocation10 + $0x4b0] sm:$0xff] }
 0x3aa   :  { %5720 = vmatprep.subr.bf16.mxu0 %v5719_v9  ;;  %5752 = vmatprep.subr.bf16.mxu1 %v5751_v59  ;;  %v5825_v4 = vpack.c.bf16 %v1657_v56, %v1653_v35  ;;  %v1655_v9 = vld [vmem:[#allocation10 + $0x450] sm:$0xff]  ;;  %v1673_v49 = vld [vmem:[#allocation10 + $0x4e0] sm:$0xff] }
 0x3ab   :  { %v1659_v59 = vld [vmem:[#allocation10 + $0x470] sm:$0xff] }
 0x3ac   :  { %v5857_v2 = vpack.c.bf16 %v1659_v59, %v1655_v9  ;;  %v1671_v35 = vld [vmem:[#allocation10 + $0x4d0] sm:$0xff]  ;;  %v1682_v9 = vld [vmem:[#allocation10 + $0x528] sm:$0xff]  ;;  %v1680_v59 = vld [vmem:[#allocation10 + $0x518] sm:$0xff] }
 0x3ad   :  { %5722 = vmatpush1.bf16.msra.mxu0 %v5721_v10  ;;  %5754 = vmatpush1.bf16.msra.mxu1 %v5753_v57  ;;  %v1664_v10 = vld [vmem:[#allocation10 + $0x498] sm:$0xff]  ;;  %v5827_v57 = vpack.c.bf16 %v1666_v18, %v1662_v14  ;;  %v1675_v56 = vld [vmem:[#allocation10 + $0x4f0] sm:$0xff]  ;;  %v1677_v18 = vld [vmem:[#allocation10 + $0x500] sm:$0xff] }
 0x3ae   :  { %5756 = vmatprep.subr.bf16.mxu0 %v8031_v15  ;;  %5788 = vmatprep.subr.bf16.mxu1 %v8117_v23  ;;  %v1684_v14 = vld [vmem:[#allocation10 + $0x538] sm:$0xff] }
 0x3b0   :  { %1390 = vmatmul.mubr.f32.vlgmr.msra.gmra.mrb[20].mxu0 %v8242_v48  ;;  %1461 = vmatmul.mubr.f32.vlgmr.msra.gmra.mrb[22].mxu1 %v8242_v48  ;;  %v1646_v48 = vld [vmem:[#allocation10 + $0x408] sm:$0xff] }
 0x3b1   :  { %5758 = vmatpush1.bf16.msra.mxu0 %v8035_v21  ;;  %5790 = vmatpush1.bf16.msra.mxu1 %v8139_v32  ;;  %v5819_v26 = vpack.c.bf16 %v1650_v11, %v1646_v48  ;;  %v1668_v48 = vld [vmem:[#allocation10 + $0x4b8] sm:$0xff]  ;;  %v1661_v11 = vld [vmem:[#allocation10 + $0x480] sm:$0xff] }
 0x3b2   :  { %5760 = vmatprep.subr.bf16.mxu0 %v8038_v22  ;;  %5792 = vmatprep.subr.bf16.mxu1 %v8141_v33  ;;  %v5829_v19 = vpack.c.bf16 %v1665_v25, %v1661_v11  ;;  %v1679_v11 = vld [vmem:[#allocation10 + $0x510] sm:$0xff] }
 0x3b3   :  { %1538 = vmatprep.mubr.f32.mxu0 %v8738_v31  ;;  %1609 = vmatprep.mubr.f32.mxu1 %v8738_v31  ;;  %v1683_v25 = vld [vmem:[#allocation10 + $0x530] sm:$0xff] }
 0x3b5   :  { %5762 = vmatpush1.bf16.msra.mxu0 %v8046_v28  ;;  %5794 = vmatpush1.bf16.msra.mxu1 %v8149_v38 }
 0x3b6   :  { %5764 = vmatprep.subr.bf16.mxu0 %v8049_v30  ;;  %5796 = vmatprep.subr.bf16.mxu1 %v8153_v39 }
 0x3b9   :  { %5766 = vmatpush1.bf16.msra.mxu0 %v8057_v40  ;;  %5798 = vmatpush1.bf16.msra.mxu1 %v8159_v46 }
 0x3ba   :  { %5768 = vmatprep.subr.bf16.mxu0 %v8060_v45  ;;  %5800 = vmatprep.subr.bf16.mxu1 %v8162_v47 }
 0x3bd   :  { %5770 = vmatpush1.bf16.msra.mxu0 %v8066_v54  ;;  %5802 = vmatpush1.bf16.msra.mxu1 %v8167_v52 }
 0x3be   :  { %5772 = vmatprep.subr.bf16.mxu0 %v8069_v55  ;;  %5804 = vmatprep.subr.bf16.mxu1 %v8170_v53 }
 0x3c1   :  { %5774 = vmatpush1.bf16.msra.mxu0 %v8075_v61  ;;  %5806 = vmatpush1.bf16.msra.mxu1 %v8175_v60 }
 0x3c2   :  { %5776 = vmatprep.subr.bf16.mxu0 %v8078_v62  ;;  %5808 = vmatprep.subr.bf16.mxu1 %v8178_v63 }
 0x3c5   :  { %5778 = vmatpush1.bf16.msra.mxu0 %v8088_v5  ;;  %5810 = vmatpush1.bf16.msra.mxu1 %v8181_v7 }
 0x3c6   :  { %5780 = vmatprep.subr.bf16.mxu0 %v8091_v6  ;;  %5812 = vmatprep.subr.bf16.mxu1 %v8184_v8 }
 0x3c9   :  { %5782 = vmatpush1.bf16.msra.mxu0 %v8101_v12  ;;  %5814 = vmatpush1.bf16.msra.mxu1 %v8187_v16 }
 0x3ca   :  { %5784 = vmatprep.subr.bf16.mxu0 %v8104_v13  ;;  %5816 = vmatprep.subr.bf16.mxu1 %v8190_v17 }
 0x3cd   :  { %5786 = vmatpush1.bf16.msra.mxu0 %v8114_v20  ;;  %5818 = vmatpush1.bf16.msra.mxu1 %v8193_v24 }
 0x3ce   :  { %5820 = vmatprep.subr.bf16.mxu0 %v5819_v26  ;;  %5852 = vmatprep.subr.bf16.mxu1 %v5851_v29  ;;  %v5859_v26 = vpack.c.bf16 %v1668_v48, %v1664_v10  ;;  %v5861_v29 = vpack.c.bf16 %v1667_v34, %v1663_v27  ;;  %v1681_v10 = vld [vmem:[#allocation10 + $0x520] sm:$0xff]  ;;  %v1690_v27 = vld [vmem:[#allocation10 + $0x568] sm:$0xff]  ;;  %v1688_v34 = vld [vmem:[#allocation10 + $0x558] sm:$0xff] }
 0x3cf   :  { %v5837_v48 = vpack.c.bf16 %v1681_v10, %v1677_v18  ;;  %v1695_v18 = vld [vmem:[#allocation10 + $0x590] sm:$0xff] }
 0x3d0   :  { %1539 = vmatmul.mubr.f32.vlgmr.msra.gmra.mrb[4].mxu0 %v8256_v42  ;;  %1610 = vmatmul.mubr.f32.vlgmr.msra.gmra.mrb[4].mxu1 %v8256_v42  ;;  %v1654_v42 = vld [vmem:[#allocation10 + $0x448] sm:$0xff]  ;;  %v1699_v10 = vld [vmem:[#allocation10 + $0x5b0] sm:$0xff] }
 0x3d1   :  { %1773 = vmatprep.mubr.f32.mxu0 %v8738_v31  ;;  %1844 = vmatprep.mubr.f32.mxu1 %v8738_v31  ;;  %v5823_v50 = vpack.c.bf16 %v1658_v51, %v1654_v42  ;;  %v1676_v42 = vld [vmem:[#allocation10 + $0x4f8] sm:$0xff]  ;;  %v1669_v51 = vld [vmem:[#allocation10 + $0x4c0] sm:$0xff] }
 0x3d2   :  { %5822 = vmatpush1.bf16.msra.mxu0 %v5821_v3  ;;  %5854 = vmatpush1.bf16.msra.mxu1 %v5853_v44  ;;  %v1670_v3 = vld [vmem:[#allocation10 + $0x4c8] sm:$0xff]  ;;  %v5833_v58 = vpack.c.bf16 %v1673_v49, %v1669_v51  ;;  %v1687_v51 = vld [vmem:[#allocation10 + $0x550] sm:$0xff] }
 0x3d3   :  { %5824 = vmatprep.subr.bf16.mxu0 %v5823_v50  ;;  %5856 = vmatprep.subr.bf16.mxu1 %v5855_v0  ;;  %v5831_v44 = vpack.c.bf16 %v1674_v43, %v1670_v3  ;;  %v5863_v50 = vpack.c.bf16 %v1676_v42, %v1672_v41  ;;  %v5865_v0 = vpack.c.bf16 %v1675_v56, %v1671_v35  ;;  %v1692_v3 = vld [vmem:[#allocation10 + $0x578] sm:$0xff]  ;;  %v1685_v43 = vld [vmem:[#allocation10 + $0x540] sm:$0xff]  ;;  %v1691_v49 = vld [vmem:[#allocation10 + $0x570] sm:$0xff] }
 0x3d4   :  { %v1689_v41 = vld [vmem:[#allocation10 + $0x560] sm:$0xff]  ;;  %v1698_v35 = vld [vmem:[#allocation10 + $0x5a8] sm:$0xff]  ;;  %v1696_v56 = vld [vmem:[#allocation10 + $0x598] sm:$0xff] }
 0x3d5   :  { %v5841_v42 = vpack.c.bf16 %v1689_v41, %v1685_v43  ;;  %v1707_v41 = vld [vmem:[#allocation10 + $0x5f0] sm:$0xff] }
 0x3d6   :  { %5826 = vmatpush1.bf16.msra.mxu0 %v5825_v4  ;;  %5858 = vmatpush1.bf16.msra.mxu1 %v5857_v2  ;;  %v1678_v4 = vld [vmem:[#allocation10 + $0x508] sm:$0xff] }
 0x3d7   :  { %5828 = vmatprep.subr.bf16.mxu0 %v5827_v57  ;;  %5860 = vmatprep.subr.bf16.mxu1 %v5859_v26  ;;  %v5835_v2 = vpack.c.bf16 %v1682_v9, %v1678_v4  ;;  %v5867_v57 = vpack.c.bf16 %v1684_v14, %v1680_v59  ;;  %v5869_v26 = vpack.c.bf16 %v1683_v25, %v1679_v11  ;;  %v1700_v4 = vld [vmem:[#allocation10 + $0x5b8] sm:$0xff]  ;;  %v1693_v9 = vld [vmem:[#allocation10 + $0x580] sm:$0xff]  ;;  %v1706_v11 = vld [vmem:[#allocation10 + $0x5e8] sm:$0xff] }
 0x3d8   :  { %v1697_v59 = vld [vmem:[#allocation10 + $0x5a0] sm:$0xff]  ;;  %v1704_v25 = vld [vmem:[#allocation10 + $0x5d8] sm:$0xff] }
 0x3d9   :  { %v5845_v14 = vpack.c.bf16 %v1697_v59, %v1693_v9  ;;  %v8739_v9 = vld [vmem:[#allocation42_spill] sm:$0xff] }
 0x3da   :  { %5830 = vmatpush1.bf16.msra.mxu0 %v5829_v19  ;;  %5862 = vmatpush1.bf16.msra.mxu1 %v5861_v29  ;;  %v1686_v19 = vld [vmem:[#allocation10 + $0x548] sm:$0xff] }
 0x3db   :  { %5832 = vmatprep.subr.bf16.mxu0 %v5831_v44  ;;  %5864 = vmatprep.subr.bf16.mxu1 %v5863_v50  ;;  %v5839_v29 = vpack.c.bf16 %v1690_v27, %v1686_v19  ;;  %v5871_v44 = vpack.c.bf16 %v1692_v3, %v1688_v34  ;;  %v5873_v50 = vpack.c.bf16 %v1691_v49, %v1687_v51  ;;  %v1701_v34 = vld [vmem:[#allocation10 + $0x5c0] sm:$0xff]  ;;  %v1703_v3 = vld [vmem:[#allocation10 + $0x5d0] sm:$0xff] }
 0x3de   :  { %5834 = vmatpush1.bf16.msra.mxu0 %v5833_v58  ;;  %5866 = vmatpush1.bf16.msra.mxu1 %v5865_v0  ;;  %v1694_v58 = vld [vmem:[#allocation10 + $0x588] sm:$0xff] }
 0x3df   :  { %5836 = vmatprep.subr.bf16.mxu0 %v5835_v2  ;;  %5868 = vmatprep.subr.bf16.mxu1 %v5867_v57  ;;  %v5843_v0 = vpack.c.bf16 %v1698_v35, %v1694_v58  ;;  %v5875_v2 = vpack.c.bf16 %v1700_v4, %v1696_v56  ;;  %v1702_v57 = vld [vmem:[#allocation10 + $0x5c8] sm:$0xff] }
 0x3e0   :  { %v5847_v19 = vpack.c.bf16 %v1706_v11, %v1702_v57 }
 0x3e2   :  { %5838 = vmatpush1.bf16.msra.mxu0 %v5837_v48  ;;  %5870 = vmatpush1.bf16.msra.mxu1 %v5869_v26  ;;  %v5877_v48 = vpack.c.bf16 %v1699_v10, %v1695_v18  ;;  %v1708_v26 = vld [vmem:[#allocation10 + $0x5f8] sm:$0xff] }
 0x3e3   :  { %5840 = vmatprep.subr.bf16.mxu0 %v5839_v29  ;;  %5872 = vmatprep.subr.bf16.mxu1 %v5871_v44  ;;  %v5879_v27 = vpack.c.bf16 %v1708_v26, %v1704_v25  ;;  %v1705_v29 = vld [vmem:[#allocation10 + $0x5e0] sm:$0xff]  ;;  %v5881_v44 = vpack.c.bf16 %v1707_v41, %v1703_v3 }
 0x3e4   :  { %v5849_v43 = vpack.c.bf16 %v1705_v29, %v1701_v34  ;;  %v8740_v34 = vld [vmem:[#allocation43_spill] sm:$0xff] }
 0x3e6   :  { %5842 = vmatpush1.bf16.msra.mxu0 %v5841_v42  ;;  %5874 = vmatpush1.bf16.msra.mxu1 %v5873_v50 }
 0x3e7   :  { %5844 = vmatprep.subr.bf16.mxu0 %v5843_v0  ;;  %5876 = vmatprep.subr.bf16.mxu1 %v5875_v2 }
 0x3ea   :  { %5846 = vmatpush1.bf16.msra.mxu0 %v5845_v14  ;;  %5878 = vmatpush1.bf16.msra.mxu1 %v5877_v48 }
 0x3eb   :  { %5848 = vmatprep.subr.bf16.mxu0 %v5847_v19  ;;  %5880 = vmatprep.subr.bf16.mxu1 %v5879_v27 }
 0x3ee   :  { %5850 = vmatpush1.bf16.msra.mxu0 %v5849_v43  ;;  %5882 = vmatpush1.bf16.msra.mxu1 %v5881_v44 }
 0x3ef   :  { %5884 = vmatprep.subr.bf16.mxu0 %v8031_v15  ;;  %5916 = vmatprep.subr.bf16.mxu1 %v8117_v23 }
 0x4a3   :  { %v1540_v42 = vpop.f32.mrb[4].mxu0  ;;  %v1611_v51 = vpop.f32.mrb[4].mxu1 }
 0x4a4   :  { %v6969_v49 = vadd.f32 %v1540_v42, %v8220_v36  ;;  %v1542_v50 = vpop.f32.mrb[5].mxu0  ;;  %v1613_v58 = vpop.f32.mrb[5].mxu1  ;;  %v6989_v4 = vadd.f32 %v1611_v51, %v8232_v1  ;;  %v2034_v42 = vld [vmem:[#allocation10 + $0x608] sm:$0xff] }
 0x4a5   :  { %v6970_v35 = vadd.f32 %v1542_v50, %v8223_v37  ;;  %v6990_v59 = vadd.f32 %v1613_v58, %v8739_v9  ;;  %v2038_v51 = vld [vmem:[#allocation10 + $0x628] sm:$0xff]  ;;  %v2040_v58 = vld [vmem:[#allocation10 + $0x638] sm:$0xff] }
 0x4a6   :  { %v5368_v56 = vmul.f32 -1.442695, %v6969_v49  ;;  %v5370_v2 = vmul.f32 -1.442695, %v6989_v4  ;;  %v2036_v49 = vld [vmem:[#allocation10 + $0x618] sm:$0xff]  ;;  %v5947_v50 = vpack.c.bf16 %v2038_v51, %v2034_v42 }
 0x4a7   :  { %v5369_v0 = vmul.f32 -1.442695, %v6970_v35  ;;  %v2033_v35 = vld [vmem:[#allocation10 + $0x600] sm:$0xff]  ;;  %v2052_v42 = vld [vmem:[#allocation10 + $0x698] sm:$0xff] }
 0x4a8   :  { %7141 = vpow2.f32 %v5368_v56  ;;  %v2037_v56 = vld [vmem:[#allocation10 + $0x620] sm:$0xff] }
 0x4a9   :  { %7143 = vpow2.f32 %v5369_v0  ;;  %v5979_v0 = vpack.c.bf16 %v2040_v58, %v2036_v49  ;;  %v5949_v4 = vpack.c.bf16 %v2037_v56, %v2033_v35  ;;  %v2056_v49 = vld [vmem:[#allocation10 + $0x6b8] sm:$0xff]  ;;  %v2053_v58 = vld [vmem:[#allocation10 + $0x6a0] sm:$0xff] }
 0x4aa   :  { %7145 = vtanh.f32 %v6990_v59  ;;  %v2035_v59 = vld [vmem:[#allocation10 + $0x610] sm:$0xff]  ;;  %v5987_v35 = vpack.c.bf16 %v2056_v49, %v2052_v42  ;;  %v2072_v42 = vld [vmem:[#allocation10 + $0x738] sm:$0xff]  ;;  %v2069_v49 = vld [vmem:[#allocation10 + $0x720] sm:$0xff] }
 0x4ab   :  { %7147 = vpow2.f32 %v5370_v2  ;;  %v2039_v2 = vld [vmem:[#allocation10 + $0x630] sm:$0xff] }
 0x4b2   :  { %v7142_v14 = vpop.eup %7141 }
 0x4b3   :  { %v1629_v18 = vadd.f32 1.0, %v7142_v14  ;;  %v7144_v10 = vpop.eup %7143  ;;  %v5981_v14 = vpack.c.bf16 %v2039_v2, %v2035_v59  ;;  %v2058_v2 = vld [vmem:[#allocation10 + $0x6c8] sm:$0xff] }
 0x4b4   :  { %v1630_v57 = vadd.f32 1.0, %v7144_v10  ;;  %v7146_v48 = vpop.eup %7145  ;;  %v2046_v10 = vld [vmem:[#allocation10 + $0x668] sm:$0xff] }
 0x4b5   :  { %7149 = vrcp.f32 %v1629_v18  ;;  %v7148_v11 = vpop.eup %7147  ;;  %v2042_v18 = vld [vmem:[#allocation10 + $0x648] sm:$0xff] }
 0x4b6   :  { %7151 = vrcp.f32 %v1630_v57  ;;  %v1631_v27 = vadd.f32 1.0, %v7148_v11  ;;  %v2044_v57 = vld [vmem:[#allocation10 + $0x658] sm:$0xff] }
 0x4b7   :  { %v2048_v11 = vld [vmem:[#allocation10 + $0x678] sm:$0xff] }
 0x4b8   :  { %7153 = vrcp.f32 %v1631_v27 }
 0x4bf   :  { %v7150_v25 = vpop.eup %7149 }
 0x4c0   :  { %v1640_v26 = vmul.f32 %v7150_v25, %v7146_v48  ;;  %v7152_v19 = vpop.eup %7151  ;;  %v5951_v48 = vpack.c.bf16 %v2046_v10, %v2042_v18  ;;  %v2041_v25 = vld [vmem:[#allocation10 + $0x640] sm:$0xff]  ;;  %v2060_v18 = vld [vmem:[#allocation10 + $0x6d8] sm:$0xff] }
 0x4c1   :  { %v1639_v29 = vmul.f32 %v7152_v19, %v8740_v34  ;;  %v5983_v19 = vpack.c.bf16 %v2048_v11, %v2044_v57  ;;  %v2043_v34 = vld [vmem:[#allocation10 + $0x650] sm:$0xff]  ;;  %v2064_v57 = vld [vmem:[#allocation10 + $0x6f8] sm:$0xff]  ;;  %v2061_v11 = vld [vmem:[#allocation10 + $0x6e0] sm:$0xff] }
 0x4c2   :  { %v7154_v43 = vpop.eup %7153 }
 0x4c3   :  { %v8309_v3 = vadd.f32 %v1640_v26, %v1639_v29  ;;  %v2045_v26 = vld [vmem:[#allocation10 + $0x660] sm:$0xff]  ;;  %v2047_v29 = vld [vmem:[#allocation10 + $0x670] sm:$0xff] }
 0x4c4   :  { %v5953_v27 = vpack.c.bf16 %v2045_v26, %v2041_v25  ;;  %v5991_v25 = vpack.c.bf16 %v2064_v57, %v2060_v18  ;;  %v2080_v18 = vld [vmem:[#allocation10 + $0x778] sm:$0xff]  ;;  %v2077_v57 = vld [vmem:[#allocation10 + $0x760] sm:$0xff] }
 0x4c5   :  { %7155 = vtanh.f32 %v8309_v3 }
 0x4cf   :  { %v7156_v41 = vpop.eup %7155 }
 0x4d0   :  { %v1643_v44 = vmul.f32 %v7156_v41, %v7154_v43  ;;  %v5985_v43 = vpack.c.bf16 %v2047_v29, %v2043_v34  ;;  %v2050_v41 = vld [vmem:[#allocation10 + $0x688] sm:$0xff] }
 0x4d1   :  { %v2066_v29 = vld [vmem:[#allocation10 + $0x708] sm:$0xff] }
 0x4d2   :  { %1774 = vmatmul.mubr.f32.vlgmr.msra.gmra.mrb[20].mxu0 %v1643_v44  ;;  %1845 = vmatmul.mubr.f32.vlgmr.msra.gmra.mrb[22].mxu1 %v1643_v44 }
 0x4d3   :  { %5886 = vmatpush1.bf16.msra.mxu0 %v8035_v21  ;;  %5918 = vmatpush1.bf16.msra.mxu1 %v8139_v32 }
 0x4d4   :  { %5888 = vmatprep.subr.bf16.mxu0 %v8038_v22  ;;  %5920 = vmatprep.subr.bf16.mxu1 %v8141_v33 }
 0x4d5   :  { %1926 = vmatprep.mubr.f32.mxu0 %v8738_v31  ;;  %1997 = vmatprep.mubr.f32.mxu1 %v8738_v31 }
 0x4d7   :  { %5890 = vmatpush1.bf16.msra.mxu0 %v8046_v28  ;;  %5922 = vmatpush1.bf16.msra.mxu1 %v8149_v38 }
 0x4d8   :  { %5892 = vmatprep.subr.bf16.mxu0 %v8049_v30  ;;  %5924 = vmatprep.subr.bf16.mxu1 %v8153_v39 }
 0x4db   :  { %5894 = vmatpush1.bf16.msra.mxu0 %v8057_v40  ;;  %5926 = vmatpush1.bf16.msra.mxu1 %v8159_v46 }
 0x4dc   :  { %5896 = vmatprep.subr.bf16.mxu0 %v8060_v45  ;;  %5928 = vmatprep.subr.bf16.mxu1 %v8162_v47 }
 0x4df   :  { %5898 = vmatpush1.bf16.msra.mxu0 %v8066_v54  ;;  %5930 = vmatpush1.bf16.msra.mxu1 %v8167_v52 }
 0x4e0   :  { %5900 = vmatprep.subr.bf16.mxu0 %v8069_v55  ;;  %5932 = vmatprep.subr.bf16.mxu1 %v8170_v53 }
 0x4e3   :  { %5902 = vmatpush1.bf16.msra.mxu0 %v8075_v61  ;;  %5934 = vmatpush1.bf16.msra.mxu1 %v8175_v60 }
 0x4e4   :  { %5904 = vmatprep.subr.bf16.mxu0 %v8078_v62  ;;  %5936 = vmatprep.subr.bf16.mxu1 %v8178_v63 }
 0x4e7   :  { %5906 = vmatpush1.bf16.msra.mxu0 %v8088_v5  ;;  %5938 = vmatpush1.bf16.msra.mxu1 %v8181_v7 }
 0x4e8   :  { %5908 = vmatprep.subr.bf16.mxu0 %v8091_v6  ;;  %5940 = vmatprep.subr.bf16.mxu1 %v8184_v8 }
 0x4eb   :  { %5910 = vmatpush1.bf16.msra.mxu0 %v8101_v12  ;;  %5942 = vmatpush1.bf16.msra.mxu1 %v8187_v16 }
 0x4ec   :  { %5912 = vmatprep.subr.bf16.mxu0 %v8104_v13  ;;  %5944 = vmatprep.subr.bf16.mxu1 %v8190_v17 }
 0x4ef   :  { %5914 = vmatpush1.bf16.msra.mxu0 %v8114_v20  ;;  %5946 = vmatpush1.bf16.msra.mxu1 %v8193_v24 }
 0x4f0   :  { %5948 = vmatprep.subr.bf16.mxu0 %v5947_v50  ;;  %5980 = vmatprep.subr.bf16.mxu1 %v5979_v0  ;;  %v2049_v50 = vld [vmem:[#allocation10 + $0x680] sm:$0xff]  ;;  %v2051_v0 = vld [vmem:[#allocation10 + $0x690] sm:$0xff] }
 0x4f1   :  { %v5957_v56 = vpack.c.bf16 %v2053_v58, %v2049_v50 }
 0x4f2   :  { %1927 = vmatmul.mubr.f32.vlgmr.msra.gmra.mrb[6].mxu0 %v1643_v44  ;;  %1998 = vmatmul.mubr.f32.vlgmr.msra.gmra.mrb[6].mxu1 %v1643_v44  ;;  %v2054_v44 = vld [vmem:[#allocation10 + $0x6a8] sm:$0xff] }
 0x4f3   :  { %2161 = vmatprep.mubr.f32.mxu0 %v8738_v31  ;;  %2232 = vmatprep.mubr.f32.mxu1 %v8738_v31  ;;  %v5955_v51 = vpack.c.bf16 %v2054_v44, %v2050_v41  ;;  %v2068_v41 = vld [vmem:[#allocation10 + $0x718] sm:$0xff] }
 0x4f4   :  { %5950 = vmatpush1.bf16.msra.mxu0 %v5949_v4  ;;  %5982 = vmatpush1.bf16.msra.mxu1 %v5981_v14  ;;  %v2055_v4 = vld [vmem:[#allocation10 + $0x6b0] sm:$0xff]  ;;  %v2062_v14 = vld [vmem:[#allocation10 + $0x6e8] sm:$0xff]  ;;  %v5995_v50 = vpack.c.bf16 %v2072_v42, %v2068_v41  ;;  %v2088_v41 = vld [vmem:[#allocation10 + $0x7b8] sm:$0xff] }
 0x4f5   :  { %5952 = vmatprep.subr.bf16.mxu0 %v5951_v48  ;;  %5984 = vmatprep.subr.bf16.mxu1 %v5983_v19  ;;  %v5989_v59 = vpack.c.bf16 %v2055_v4, %v2051_v0  ;;  %v5959_v10 = vpack.c.bf16 %v2062_v14, %v2058_v2  ;;  %v2057_v48 = vld [vmem:[#allocation10 + $0x6c0] sm:$0xff]  ;;  %v2059_v19 = vld [vmem:[#allocation10 + $0x6d0] sm:$0xff]  ;;  %v2074_v4 = vld [vmem:[#allocation10 + $0x748] sm:$0xff] }
 0x4f6   :  { %v5961_v26 = vpack.c.bf16 %v2061_v11, %v2057_v48  ;;  %v2076_v2 = vld [vmem:[#allocation10 + $0x758] sm:$0xff]  ;;  %v2085_v42 = vld [vmem:[#allocation10 + $0x7a0] sm:$0xff] }
 0x4f7   :  { %v5999_v48 = vpack.c.bf16 %v2080_v18, %v2076_v2  ;;  %v2089_v18 = vld [vmem:[#allocation10 + $0x7c0] sm:$0xff] }
 0x4f8   :  { %5954 = vmatpush1.bf16.msra.mxu0 %v5953_v27  ;;  %5986 = vmatpush1.bf16.msra.mxu1 %v5985_v43  ;;  %v2063_v27 = vld [vmem:[#allocation10 + $0x6f0] sm:$0xff]  ;;  %v2070_v43 = vld [vmem:[#allocation10 + $0x728] sm:$0xff] }
 0x4f9   :  { %5956 = vmatprep.subr.bf16.mxu0 %v5955_v51  ;;  %5988 = vmatprep.subr.bf16.mxu1 %v5987_v35  ;;  %v5993_v34 = vpack.c.bf16 %v2063_v27, %v2059_v19  ;;  %v5963_v44 = vpack.c.bf16 %v2070_v43, %v2066_v29  ;;  %v2065_v51 = vld [vmem:[#allocation10 + $0x700] sm:$0xff]  ;;  %v2067_v35 = vld [vmem:[#allocation10 + $0x710] sm:$0xff]  ;;  %v2082_v27 = vld [vmem:[#allocation10 + $0x788] sm:$0xff] }
 0x4fa   :  { %v5965_v58 = vpack.c.bf16 %v2069_v49, %v2065_v51  ;;  %v2084_v29 = vld [vmem:[#allocation10 + $0x798] sm:$0xff] }
 0x4fb   :  { %v6003_v51 = vpack.c.bf16 %v2088_v41, %v2084_v29 }
 0x4fc   :  { %5958 = vmatpush1.bf16.msra.mxu0 %v5957_v56  ;;  %5990 = vmatpush1.bf16.msra.mxu1 %v5989_v59  ;;  %v2071_v56 = vld [vmem:[#allocation10 + $0x730] sm:$0xff]  ;;  %v2078_v59 = vld [vmem:[#allocation10 + $0x768] sm:$0xff] }
 0x4fd   :  { %5960 = vmatprep.subr.bf16.mxu0 %v5959_v10  ;;  %5992 = vmatprep.subr.bf16.mxu1 %v5991_v25  ;;  %v5997_v0 = vpack.c.bf16 %v2071_v56, %v2067_v35  ;;  %v5967_v14 = vpack.c.bf16 %v2078_v59, %v2074_v4  ;;  %v2073_v10 = vld [vmem:[#allocation10 + $0x740] sm:$0xff]  ;;  %v2075_v25 = vld [vmem:[#allocation10 + $0x750] sm:$0xff]  ;;  %v2090_v35 = vld [vmem:[#allocation10 + $0x7c8] sm:$0xff] }
 0x4fe   :  { %v5969_v11 = vpack.c.bf16 %v2077_v57, %v2073_v10  ;;  %v2092_v4 = vld [vmem:[#allocation10 + $0x7d8] sm:$0xff]  ;;  %v2093_v10 = vld [vmem:[#allocation10 + $0x7e0] sm:$0xff]  ;;  %v2091_v57 = vld [vmem:[#allocation10 + $0x7d0] sm:$0xff] }
 0x4ff   :  { %v2096_v59 = vld [vmem:[#allocation10 + $0x7f8] sm:$0xff] }
 0x500   :  { %5962 = vmatpush1.bf16.msra.mxu0 %v5961_v26  ;;  %5994 = vmatpush1.bf16.msra.mxu1 %v5993_v34  ;;  %v2079_v26 = vld [vmem:[#allocation10 + $0x770] sm:$0xff]  ;;  %v2086_v34 = vld [vmem:[#allocation10 + $0x7a8] sm:$0xff] }
 0x501   :  { %5964 = vmatprep.subr.bf16.mxu0 %v5963_v44  ;;  %5996 = vmatprep.subr.bf16.mxu1 %v5995_v50  ;;  %v6001_v19 = vpack.c.bf16 %v2079_v26, %v2075_v25  ;;  %v5971_v43 = vpack.c.bf16 %v2086_v34, %v2082_v27  ;;  %v2081_v44 = vld [vmem:[#allocation10 + $0x780] sm:$0xff]  ;;  %v2083_v50 = vld [vmem:[#allocation10 + $0x790] sm:$0xff] }
 0x502   :  { %v5973_v49 = vpack.c.bf16 %v2085_v42, %v2081_v44 }
 0x504   :  { %5966 = vmatpush1.bf16.msra.mxu0 %v5965_v58  ;;  %5998 = vmatpush1.bf16.msra.mxu1 %v5997_v0  ;;  %v2087_v58 = vld [vmem:[#allocation10 + $0x7b0] sm:$0xff]  ;;  %v2094_v0 = vld [vmem:[#allocation10 + $0x7e8] sm:$0xff] }
 0x505   :  { %5968 = vmatprep.subr.bf16.mxu0 %v5967_v14  ;;  %6000 = vmatprep.subr.bf16.mxu1 %v5999_v48  ;;  %v6005_v56 = vpack.c.bf16 %v2087_v58, %v2083_v50  ;;  %v5975_v2 = vpack.c.bf16 %v2094_v0, %v2090_v35  ;;  %v6007_v14 = vpack.c.bf16 %v2096_v59, %v2092_v4 }
 0x506   :  { %v5977_v48 = vpack.c.bf16 %v2093_v10, %v2089_v18 }
 0x508   :  { %5970 = vmatpush1.bf16.msra.mxu0 %v5969_v11  ;;  %6002 = vmatpush1.bf16.msra.mxu1 %v6001_v19  ;;  %v2095_v11 = vld [vmem:[#allocation10 + $0x7f0] sm:$0xff] }
 0x509   :  { %5972 = vmatprep.subr.bf16.mxu0 %v5971_v43  ;;  %6004 = vmatprep.subr.bf16.mxu1 %v6003_v51  ;;  %v6009_v25 = vpack.c.bf16 %v2095_v11, %v2091_v57 }
 0x50c   :  { %5974 = vmatpush1.bf16.msra.mxu0 %v5973_v49  ;;  %6006 = vmatpush1.bf16.msra.mxu1 %v6005_v56 }
 0x50d   :  { %5976 = vmatprep.subr.bf16.mxu0 %v5975_v2  ;;  %6008 = vmatprep.subr.bf16.mxu1 %v6007_v14 }
 0x510   :  { %5978 = vmatpush1.bf16.msra.mxu0 %v5977_v48  ;;  %6010 = vmatpush1.bf16.msra.mxu1 %v6009_v25 }
 0x511   :  { %6012 = vmatprep.subr.bf16.mxu0 %v8031_v15  ;;  %6044 = vmatprep.subr.bf16.mxu1 %v8117_v23 }
 0x5c5   :  { %v1928_v26 = vpop.f32.mrb[6].mxu0  ;;  %v1999_v19 = vpop.f32.mrb[6].mxu1 }
 0x5c6   :  { %v6971_v27 = vadd.f32 %v1928_v26, %v8220_v36  ;;  %v1930_v34 = vpop.f32.mrb[7].mxu0  ;;  %v2001_v29 = vpop.f32.mrb[7].mxu1  ;;  %v6991_v42 = vadd.f32 %v1999_v19, %v8232_v1  ;;  %v2426_v26 = vld [vmem:[#allocation10 + $0x828] sm:$0xff]  ;;  %v2424_v19 = vld [vmem:[#allocation10 + $0x818] sm:$0xff] }
 0x5c7   :  { %v6972_v43 = vadd.f32 %v1930_v34, %v8223_v37  ;;  %v6992_v51 = vadd.f32 %v2001_v29, %v8739_v9  ;;  %v2428_v34 = vld [vmem:[#allocation10 + $0x838] sm:$0xff]  ;;  %v2421_v29 = vld [vmem:[#allocation10 + $0x800] sm:$0xff] }
 0x5c8   :  { %v5371_v41 = vmul.f32 -1.442695, %v6971_v27  ;;  %v5373_v49 = vmul.f32 -1.442695, %v6991_v42  ;;  %v2423_v42 = vld [vmem:[#allocation10 + $0x810] sm:$0xff] }
 0x5c9   :  { %v5372_v44 = vmul.f32 -1.442695, %v6972_v43  ;;  %v2425_v43 = vld [vmem:[#allocation10 + $0x820] sm:$0xff] }
 0x5ca   :  { %7157 = vpow2.f32 %v5371_v41  ;;  %v6107_v41 = vpack.c.bf16 %v2428_v34, %v2424_v19  ;;  %v2444_v19 = vld [vmem:[#allocation10 + $0x8b8] sm:$0xff]  ;;  %v2441_v34 = vld [vmem:[#allocation10 + $0x8a0] sm:$0xff] }
 0x5cb   :  { %7159 = vpow2.f32 %v5372_v44  ;;  %v6077_v44 = vpack.c.bf16 %v2425_v43, %v2421_v29 }
 0x5cc   :  { %7161 = vtanh.f32 %v6992_v51  ;;  %v2427_v51 = vld [vmem:[#allocation10 + $0x830] sm:$0xff] }
 0x5cd   :  { %7163 = vpow2.f32 %v5373_v49  ;;  %v6109_v49 = vpack.c.bf16 %v2427_v51, %v2423_v42  ;;  %v2446_v51 = vld [vmem:[#allocation10 + $0x8c8] sm:$0xff] }
 0x5d4   :  { %v7158_v50 = vpop.eup %7157 }
 0x5d5   :  { %v2017_v58 = vadd.f32 1.0, %v7158_v50  ;;  %v7160_v35 = vpop.eup %7159  ;;  %v2430_v50 = vld [vmem:[#allocation10 + $0x848] sm:$0xff] }
 0x5d6   :  { %v2018_v56 = vadd.f32 1.0, %v7160_v35  ;;  %v7162_v0 = vpop.eup %7161  ;;  %v2432_v35 = vld [vmem:[#allocation10 + $0x858] sm:$0xff] }
 0x5d7   :  { %7165 = vrcp.f32 %v2017_v58  ;;  %v7164_v4 = vpop.eup %7163  ;;  %v2434_v58 = vld [vmem:[#allocation10 + $0x868] sm:$0xff] }
 0x5d8   :  { %7167 = vrcp.f32 %v2018_v56  ;;  %v2019_v18 = vadd.f32 1.0, %v7164_v4  ;;  %v6079_v56 = vpack.c.bf16 %v2434_v58, %v2430_v50  ;;  %v2429_v4 = vld [vmem:[#allocation10 + $0x840] sm:$0xff]  ;;  %v2448_v50 = vld [vmem:[#allocation10 + $0x8d8] sm:$0xff] }
 0x5da   :  { %7169 = vrcp.f32 %v2019_v18  ;;  %v2431_v18 = vld [vmem:[#allocation10 + $0x850] sm:$0xff] }
 0x5e1   :  { %v7166_v59 = vpop.eup %7165 }
 0x5e2   :  { %v2028_v2 = vmul.f32 %v7166_v59, %v7162_v0  ;;  %v7168_v14 = vpop.eup %7167  ;;  %v2436_v0 = vld [vmem:[#allocation10 + $0x878] sm:$0xff]  ;;  %v2433_v59 = vld [vmem:[#allocation10 + $0x860] sm:$0xff] }
 0x5e3   :  { %v2027_v10 = vmul.f32 %v7168_v14, %v8309_v3  ;;  %v2422_v3 = vld [vmem:[#allocation10 + $0x808] sm:$0xff]  ;;  %v6081_v14 = vpack.c.bf16 %v2433_v59, %v2429_v4 }
 0x5e4   :  { %v7170_v48 = vpop.eup %7169  ;;  %v6075_v27 = vpack.c.bf16 %v2426_v26, %v2422_v3  ;;  %v2440_v3 = vld [vmem:[#allocation10 + $0x898] sm:$0xff] }
 0x5e5   :  { %v8353_v57 = vadd.f32 %v2028_v2, %v2027_v10  ;;  %v6111_v2 = vpack.c.bf16 %v2436_v0, %v2432_v35  ;;  %v2435_v10 = vld [vmem:[#allocation10 + $0x870] sm:$0xff]  ;;  %v6115_v29 = vpack.c.bf16 %v2444_v19, %v2440_v3  ;;  %v2452_v35 = vld [vmem:[#allocation10 + $0x8f8] sm:$0xff]  ;;  %v2449_v0 = vld [vmem:[#allocation10 + $0x8e0] sm:$0xff] }
 0x5e6   :  { %v6119_v4 = vpack.c.bf16 %v2452_v35, %v2448_v50  ;;  %v2460_v3 = vld [vmem:[#allocation10 + $0x938] sm:$0xff]  ;;  %v2457_v19 = vld [vmem:[#allocation10 + $0x920] sm:$0xff] }
 0x5e7   :  { %7171 = vtanh.f32 %v8353_v57  ;;  %v2468_v50 = vld [vmem:[#allocation10 + $0x978] sm:$0xff]  ;;  %v2465_v35 = vld [vmem:[#allocation10 + $0x960] sm:$0xff] }
 0x5f1   :  { %v7172_v11 = vpop.eup %7171 }
 0x5f2   :  { %v2031_v25 = vmul.f32 %v7172_v11, %v7170_v48  ;;  %v6113_v48 = vpack.c.bf16 %v2435_v10, %v2431_v18  ;;  %v2438_v11 = vld [vmem:[#allocation10 + $0x888] sm:$0xff] }
 0x5f3   :  { %v2454_v10 = vld [vmem:[#allocation10 + $0x908] sm:$0xff] }
 0x5f4   :  { %2162 = vmatmul.mubr.f32.vlgmr.msra.gmra.mrb[20].mxu0 %v2031_v25  ;;  %2233 = vmatmul.mubr.f32.vlgmr.msra.gmra.mrb[22].mxu1 %v2031_v25 }
 0x5f5   :  { %6014 = vmatpush1.bf16.msra.mxu0 %v8035_v21  ;;  %6046 = vmatpush1.bf16.msra.mxu1 %v8139_v32 }
 0x5f6   :  { %6016 = vmatprep.subr.bf16.mxu0 %v8038_v22  ;;  %6048 = vmatprep.subr.bf16.mxu1 %v8141_v33 }
 0x5f7   :  { %2314 = vmatprep.mubr.f32.mxu0 %v8738_v31  ;;  %2385 = vmatprep.mubr.f32.mxu1 %v8738_v31 }
 0x5f9   :  { %6018 = vmatpush1.bf16.msra.mxu0 %v8046_v28  ;;  %6050 = vmatpush1.bf16.msra.mxu1 %v8149_v38 }
 0x5fa   :  { %6020 = vmatprep.subr.bf16.mxu0 %v8049_v30  ;;  %6052 = vmatprep.subr.bf16.mxu1 %v8153_v39 }
 0x5fd   :  { %6022 = vmatpush1.bf16.msra.mxu0 %v8057_v40  ;;  %6054 = vmatpush1.bf16.msra.mxu1 %v8159_v46 }
 0x5fe   :  { %6024 = vmatprep.subr.bf16.mxu0 %v8060_v45  ;;  %6056 = vmatprep.subr.bf16.mxu1 %v8162_v47 }
 0x601   :  { %6026 = vmatpush1.bf16.msra.mxu0 %v8066_v54  ;;  %6058 = vmatpush1.bf16.msra.mxu1 %v8167_v52 }
 0x602   :  { %6028 = vmatprep.subr.bf16.mxu0 %v8069_v55  ;;  %6060 = vmatprep.subr.bf16.mxu1 %v8170_v53 }
 0x605   :  { %6030 = vmatpush1.bf16.msra.mxu0 %v8075_v61  ;;  %6062 = vmatpush1.bf16.msra.mxu1 %v8175_v60 }
 0x606   :  { %6032 = vmatprep.subr.bf16.mxu0 %v8078_v62  ;;  %6064 = vmatprep.subr.bf16.mxu1 %v8178_v63 }
 0x609   :  { %6034 = vmatpush1.bf16.msra.mxu0 %v8088_v5  ;;  %6066 = vmatpush1.bf16.msra.mxu1 %v8181_v7 }
 0x60a   :  { %6036 = vmatprep.subr.bf16.mxu0 %v8091_v6  ;;  %6068 = vmatprep.subr.bf16.mxu1 %v8184_v8 }
 0x60d   :  { %6038 = vmatpush1.bf16.msra.mxu0 %v8101_v12  ;;  %6070 = vmatpush1.bf16.msra.mxu1 %v8187_v16 }
 0x60e   :  { %6040 = vmatprep.subr.bf16.mxu0 %v8104_v13  ;;  %6072 = vmatprep.subr.bf16.mxu1 %v8190_v17 }
 0x611   :  { %6042 = vmatpush1.bf16.msra.mxu0 %v8114_v20  ;;  %6074 = vmatpush1.bf16.msra.mxu1 %v8193_v24 }
 0x612   :  { %6076 = vmatprep.subr.bf16.mxu0 %v6075_v27  ;;  %6108 = vmatprep.subr.bf16.mxu1 %v6107_v41  ;;  %v2437_v27 = vld [vmem:[#allocation10 + $0x880] sm:$0xff]  ;;  %v2439_v41 = vld [vmem:[#allocation10 + $0x890] sm:$0xff] }
 0x613   :  { %v6085_v43 = vpack.c.bf16 %v2441_v34, %v2437_v27 }
 0x614   :  { %2315 = vmatmul.mubr.f32.vlgmr.msra.gmra.mrb[8].mxu0 %v2031_v25  ;;  %2386 = vmatmul.mubr.f32.vlgmr.msra.gmra.mrb[8].mxu1 %v2031_v25  ;;  %v2442_v25 = vld [vmem:[#allocation10 + $0x8a8] sm:$0xff] }
 0x615   :  { %2549 = vmatprep.mubr.f32.mxu0 %v8738_v31  ;;  %2620 = vmatprep.mubr.f32.mxu1 %v8738_v31  ;;  %v6083_v26 = vpack.c.bf16 %v2442_v25, %v2438_v11  ;;  %v2456_v11 = vld [vmem:[#allocation10 + $0x918] sm:$0xff] }
 0x616   :  { %6078 = vmatpush1.bf16.msra.mxu0 %v6077_v44  ;;  %6110 = vmatpush1.bf16.msra.mxu1 %v6109_v49  ;;  %v2443_v44 = vld [vmem:[#allocation10 + $0x8b0] sm:$0xff]  ;;  %v2450_v49 = vld [vmem:[#allocation10 + $0x8e8] sm:$0xff]  ;;  %v6123_v27 = vpack.c.bf16 %v2460_v3, %v2456_v11  ;;  %v2476_v11 = vld [vmem:[#allocation10 + $0x9b8] sm:$0xff] }
 0x617   :  { %6080 = vmatprep.subr.bf16.mxu0 %v6079_v56  ;;  %6112 = vmatprep.subr.bf16.mxu1 %v6111_v2  ;;  %v6117_v42 = vpack.c.bf16 %v2443_v44, %v2439_v41  ;;  %v6087_v58 = vpack.c.bf16 %v2450_v49, %v2446_v51  ;;  %v2445_v56 = vld [vmem:[#allocation10 + $0x8c0] sm:$0xff]  ;;  %v2447_v2 = vld [vmem:[#allocation10 + $0x8d0] sm:$0xff]  ;;  %v2462_v44 = vld [vmem:[#allocation10 + $0x948] sm:$0xff] }
 0x618   :  { %v6089_v59 = vpack.c.bf16 %v2449_v0, %v2445_v56  ;;  %v2464_v51 = vld [vmem:[#allocation10 + $0x958] sm:$0xff]  ;;  %v2473_v3 = vld [vmem:[#allocation10 + $0x9a0] sm:$0xff] }
 0x619   :  { %v6127_v56 = vpack.c.bf16 %v2468_v50, %v2464_v51  ;;  %v2477_v50 = vld [vmem:[#allocation10 + $0x9c0] sm:$0xff] }
 0x61a   :  { %6082 = vmatpush1.bf16.msra.mxu0 %v6081_v14  ;;  %6114 = vmatpush1.bf16.msra.mxu1 %v6113_v48  ;;  %v2451_v14 = vld [vmem:[#allocation10 + $0x8f0] sm:$0xff]  ;;  %v2458_v48 = vld [vmem:[#allocation10 + $0x928] sm:$0xff] }
 0x61b   :  { %6084 = vmatprep.subr.bf16.mxu0 %v6083_v26  ;;  %6116 = vmatprep.subr.bf16.mxu1 %v6115_v29  ;;  %v6121_v18 = vpack.c.bf16 %v2451_v14, %v2447_v2  ;;  %v6091_v25 = vpack.c.bf16 %v2458_v48, %v2454_v10  ;;  %v2453_v26 = vld [vmem:[#allocation10 + $0x900] sm:$0xff]  ;;  %v2455_v29 = vld [vmem:[#allocation10 + $0x910] sm:$0xff]  ;;  %v2470_v14 = vld [vmem:[#allocation10 + $0x988] sm:$0xff] }
 0x61c   :  { %v6093_v34 = vpack.c.bf16 %v2457_v19, %v2453_v26  ;;  %v2472_v10 = vld [vmem:[#allocation10 + $0x998] sm:$0xff] }
 0x61d   :  { %v6131_v26 = vpack.c.bf16 %v2476_v11, %v2472_v10 }
 0x61e   :  { %6086 = vmatpush1.bf16.msra.mxu0 %v6085_v43  ;;  %6118 = vmatpush1.bf16.msra.mxu1 %v6117_v42  ;;  %v2459_v43 = vld [vmem:[#allocation10 + $0x930] sm:$0xff]  ;;  %v2466_v42 = vld [vmem:[#allocation10 + $0x968] sm:$0xff] }
 0x61f   :  { %6088 = vmatprep.subr.bf16.mxu0 %v6087_v58  ;;  %6120 = vmatprep.subr.bf16.mxu1 %v6119_v4  ;;  %v6125_v41 = vpack.c.bf16 %v2459_v43, %v2455_v29  ;;  %v6095_v49 = vpack.c.bf16 %v2466_v42, %v2462_v44  ;;  %v2461_v58 = vld [vmem:[#allocation10 + $0x940] sm:$0xff]  ;;  %v2463_v4 = vld [vmem:[#allocation10 + $0x950] sm:$0xff]  ;;  %v2478_v29 = vld [vmem:[#allocation10 + $0x9c8] sm:$0xff] }
 0x620   :  { %v6097_v0 = vpack.c.bf16 %v2465_v35, %v2461_v58  ;;  %v2480_v44 = vld [vmem:[#allocation10 + $0x9d8] sm:$0xff]  ;;  %v2481_v58 = vld [vmem:[#allocation10 + $0x9e0] sm:$0xff]  ;;  %v2479_v35 = vld [vmem:[#allocation10 + $0x9d0] sm:$0xff] }
 0x621   :  { %v2484_v42 = vld [vmem:[#allocation10 + $0x9f8] sm:$0xff] }
 0x622   :  { %6090 = vmatpush1.bf16.msra.mxu0 %v6089_v59  ;;  %6122 = vmatpush1.bf16.msra.mxu1 %v6121_v18  ;;  %v2467_v59 = vld [vmem:[#allocation10 + $0x970] sm:$0xff]  ;;  %v2474_v18 = vld [vmem:[#allocation10 + $0x9a8] sm:$0xff] }
 0x623   :  { %6092 = vmatprep.subr.bf16.mxu0 %v6091_v25  ;;  %6124 = vmatprep.subr.bf16.mxu1 %v6123_v27  ;;  %v6129_v2 = vpack.c.bf16 %v2467_v59, %v2463_v4  ;;  %v6099_v48 = vpack.c.bf16 %v2474_v18, %v2470_v14  ;;  %v2469_v25 = vld [vmem:[#allocation10 + $0x980] sm:$0xff]  ;;  %v2471_v27 = vld [vmem:[#allocation10 + $0x990] sm:$0xff] }
 0x624   :  { %v6101_v19 = vpack.c.bf16 %v2473_v3, %v2469_v25 }
 0x626   :  { %6094 = vmatpush1.bf16.msra.mxu0 %v6093_v34  ;;  %6126 = vmatpush1.bf16.msra.mxu1 %v6125_v41  ;;  %v2475_v34 = vld [vmem:[#allocation10 + $0x9b0] sm:$0xff]  ;;  %v2482_v41 = vld [vmem:[#allocation10 + $0x9e8] sm:$0xff] }
 0x627   :  { %6096 = vmatprep.subr.bf16.mxu0 %v6095_v49  ;;  %6128 = vmatprep.subr.bf16.mxu1 %v6127_v56  ;;  %v6133_v43 = vpack.c.bf16 %v2475_v34, %v2471_v27  ;;  %v6103_v51 = vpack.c.bf16 %v2482_v41, %v2478_v29  ;;  %v6135_v49 = vpack.c.bf16 %v2484_v42, %v2480_v44 }
 0x628   :  { %v6105_v56 = vpack.c.bf16 %v2481_v58, %v2477_v50 }
 0x62a   :  { %6098 = vmatpush1.bf16.msra.mxu0 %v6097_v0  ;;  %6130 = vmatpush1.bf16.msra.mxu1 %v6129_v2  ;;  %v2483_v0 = vld [vmem:[#allocation10 + $0x9f0] sm:$0xff] }
 0x62b   :  { %6100 = vmatprep.subr.bf16.mxu0 %v6099_v48  ;;  %6132 = vmatprep.subr.bf16.mxu1 %v6131_v26  ;;  %v6137_v4 = vpack.c.bf16 %v2483_v0, %v2479_v35 }
 0x62e   :  { %6102 = vmatpush1.bf16.msra.mxu0 %v6101_v19  ;;  %6134 = vmatpush1.bf16.msra.mxu1 %v6133_v43 }
 0x62f   :  { %6104 = vmatprep.subr.bf16.mxu0 %v6103_v51  ;;  %6136 = vmatprep.subr.bf16.mxu1 %v6135_v49 }
 0x632   :  { %6106 = vmatpush1.bf16.msra.mxu0 %v6105_v56  ;;  %6138 = vmatpush1.bf16.msra.mxu1 %v6137_v4 }
 0x633   :  { %6140 = vmatprep.subr.bf16.mxu0 %v8031_v15  ;;  %6172 = vmatprep.subr.bf16.mxu1 %v8117_v23 }
 0x6e7   :  { %v2316_v59 = vpop.f32.mrb[8].mxu0  ;;  %v2387_v2 = vpop.f32.mrb[8].mxu1 }
 0x6e8   :  { %v6973_v14 = vadd.f32 %v2316_v59, %v8220_v36  ;;  %v2318_v18 = vpop.f32.mrb[9].mxu0  ;;  %v2389_v10 = vpop.f32.mrb[9].mxu1  ;;  %v6993_v3 = vadd.f32 %v2387_v2, %v8232_v1  ;;  %v2814_v59 = vld [vmem:[#allocation10 + $0xa28] sm:$0xff]  ;;  %v2812_v2 = vld [vmem:[#allocation10 + $0xa18] sm:$0xff] }
 0x6e9   :  { %v6974_v48 = vadd.f32 %v2318_v18, %v8223_v37  ;;  %v6994_v26 = vadd.f32 %v2389_v10, %v8739_v9  ;;  %v2816_v18 = vld [vmem:[#allocation10 + $0xa38] sm:$0xff]  ;;  %v2809_v10 = vld [vmem:[#allocation10 + $0xa00] sm:$0xff] }
 0x6ea   :  { %v5374_v11 = vmul.f32 -1.442695, %v6973_v14  ;;  %v5376_v19 = vmul.f32 -1.442695, %v6993_v3  ;;  %v2811_v3 = vld [vmem:[#allocation10 + $0xa10] sm:$0xff] }
 0x6eb   :  { %v5375_v25 = vmul.f32 -1.442695, %v6974_v48  ;;  %v2813_v48 = vld [vmem:[#allocation10 + $0xa20] sm:$0xff] }
 0x6ec   :  { %7173 = vpow2.f32 %v5374_v11  ;;  %v6235_v11 = vpack.c.bf16 %v2816_v18, %v2812_v2  ;;  %v2832_v2 = vld [vmem:[#allocation10 + $0xab8] sm:$0xff]  ;;  %v2829_v18 = vld [vmem:[#allocation10 + $0xaa0] sm:$0xff] }
 0x6ed   :  { %7175 = vpow2.f32 %v5375_v25  ;;  %v6205_v25 = vpack.c.bf16 %v2813_v48, %v2809_v10 }
 0x6ee   :  { %7177 = vtanh.f32 %v6994_v26  ;;  %v2815_v26 = vld [vmem:[#allocation10 + $0xa30] sm:$0xff] }
 0x6ef   :  { %7179 = vpow2.f32 %v5376_v19  ;;  %v6237_v19 = vpack.c.bf16 %v2815_v26, %v2811_v3  ;;  %v2834_v26 = vld [vmem:[#allocation10 + $0xac8] sm:$0xff] }
 0x6f6   :  { %v7174_v27 = vpop.eup %7173 }
 0x6f7   :  { %v2405_v34 = vadd.f32 1.0, %v7174_v27  ;;  %v7176_v29 = vpop.eup %7175  ;;  %v2818_v27 = vld [vmem:[#allocation10 + $0xa48] sm:$0xff] }
 0x6f8   :  { %v2406_v43 = vadd.f32 1.0, %v7176_v29  ;;  %v7178_v41 = vpop.eup %7177  ;;  %v2820_v29 = vld [vmem:[#allocation10 + $0xa58] sm:$0xff] }
 0x6f9   :  { %7181 = vrcp.f32 %v2405_v34  ;;  %v7180_v44 = vpop.eup %7179  ;;  %v2822_v34 = vld [vmem:[#allocation10 + $0xa68] sm:$0xff] }
 0x6fa   :  { %7183 = vrcp.f32 %v2406_v43  ;;  %v2407_v50 = vadd.f32 1.0, %v7180_v44  ;;  %v6207_v43 = vpack.c.bf16 %v2822_v34, %v2818_v27  ;;  %v2817_v44 = vld [vmem:[#allocation10 + $0xa40] sm:$0xff]  ;;  %v2836_v27 = vld [vmem:[#allocation10 + $0xad8] sm:$0xff] }
 0x6fc   :  { %7185 = vrcp.f32 %v2407_v50  ;;  %v2819_v50 = vld [vmem:[#allocation10 + $0xa50] sm:$0xff] }
 0x703   :  { %v7182_v42 = vpop.eup %7181 }
 0x704   :  { %v2416_v51 = vmul.f32 %v7182_v42, %v7178_v41  ;;  %v7184_v49 = vpop.eup %7183  ;;  %v2824_v41 = vld [vmem:[#allocation10 + $0xa78] sm:$0xff]  ;;  %v2821_v42 = vld [vmem:[#allocation10 + $0xa60] sm:$0xff] }
 0x705   :  { %v2415_v58 = vmul.f32 %v7184_v49, %v8353_v57  ;;  %v2810_v57 = vld [vmem:[#allocation10 + $0xa08] sm:$0xff]  ;;  %v6209_v49 = vpack.c.bf16 %v2821_v42, %v2817_v44 }
 0x706   :  { %v7186_v56 = vpop.eup %7185  ;;  %v6203_v14 = vpack.c.bf16 %v2814_v59, %v2810_v57  ;;  %v2828_v57 = vld [vmem:[#allocation10 + $0xa98] sm:$0xff] }
 0x707   :  { %v8397_v35 = vadd.f32 %v2416_v51, %v2415_v58  ;;  %v6239_v51 = vpack.c.bf16 %v2824_v41, %v2820_v29  ;;  %v2823_v58 = vld [vmem:[#allocation10 + $0xa70] sm:$0xff]  ;;  %v6243_v10 = vpack.c.bf16 %v2832_v2, %v2828_v57  ;;  %v2840_v29 = vld [vmem:[#allocation10 + $0xaf8] sm:$0xff]  ;;  %v2837_v41 = vld [vmem:[#allocation10 + $0xae0] sm:$0xff] }
 0x708   :  { %v6247_v44 = vpack.c.bf16 %v2840_v29, %v2836_v27  ;;  %v2848_v57 = vld [vmem:[#allocation10 + $0xb38] sm:$0xff]  ;;  %v2845_v2 = vld [vmem:[#allocation10 + $0xb20] sm:$0xff] }
 0x709   :  { %7187 = vtanh.f32 %v8397_v35  ;;  %v2856_v27 = vld [vmem:[#allocation10 + $0xb78] sm:$0xff]  ;;  %v2853_v29 = vld [vmem:[#allocation10 + $0xb60] sm:$0xff] }
 0x713   :  { %v7188_v0 = vpop.eup %7187 }
 0x714   :  { %v2419_v4 = vmul.f32 %v7188_v0, %v7186_v56  ;;  %v6241_v56 = vpack.c.bf16 %v2823_v58, %v2819_v50  ;;  %v2826_v0 = vld [vmem:[#allocation10 + $0xa88] sm:$0xff] }
 0x715   :  { %v2842_v58 = vld [vmem:[#allocation10 + $0xb08] sm:$0xff] }
 0x716   :  { %2550 = vmatmul.mubr.f32.vlgmr.msra.gmra.mrb[20].mxu0 %v2419_v4  ;;  %2621 = vmatmul.mubr.f32.vlgmr.msra.gmra.mrb[22].mxu1 %v2419_v4 }
 0x717   :  { %6142 = vmatpush1.bf16.msra.mxu0 %v8035_v21  ;;  %6174 = vmatpush1.bf16.msra.mxu1 %v8139_v32 }
 0x718   :  { %6144 = vmatprep.subr.bf16.mxu0 %v8038_v22  ;;  %6176 = vmatprep.subr.bf16.mxu1 %v8141_v33 }
 0x719   :  { %2702 = vmatprep.mubr.f32.mxu0 %v8738_v31  ;;  %2773 = vmatprep.mubr.f32.mxu1 %v8738_v31 }
 0x71b   :  { %6146 = vmatpush1.bf16.msra.mxu0 %v8046_v28  ;;  %6178 = vmatpush1.bf16.msra.mxu1 %v8149_v38 }
 0x71c   :  { %6148 = vmatprep.subr.bf16.mxu0 %v8049_v30  ;;  %6180 = vmatprep.subr.bf16.mxu1 %v8153_v39 }
 0x71f   :  { %6150 = vmatpush1.bf16.msra.mxu0 %v8057_v40  ;;  %6182 = vmatpush1.bf16.msra.mxu1 %v8159_v46 }
 0x720   :  { %6152 = vmatprep.subr.bf16.mxu0 %v8060_v45  ;;  %6184 = vmatprep.subr.bf16.mxu1 %v8162_v47 }
 0x723   :  { %6154 = vmatpush1.bf16.msra.mxu0 %v8066_v54  ;;  %6186 = vmatpush1.bf16.msra.mxu1 %v8167_v52 }
 0x724   :  { %6156 = vmatprep.subr.bf16.mxu0 %v8069_v55  ;;  %6188 = vmatprep.subr.bf16.mxu1 %v8170_v53 }
 0x727   :  { %6158 = vmatpush1.bf16.msra.mxu0 %v8075_v61  ;;  %6190 = vmatpush1.bf16.msra.mxu1 %v8175_v60 }
 0x728   :  { %6160 = vmatprep.subr.bf16.mxu0 %v8078_v62  ;;  %6192 = vmatprep.subr.bf16.mxu1 %v8178_v63 }
 0x72b   :  { %6162 = vmatpush1.bf16.msra.mxu0 %v8088_v5  ;;  %6194 = vmatpush1.bf16.msra.mxu1 %v8181_v7 }
 0x72c   :  { %6164 = vmatprep.subr.bf16.mxu0 %v8091_v6  ;;  %6196 = vmatprep.subr.bf16.mxu1 %v8184_v8 }
 0x72f   :  { %6166 = vmatpush1.bf16.msra.mxu0 %v8101_v12  ;;  %6198 = vmatpush1.bf16.msra.mxu1 %v8187_v16 }
 0x730   :  { %6168 = vmatprep.subr.bf16.mxu0 %v8104_v13  ;;  %6200 = vmatprep.subr.bf16.mxu1 %v8190_v17 }
 0x733   :  { %6170 = vmatpush1.bf16.msra.mxu0 %v8114_v20  ;;  %6202 = vmatpush1.bf16.msra.mxu1 %v8193_v24 }
 0x734   :  { %6204 = vmatprep.subr.bf16.mxu0 %v6203_v14  ;;  %6236 = vmatprep.subr.bf16.mxu1 %v6235_v11  ;;  %v2825_v14 = vld [vmem:[#allocation10 + $0xa80] sm:$0xff]  ;;  %v2827_v11 = vld [vmem:[#allocation10 + $0xa90] sm:$0xff] }
 0x735   :  { %v6213_v48 = vpack.c.bf16 %v2829_v18, %v2825_v14 }
 0x736   :  { %2703 = vmatmul.mubr.f32.vlgmr.msra.gmra.mrb[10].mxu0 %v2419_v4  ;;  %2774 = vmatmul.mubr.f32.vlgmr.msra.gmra.mrb[10].mxu1 %v2419_v4  ;;  %v2830_v4 = vld [vmem:[#allocation10 + $0xaa8] sm:$0xff] }
 0x737   :  { %2937 = vmatprep.mubr.f32.mxu0 %v8738_v31  ;;  %3008 = vmatprep.mubr.f32.mxu1 %v8738_v31  ;;  %v6211_v59 = vpack.c.bf16 %v2830_v4, %v2826_v0  ;;  %v2844_v0 = vld [vmem:[#allocation10 + $0xb18] sm:$0xff] }
 0x738   :  { %6206 = vmatpush1.bf16.msra.mxu0 %v6205_v25  ;;  %6238 = vmatpush1.bf16.msra.mxu1 %v6237_v19  ;;  %v2831_v25 = vld [vmem:[#allocation10 + $0xab0] sm:$0xff]  ;;  %v2838_v19 = vld [vmem:[#allocation10 + $0xae8] sm:$0xff]  ;;  %v6251_v14 = vpack.c.bf16 %v2848_v57, %v2844_v0  ;;  %v2864_v0 = vld [vmem:[#allocation10 + $0xbb8] sm:$0xff] }
 0x739   :  { %6208 = vmatprep.subr.bf16.mxu0 %v6207_v43  ;;  %6240 = vmatprep.subr.bf16.mxu1 %v6239_v51  ;;  %v6245_v3 = vpack.c.bf16 %v2831_v25, %v2827_v11  ;;  %v6215_v34 = vpack.c.bf16 %v2838_v19, %v2834_v26  ;;  %v2833_v43 = vld [vmem:[#allocation10 + $0xac0] sm:$0xff]  ;;  %v2835_v51 = vld [vmem:[#allocation10 + $0xad0] sm:$0xff]  ;;  %v2850_v25 = vld [vmem:[#allocation10 + $0xb48] sm:$0xff] }
 0x73a   :  { %v6217_v42 = vpack.c.bf16 %v2837_v41, %v2833_v43  ;;  %v2852_v26 = vld [vmem:[#allocation10 + $0xb58] sm:$0xff]  ;;  %v2861_v57 = vld [vmem:[#allocation10 + $0xba0] sm:$0xff] }
 0x73b   :  { %v6255_v43 = vpack.c.bf16 %v2856_v27, %v2852_v26  ;;  %v2865_v27 = vld [vmem:[#allocation10 + $0xbc0] sm:$0xff] }
 0x73c   :  { %6210 = vmatpush1.bf16.msra.mxu0 %v6209_v49  ;;  %6242 = vmatpush1.bf16.msra.mxu1 %v6241_v56  ;;  %v2839_v49 = vld [vmem:[#allocation10 + $0xaf0] sm:$0xff]  ;;  %v2846_v56 = vld [vmem:[#allocation10 + $0xb28] sm:$0xff] }
 0x73d   :  { %6212 = vmatprep.subr.bf16.mxu0 %v6211_v59  ;;  %6244 = vmatprep.subr.bf16.mxu1 %v6243_v10  ;;  %v6249_v50 = vpack.c.bf16 %v2839_v49, %v2835_v51  ;;  %v6219_v4 = vpack.c.bf16 %v2846_v56, %v2842_v58  ;;  %v2841_v59 = vld [vmem:[#allocation10 + $0xb00] sm:$0xff]  ;;  %v2843_v10 = vld [vmem:[#allocation10 + $0xb10] sm:$0xff]  ;;  %v2858_v49 = vld [vmem:[#allocation10 + $0xb88] sm:$0xff] }
 0x73e   :  { %v6221_v18 = vpack.c.bf16 %v2845_v2, %v2841_v59  ;;  %v2860_v58 = vld [vmem:[#allocation10 + $0xb98] sm:$0xff] }
 0x73f   :  { %v6259_v59 = vpack.c.bf16 %v2864_v0, %v2860_v58 }
 0x740   :  { %6214 = vmatpush1.bf16.msra.mxu0 %v6213_v48  ;;  %6246 = vmatpush1.bf16.msra.mxu1 %v6245_v3  ;;  %v2847_v48 = vld [vmem:[#allocation10 + $0xb30] sm:$0xff]  ;;  %v2854_v3 = vld [vmem:[#allocation10 + $0xb68] sm:$0xff] }
 0x741   :  { %6216 = vmatprep.subr.bf16.mxu0 %v6215_v34  ;;  %6248 = vmatprep.subr.bf16.mxu1 %v6247_v44  ;;  %v6253_v11 = vpack.c.bf16 %v2847_v48, %v2843_v10  ;;  %v6223_v19 = vpack.c.bf16 %v2854_v3, %v2850_v25  ;;  %v2849_v34 = vld [vmem:[#allocation10 + $0xb40] sm:$0xff]  ;;  %v2851_v44 = vld [vmem:[#allocation10 + $0xb50] sm:$0xff]  ;;  %v2866_v10 = vld [vmem:[#allocation10 + $0xbc8] sm:$0xff] }
 0x742   :  { %v6225_v41 = vpack.c.bf16 %v2853_v29, %v2849_v34  ;;  %v2868_v25 = vld [vmem:[#allocation10 + $0xbd8] sm:$0xff]  ;;  %v2869_v34 = vld [vmem:[#allocation10 + $0xbe0] sm:$0xff]  ;;  %v2867_v29 = vld [vmem:[#allocation10 + $0xbd0] sm:$0xff] }
 0x743   :  { %v2872_v3 = vld [vmem:[#allocation10 + $0xbf8] sm:$0xff] }
 0x744   :  { %6218 = vmatpush1.bf16.msra.mxu0 %v6217_v42  ;;  %6250 = vmatpush1.bf16.msra.mxu1 %v6249_v50  ;;  %v2855_v42 = vld [vmem:[#allocation10 + $0xb70] sm:$0xff]  ;;  %v2862_v50 = vld [vmem:[#allocation10 + $0xba8] sm:$0xff] }
 0x745   :  { %6220 = vmatprep.subr.bf16.mxu0 %v6219_v4  ;;  %6252 = vmatprep.subr.bf16.mxu1 %v6251_v14  ;;  %v6257_v51 = vpack.c.bf16 %v2855_v42, %v2851_v44  ;;  %v6227_v56 = vpack.c.bf16 %v2862_v50, %v2858_v49  ;;  %v2857_v4 = vld [vmem:[#allocation10 + $0xb80] sm:$0xff]  ;;  %v2859_v14 = vld [vmem:[#allocation10 + $0xb90] sm:$0xff] }
 0x746   :  { %v6229_v2 = vpack.c.bf16 %v2861_v57, %v2857_v4 }
 0x748   :  { %6222 = vmatpush1.bf16.msra.mxu0 %v6221_v18  ;;  %6254 = vmatpush1.bf16.msra.mxu1 %v6253_v11  ;;  %v2863_v18 = vld [vmem:[#allocation10 + $0xbb0] sm:$0xff]  ;;  %v2870_v11 = vld [vmem:[#allocation10 + $0xbe8] sm:$0xff] }
 0x749   :  { %6224 = vmatprep.subr.bf16.mxu0 %v6223_v19  ;;  %6256 = vmatprep.subr.bf16.mxu1 %v6255_v43  ;;  %v6261_v48 = vpack.c.bf16 %v2863_v18, %v2859_v14  ;;  %v6231_v26 = vpack.c.bf16 %v2870_v11, %v2866_v10  ;;  %v6263_v19 = vpack.c.bf16 %v2872_v3, %v2868_v25 }
 0x74a   :  { %v6233_v43 = vpack.c.bf16 %v2869_v34, %v2865_v27 }
 0x74c   :  { %6226 = vmatpush1.bf16.msra.mxu0 %v6225_v41  ;;  %6258 = vmatpush1.bf16.msra.mxu1 %v6257_v51  ;;  %v2871_v41 = vld [vmem:[#allocation10 + $0xbf0] sm:$0xff] }
 0x74d   :  { %6228 = vmatprep.subr.bf16.mxu0 %v6227_v56  ;;  %6260 = vmatprep.subr.bf16.mxu1 %v6259_v59  ;;  %v6265_v44 = vpack.c.bf16 %v2871_v41, %v2867_v29 }
 0x750   :  { %6230 = vmatpush1.bf16.msra.mxu0 %v6229_v2  ;;  %6262 = vmatpush1.bf16.msra.mxu1 %v6261_v48 }
 0x751   :  { %6232 = vmatprep.subr.bf16.mxu0 %v6231_v26  ;;  %6264 = vmatprep.subr.bf16.mxu1 %v6263_v19 }
 0x754   :  { %6234 = vmatpush1.bf16.msra.mxu0 %v6233_v43  ;;  %6266 = vmatpush1.bf16.msra.mxu1 %v6265_v44 }
 0x755   :  { %6268 = vmatprep.subr.bf16.mxu0 %v8031_v15  ;;  %6300 = vmatprep.subr.bf16.mxu1 %v8117_v23 }
 0x809   :  { %v2704_v42 = vpop.f32.mrb[10].mxu0  ;;  %v2775_v51 = vpop.f32.mrb[10].mxu1 }
 0x80a   :  { %v6975_v49 = vadd.f32 %v2704_v42, %v8220_v36  ;;  %v2706_v50 = vpop.f32.mrb[11].mxu0  ;;  %v2777_v58 = vpop.f32.mrb[11].mxu1  ;;  %v6995_v57 = vadd.f32 %v2775_v51, %v8232_v1  ;;  %v3202_v42 = vld [vmem:[#allocation10 + $0xc28] sm:$0xff]  ;;  %v3200_v51 = vld [vmem:[#allocation10 + $0xc18] sm:$0xff] }
 0x80b   :  { %v6976_v56 = vadd.f32 %v2706_v50, %v8223_v37  ;;  %v6996_v59 = vadd.f32 %v2777_v58, %v8739_v9  ;;  %v3204_v50 = vld [vmem:[#allocation10 + $0xc38] sm:$0xff]  ;;  %v3197_v58 = vld [vmem:[#allocation10 + $0xc00] sm:$0xff] }
 0x80c   :  { %v5377_v0 = vmul.f32 -1.442695, %v6975_v49  ;;  %v5379_v2 = vmul.f32 -1.442695, %v6995_v57  ;;  %v3199_v57 = vld [vmem:[#allocation10 + $0xc10] sm:$0xff] }
 0x80d   :  { %v5378_v4 = vmul.f32 -1.442695, %v6976_v56  ;;  %v3201_v56 = vld [vmem:[#allocation10 + $0xc20] sm:$0xff] }
 0x80e   :  { %7189 = vpow2.f32 %v5377_v0  ;;  %v6363_v0 = vpack.c.bf16 %v3204_v50, %v3200_v51  ;;  %v3220_v51 = vld [vmem:[#allocation10 + $0xcb8] sm:$0xff]  ;;  %v3217_v50 = vld [vmem:[#allocation10 + $0xca0] sm:$0xff] }
 0x80f   :  { %7191 = vpow2.f32 %v5378_v4  ;;  %v6333_v4 = vpack.c.bf16 %v3201_v56, %v3197_v58 }
 0x810   :  { %7193 = vtanh.f32 %v6996_v59  ;;  %v3203_v59 = vld [vmem:[#allocation10 + $0xc30] sm:$0xff] }
 0x811   :  { %7195 = vpow2.f32 %v5379_v2  ;;  %v6365_v2 = vpack.c.bf16 %v3203_v59, %v3199_v57  ;;  %v3222_v59 = vld [vmem:[#allocation10 + $0xcc8] sm:$0xff] }
 0x818   :  { %v7190_v14 = vpop.eup %7189 }
 0x819   :  { %v2793_v18 = vadd.f32 1.0, %v7190_v14  ;;  %v7192_v10 = vpop.eup %7191  ;;  %v3206_v14 = vld [vmem:[#allocation10 + $0xc48] sm:$0xff] }
 0x81a   :  { %v2794_v48 = vadd.f32 1.0, %v7192_v10  ;;  %v7194_v11 = vpop.eup %7193  ;;  %v3208_v10 = vld [vmem:[#allocation10 + $0xc58] sm:$0xff] }
 0x81b   :  { %7197 = vrcp.f32 %v2793_v18  ;;  %v7196_v25 = vpop.eup %7195  ;;  %v3210_v18 = vld [vmem:[#allocation10 + $0xc68] sm:$0xff] }
 0x81c   :  { %7199 = vrcp.f32 %v2794_v48  ;;  %v2795_v27 = vadd.f32 1.0, %v7196_v25  ;;  %v6335_v48 = vpack.c.bf16 %v3210_v18, %v3206_v14  ;;  %v3205_v25 = vld [vmem:[#allocation10 + $0xc40] sm:$0xff]  ;;  %v3224_v14 = vld [vmem:[#allocation10 + $0xcd8] sm:$0xff] }
 0x81e   :  { %7201 = vrcp.f32 %v2795_v27  ;;  %v3207_v27 = vld [vmem:[#allocation10 + $0xc50] sm:$0xff] }
 0x825   :  { %v7198_v3 = vpop.eup %7197 }
 0x826   :  { %v2804_v26 = vmul.f32 %v7198_v3, %v7194_v11  ;;  %v7200_v19 = vpop.eup %7199  ;;  %v3212_v11 = vld [vmem:[#allocation10 + $0xc78] sm:$0xff]  ;;  %v3209_v3 = vld [vmem:[#allocation10 + $0xc60] sm:$0xff] }
 0x827   :  { %v2803_v34 = vmul.f32 %v7200_v19, %v8397_v35  ;;  %v3198_v35 = vld [vmem:[#allocation10 + $0xc08] sm:$0xff]  ;;  %v6337_v19 = vpack.c.bf16 %v3209_v3, %v3205_v25 }
 0x828   :  { %v7202_v43 = vpop.eup %7201  ;;  %v6331_v49 = vpack.c.bf16 %v3202_v42, %v3198_v35  ;;  %v3216_v35 = vld [vmem:[#allocation10 + $0xc98] sm:$0xff] }
 0x829   :  { %v8441_v29 = vadd.f32 %v2804_v26, %v2803_v34  ;;  %v6367_v26 = vpack.c.bf16 %v3212_v11, %v3208_v10  ;;  %v3211_v34 = vld [vmem:[#allocation10 + $0xc70] sm:$0xff]  ;;  %v6371_v58 = vpack.c.bf16 %v3220_v51, %v3216_v35  ;;  %v3228_v10 = vld [vmem:[#allocation10 + $0xcf8] sm:$0xff]  ;;  %v3225_v11 = vld [vmem:[#allocation10 + $0xce0] sm:$0xff] }
 0x82a   :  { %v6375_v25 = vpack.c.bf16 %v3228_v10, %v3224_v14  ;;  %v3236_v35 = vld [vmem:[#allocation10 + $0xd38] sm:$0xff]  ;;  %v3233_v51 = vld [vmem:[#allocation10 + $0xd20] sm:$0xff] }
 0x82b   :  { %7203 = vtanh.f32 %v8441_v29  ;;  %v3244_v14 = vld [vmem:[#allocation10 + $0xd78] sm:$0xff]  ;;  %v3241_v10 = vld [vmem:[#allocation10 + $0xd60] sm:$0xff] }
 0x835   :  { %v7204_v41 = vpop.eup %7203 }
 0x836   :  { %v2807_v44 = vmul.f32 %v7204_v41, %v7202_v43  ;;  %v6369_v43 = vpack.c.bf16 %v3211_v34, %v3207_v27  ;;  %v3214_v41 = vld [vmem:[#allocation10 + $0xc88] sm:$0xff] }
 0x837   :  { %v3230_v34 = vld [vmem:[#allocation10 + $0xd08] sm:$0xff] }
 0x838   :  { %2938 = vmatmul.mubr.f32.vlgmr.msra.gmra.mrb[20].mxu0 %v2807_v44  ;;  %3009 = vmatmul.mubr.f32.vlgmr.msra.gmra.mrb[22].mxu1 %v2807_v44 }
 0x839   :  { %6270 = vmatpush1.bf16.msra.mxu0 %v8035_v21  ;;  %6302 = vmatpush1.bf16.msra.mxu1 %v8139_v32 }
 0x83a   :  { %6272 = vmatprep.subr.bf16.mxu0 %v8038_v22  ;;  %6304 = vmatprep.subr.bf16.mxu1 %v8141_v33 }
 0x83b   :  { %3090 = vmatprep.mubr.f32.mxu0 %v8738_v31  ;;  %3161 = vmatprep.mubr.f32.mxu1 %v8738_v31 }
 0x83d   :  { %6274 = vmatpush1.bf16.msra.mxu0 %v8046_v28  ;;  %6306 = vmatpush1.bf16.msra.mxu1 %v8149_v38 }
 0x83e   :  { %6276 = vmatprep.subr.bf16.mxu0 %v8049_v30  ;;  %6308 = vmatprep.subr.bf16.mxu1 %v8153_v39 }
 0x841   :  { %6278 = vmatpush1.bf16.msra.mxu0 %v8057_v40  ;;  %6310 = vmatpush1.bf16.msra.mxu1 %v8159_v46 }
 0x842   :  { %6280 = vmatprep.subr.bf16.mxu0 %v8060_v45  ;;  %6312 = vmatprep.subr.bf16.mxu1 %v8162_v47 }
 0x845   :  { %6282 = vmatpush1.bf16.msra.mxu0 %v8066_v54  ;;  %6314 = vmatpush1.bf16.msra.mxu1 %v8167_v52 }
 0x846   :  { %6284 = vmatprep.subr.bf16.mxu0 %v8069_v55  ;;  %6316 = vmatprep.subr.bf16.mxu1 %v8170_v53 }
 0x849   :  { %6286 = vmatpush1.bf16.msra.mxu0 %v8075_v61  ;;  %6318 = vmatpush1.bf16.msra.mxu1 %v8175_v60 }
 0x84a   :  { %6288 = vmatprep.subr.bf16.mxu0 %v8078_v62  ;;  %6320 = vmatprep.subr.bf16.mxu1 %v8178_v63 }
 0x84d   :  { %6290 = vmatpush1.bf16.msra.mxu0 %v8088_v5  ;;  %6322 = vmatpush1.bf16.msra.mxu1 %v8181_v7 }
 0x84e   :  { %6292 = vmatprep.subr.bf16.mxu0 %v8091_v6  ;;  %6324 = vmatprep.subr.bf16.mxu1 %v8184_v8 }
 0x851   :  { %6294 = vmatpush1.bf16.msra.mxu0 %v8101_v12  ;;  %6326 = vmatpush1.bf16.msra.mxu1 %v8187_v16 }
 0x852   :  { %6296 = vmatprep.subr.bf16.mxu0 %v8104_v13  ;;  %6328 = vmatprep.subr.bf16.mxu1 %v8190_v17 }
 0x855   :  { %6298 = vmatpush1.bf16.msra.mxu0 %v8114_v20  ;;  %6330 = vmatpush1.bf16.msra.mxu1 %v8193_v24 }
 0x856   :  { %6332 = vmatprep.subr.bf16.mxu0 %v6331_v49  ;;  %6364 = vmatprep.subr.bf16.mxu1 %v6363_v0  ;;  %v3213_v49 = vld [vmem:[#allocation10 + $0xc80] sm:$0xff]  ;;  %v3215_v0 = vld [vmem:[#allocation10 + $0xc90] sm:$0xff] }
 0x857   :  { %v6341_v56 = vpack.c.bf16 %v3217_v50, %v3213_v49 }
 0x858   :  { %3091 = vmatmul.mubr.f32.vlgmr.msra.gmra.mrb[12].mxu0 %v2807_v44  ;;  %3162 = vmatmul.mubr.f32.vlgmr.msra.gmra.mrb[12].mxu1 %v2807_v44  ;;  %v3218_v44 = vld [vmem:[#allocation10 + $0xca8] sm:$0xff] }
 0x859   :  { %3325 = vmatprep.mubr.f32.mxu0 %v8738_v31  ;;  %3396 = vmatprep.mubr.f32.mxu1 %v8738_v31  ;;  %v6339_v42 = vpack.c.bf16 %v3218_v44, %v3214_v41  ;;  %v3232_v41 = vld [vmem:[#allocation10 + $0xd18] sm:$0xff] }
 0x85a   :  { %6334 = vmatpush1.bf16.msra.mxu0 %v6333_v4  ;;  %6366 = vmatpush1.bf16.msra.mxu1 %v6365_v2  ;;  %v3219_v4 = vld [vmem:[#allocation10 + $0xcb0] sm:$0xff]  ;;  %v3226_v2 = vld [vmem:[#allocation10 + $0xce8] sm:$0xff]  ;;  %v6379_v49 = vpack.c.bf16 %v3236_v35, %v3232_v41  ;;  %v3252_v41 = vld [vmem:[#allocation10 + $0xdb8] sm:$0xff] }
 0x85b   :  { %6336 = vmatprep.subr.bf16.mxu0 %v6335_v48  ;;  %6368 = vmatprep.subr.bf16.mxu1 %v6367_v26  ;;  %v6373_v57 = vpack.c.bf16 %v3219_v4, %v3215_v0  ;;  %v6343_v18 = vpack.c.bf16 %v3226_v2, %v3222_v59  ;;  %v3221_v48 = vld [vmem:[#allocation10 + $0xcc0] sm:$0xff]  ;;  %v3223_v26 = vld [vmem:[#allocation10 + $0xcd0] sm:$0xff]  ;;  %v3238_v4 = vld [vmem:[#allocation10 + $0xd48] sm:$0xff] }
 0x85c   :  { %v6345_v3 = vpack.c.bf16 %v3225_v11, %v3221_v48  ;;  %v3240_v59 = vld [vmem:[#allocation10 + $0xd58] sm:$0xff]  ;;  %v3249_v35 = vld [vmem:[#allocation10 + $0xda0] sm:$0xff] }
 0x85d   :  { %v6383_v48 = vpack.c.bf16 %v3244_v14, %v3240_v59  ;;  %v3253_v14 = vld [vmem:[#allocation10 + $0xdc0] sm:$0xff] }
 0x85e   :  { %6338 = vmatpush1.bf16.msra.mxu0 %v6337_v19  ;;  %6370 = vmatpush1.bf16.msra.mxu1 %v6369_v43  ;;  %v3227_v19 = vld [vmem:[#allocation10 + $0xcf0] sm:$0xff]  ;;  %v3234_v43 = vld [vmem:[#allocation10 + $0xd28] sm:$0xff] }
 0x85f   :  { %6340 = vmatprep.subr.bf16.mxu0 %v6339_v42  ;;  %6372 = vmatprep.subr.bf16.mxu1 %v6371_v58  ;;  %v6377_v27 = vpack.c.bf16 %v3227_v19, %v3223_v26  ;;  %v6347_v44 = vpack.c.bf16 %v3234_v43, %v3230_v34  ;;  %v3229_v42 = vld [vmem:[#allocation10 + $0xd00] sm:$0xff]  ;;  %v3231_v58 = vld [vmem:[#allocation10 + $0xd10] sm:$0xff]  ;;  %v3246_v19 = vld [vmem:[#allocation10 + $0xd88] sm:$0xff] }
 0x860   :  { %v6349_v50 = vpack.c.bf16 %v3233_v51, %v3229_v42  ;;  %v3248_v34 = vld [vmem:[#allocation10 + $0xd98] sm:$0xff] }
 0x861   :  { %v6387_v42 = vpack.c.bf16 %v3252_v41, %v3248_v34 }
 0x862   :  { %6342 = vmatpush1.bf16.msra.mxu0 %v6341_v56  ;;  %6374 = vmatpush1.bf16.msra.mxu1 %v6373_v57  ;;  %v3235_v56 = vld [vmem:[#allocation10 + $0xd30] sm:$0xff]  ;;  %v3242_v57 = vld [vmem:[#allocation10 + $0xd68] sm:$0xff] }
 0x863   :  { %6344 = vmatprep.subr.bf16.mxu0 %v6343_v18  ;;  %6376 = vmatprep.subr.bf16.mxu1 %v6375_v25  ;;  %v6381_v0 = vpack.c.bf16 %v3235_v56, %v3231_v58  ;;  %v6351_v2 = vpack.c.bf16 %v3242_v57, %v3238_v4  ;;  %v3237_v18 = vld [vmem:[#allocation10 + $0xd40] sm:$0xff]  ;;  %v3239_v25 = vld [vmem:[#allocation10 + $0xd50] sm:$0xff]  ;;  %v3254_v58 = vld [vmem:[#allocation10 + $0xdc8] sm:$0xff] }
 0x864   :  { %v6353_v11 = vpack.c.bf16 %v3241_v10, %v3237_v18  ;;  %v3256_v4 = vld [vmem:[#allocation10 + $0xdd8] sm:$0xff]  ;;  %v3257_v18 = vld [vmem:[#allocation10 + $0xde0] sm:$0xff]  ;;  %v3255_v10 = vld [vmem:[#allocation10 + $0xdd0] sm:$0xff] }
 0x865   :  { %v3260_v57 = vld [vmem:[#allocation10 + $0xdf8] sm:$0xff] }
 0x866   :  { %6346 = vmatpush1.bf16.msra.mxu0 %v6345_v3  ;;  %6378 = vmatpush1.bf16.msra.mxu1 %v6377_v27  ;;  %v3243_v3 = vld [vmem:[#allocation10 + $0xd70] sm:$0xff]  ;;  %v3250_v27 = vld [vmem:[#allocation10 + $0xda8] sm:$0xff] }
 0x867   :  { %6348 = vmatprep.subr.bf16.mxu0 %v6347_v44  ;;  %6380 = vmatprep.subr.bf16.mxu1 %v6379_v49  ;;  %v6385_v26 = vpack.c.bf16 %v3243_v3, %v3239_v25  ;;  %v6355_v43 = vpack.c.bf16 %v3250_v27, %v3246_v19  ;;  %v3245_v44 = vld [vmem:[#allocation10 + $0xd80] sm:$0xff]  ;;  %v3247_v49 = vld [vmem:[#allocation10 + $0xd90] sm:$0xff] }
 0x868   :  { %v6357_v51 = vpack.c.bf16 %v3249_v35, %v3245_v44 }
 0x86a   :  { %6350 = vmatpush1.bf16.msra.mxu0 %v6349_v50  ;;  %6382 = vmatpush1.bf16.msra.mxu1 %v6381_v0  ;;  %v3251_v50 = vld [vmem:[#allocation10 + $0xdb0] sm:$0xff]  ;;  %v3258_v0 = vld [vmem:[#allocation10 + $0xde8] sm:$0xff] }
 0x86b   :  { %6352 = vmatprep.subr.bf16.mxu0 %v6351_v2  ;;  %6384 = vmatprep.subr.bf16.mxu1 %v6383_v48  ;;  %v6389_v56 = vpack.c.bf16 %v3251_v50, %v3247_v49  ;;  %v6359_v59 = vpack.c.bf16 %v3258_v0, %v3254_v58  ;;  %v6391_v2 = vpack.c.bf16 %v3260_v57, %v3256_v4 }
 0x86c   :  { %v6361_v48 = vpack.c.bf16 %v3257_v18, %v3253_v14 }
 0x86e   :  { %6354 = vmatpush1.bf16.msra.mxu0 %v6353_v11  ;;  %6386 = vmatpush1.bf16.msra.mxu1 %v6385_v26  ;;  %v3259_v11 = vld [vmem:[#allocation10 + $0xdf0] sm:$0xff] }
 0x86f   :  { %6356 = vmatprep.subr.bf16.mxu0 %v6355_v43  ;;  %6388 = vmatprep.subr.bf16.mxu1 %v6387_v42  ;;  %v6393_v25 = vpack.c.bf16 %v3259_v11, %v3255_v10 }
 0x872   :  { %6358 = vmatpush1.bf16.msra.mxu0 %v6357_v51  ;;  %6390 = vmatpush1.bf16.msra.mxu1 %v6389_v56 }
 0x873   :  { %6360 = vmatprep.subr.bf16.mxu0 %v6359_v59  ;;  %6392 = vmatprep.subr.bf16.mxu1 %v6391_v2 }
 0x876   :  { %6362 = vmatpush1.bf16.msra.mxu0 %v6361_v48  ;;  %6394 = vmatpush1.bf16.msra.mxu1 %v6393_v25 }
 0x877   :  { %6396 = vmatprep.subr.bf16.mxu0 %v8031_v15  ;;  %6428 = vmatprep.subr.bf16.mxu1 %v8117_v23 }
 0x92b   :  { %v3092_v3 = vpop.f32.mrb[12].mxu0  ;;  %v3163_v26 = vpop.f32.mrb[12].mxu1 }
 0x92c   :  { %v6977_v19 = vadd.f32 %v3092_v3, %v8220_v36  ;;  %v3094_v27 = vpop.f32.mrb[13].mxu0  ;;  %v3165_v34 = vpop.f32.mrb[13].mxu1  ;;  %v6997_v35 = vadd.f32 %v3163_v26, %v8232_v1  ;;  %v3590_v3 = vld [vmem:[#allocation10 + $0xe28] sm:$0xff]  ;;  %v3588_v26 = vld [vmem:[#allocation10 + $0xe18] sm:$0xff] }
 0x92d   :  { %v6978_v43 = vadd.f32 %v3094_v27, %v8223_v37  ;;  %v6998_v42 = vadd.f32 %v3165_v34, %v8739_v9  ;;  %v3592_v27 = vld [vmem:[#allocation10 + $0xe38] sm:$0xff]  ;;  %v3585_v34 = vld [vmem:[#allocation10 + $0xe00] sm:$0xff] }
 0x92e   :  { %v5380_v41 = vmul.f32 -1.442695, %v6977_v19  ;;  %v5382_v51 = vmul.f32 -1.442695, %v6997_v35  ;;  %v3587_v35 = vld [vmem:[#allocation10 + $0xe10] sm:$0xff] }
 0x92f   :  { %v5381_v44 = vmul.f32 -1.442695, %v6978_v43  ;;  %v3589_v43 = vld [vmem:[#allocation10 + $0xe20] sm:$0xff] }
 0x930   :  { %7205 = vpow2.f32 %v5380_v41  ;;  %v6491_v41 = vpack.c.bf16 %v3592_v27, %v3588_v26  ;;  %v3608_v26 = vld [vmem:[#allocation10 + $0xeb8] sm:$0xff]  ;;  %v3605_v27 = vld [vmem:[#allocation10 + $0xea0] sm:$0xff] }
 0x931   :  { %7207 = vpow2.f32 %v5381_v44  ;;  %v6461_v44 = vpack.c.bf16 %v3589_v43, %v3585_v34 }
 0x932   :  { %7209 = vtanh.f32 %v6998_v42  ;;  %v3591_v42 = vld [vmem:[#allocation10 + $0xe30] sm:$0xff] }
 0x933   :  { %7211 = vpow2.f32 %v5382_v51  ;;  %v6493_v51 = vpack.c.bf16 %v3591_v42, %v3587_v35  ;;  %v3610_v42 = vld [vmem:[#allocation10 + $0xec8] sm:$0xff] }
 0x93a   :  { %v7206_v49 = vpop.eup %7205 }
 0x93b   :  { %v3181_v50 = vadd.f32 1.0, %v7206_v49  ;;  %v7208_v58 = vpop.eup %7207  ;;  %v3594_v49 = vld [vmem:[#allocation10 + $0xe48] sm:$0xff] }
 0x93c   :  { %v3182_v56 = vadd.f32 1.0, %v7208_v58  ;;  %v7210_v0 = vpop.eup %7209  ;;  %v3596_v58 = vld [vmem:[#allocation10 + $0xe58] sm:$0xff] }
 0x93d   :  { %7213 = vrcp.f32 %v3181_v50  ;;  %v7212_v4 = vpop.eup %7211  ;;  %v3598_v50 = vld [vmem:[#allocation10 + $0xe68] sm:$0xff] }
 0x93e   :  { %7215 = vrcp.f32 %v3182_v56  ;;  %v3183_v14 = vadd.f32 1.0, %v7212_v4  ;;  %v6463_v56 = vpack.c.bf16 %v3598_v50, %v3594_v49  ;;  %v3593_v4 = vld [vmem:[#allocation10 + $0xe40] sm:$0xff]  ;;  %v3612_v49 = vld [vmem:[#allocation10 + $0xed8] sm:$0xff] }
 0x940   :  { %7217 = vrcp.f32 %v3183_v14  ;;  %v3595_v14 = vld [vmem:[#allocation10 + $0xe50] sm:$0xff] }
 0x947   :  { %v7214_v57 = vpop.eup %7213 }
 0x948   :  { %v3192_v59 = vmul.f32 %v7214_v57, %v7210_v0  ;;  %v7216_v2 = vpop.eup %7215  ;;  %v3600_v0 = vld [vmem:[#allocation10 + $0xe78] sm:$0xff]  ;;  %v3597_v57 = vld [vmem:[#allocation10 + $0xe60] sm:$0xff] }
 0x949   :  { %v3191_v18 = vmul.f32 %v7216_v2, %v8441_v29  ;;  %v3586_v29 = vld [vmem:[#allocation10 + $0xe08] sm:$0xff]  ;;  %v6465_v2 = vpack.c.bf16 %v3597_v57, %v3593_v4 }
 0x94a   :  { %v7218_v48 = vpop.eup %7217  ;;  %v6459_v19 = vpack.c.bf16 %v3590_v3, %v3586_v29  ;;  %v3604_v29 = vld [vmem:[#allocation10 + $0xe98] sm:$0xff] }
 0x94b   :  { %v8485_v10 = vadd.f32 %v3192_v59, %v3191_v18  ;;  %v6495_v59 = vpack.c.bf16 %v3600_v0, %v3596_v58  ;;  %v3599_v18 = vld [vmem:[#allocation10 + $0xe70] sm:$0xff]  ;;  %v6499_v34 = vpack.c.bf16 %v3608_v26, %v3604_v29  ;;  %v3616_v58 = vld [vmem:[#allocation10 + $0xef8] sm:$0xff]  ;;  %v3613_v0 = vld [vmem:[#allocation10 + $0xee0] sm:$0xff] }
 0x94c   :  { %v6503_v4 = vpack.c.bf16 %v3616_v58, %v3612_v49  ;;  %v3624_v29 = vld [vmem:[#allocation10 + $0xf38] sm:$0xff]  ;;  %v3621_v26 = vld [vmem:[#allocation10 + $0xf20] sm:$0xff] }
 0x94d   :  { %7219 = vtanh.f32 %v8485_v10  ;;  %v3632_v49 = vld [vmem:[#allocation10 + $0xf78] sm:$0xff]  ;;  %v3629_v58 = vld [vmem:[#allocation10 + $0xf60] sm:$0xff] }
 0x957   :  { %v7220_v11 = vpop.eup %7219 }
 0x958   :  { %v3195_v25 = vmul.f32 %v7220_v11, %v7218_v48  ;;  %v6497_v48 = vpack.c.bf16 %v3599_v18, %v3595_v14  ;;  %v3602_v11 = vld [vmem:[#allocation10 + $0xe88] sm:$0xff] }
 0x959   :  { %v3618_v18 = vld [vmem:[#allocation10 + $0xf08] sm:$0xff] }
 0x95a   :  { %3326 = vmatmul.mubr.f32.vlgmr.msra.gmra.mrb[20].mxu0 %v3195_v25  ;;  %3397 = vmatmul.mubr.f32.vlgmr.msra.gmra.mrb[22].mxu1 %v3195_v25 }
 0x95b   :  { %6398 = vmatpush1.bf16.msra.mxu0 %v8035_v21  ;;  %6430 = vmatpush1.bf16.msra.mxu1 %v8139_v32 }
 0x95c   :  { %6400 = vmatprep.subr.bf16.mxu0 %v8038_v22  ;;  %6432 = vmatprep.subr.bf16.mxu1 %v8141_v33 }
 0x95d   :  { %3478 = vmatprep.mubr.f32.mxu0 %v8738_v31  ;;  %3549 = vmatprep.mubr.f32.mxu1 %v8738_v31 }
 0x95f   :  { %6402 = vmatpush1.bf16.msra.mxu0 %v8046_v28  ;;  %6434 = vmatpush1.bf16.msra.mxu1 %v8149_v38 }
 0x960   :  { %6404 = vmatprep.subr.bf16.mxu0 %v8049_v30  ;;  %6436 = vmatprep.subr.bf16.mxu1 %v8153_v39 }
 0x963   :  { %6406 = vmatpush1.bf16.msra.mxu0 %v8057_v40  ;;  %6438 = vmatpush1.bf16.msra.mxu1 %v8159_v46 }
 0x964   :  { %6408 = vmatprep.subr.bf16.mxu0 %v8060_v45  ;;  %6440 = vmatprep.subr.bf16.mxu1 %v8162_v47 }
 0x967   :  { %6410 = vmatpush1.bf16.msra.mxu0 %v8066_v54  ;;  %6442 = vmatpush1.bf16.msra.mxu1 %v8167_v52 }
 0x968   :  { %6412 = vmatprep.subr.bf16.mxu0 %v8069_v55  ;;  %6444 = vmatprep.subr.bf16.mxu1 %v8170_v53 }
 0x96b   :  { %6414 = vmatpush1.bf16.msra.mxu0 %v8075_v61  ;;  %6446 = vmatpush1.bf16.msra.mxu1 %v8175_v60 }
 0x96c   :  { %6416 = vmatprep.subr.bf16.mxu0 %v8078_v62  ;;  %6448 = vmatprep.subr.bf16.mxu1 %v8178_v63 }
 0x96f   :  { %6418 = vmatpush1.bf16.msra.mxu0 %v8088_v5  ;;  %6450 = vmatpush1.bf16.msra.mxu1 %v8181_v7 }
 0x970   :  { %6420 = vmatprep.subr.bf16.mxu0 %v8091_v6  ;;  %6452 = vmatprep.subr.bf16.mxu1 %v8184_v8 }
 0x973   :  { %6422 = vmatpush1.bf16.msra.mxu0 %v8101_v12  ;;  %6454 = vmatpush1.bf16.msra.mxu1 %v8187_v16 }
 0x974   :  { %6424 = vmatprep.subr.bf16.mxu0 %v8104_v13  ;;  %6456 = vmatprep.subr.bf16.mxu1 %v8190_v17 }
 0x977   :  { %6426 = vmatpush1.bf16.msra.mxu0 %v8114_v20  ;;  %6458 = vmatpush1.bf16.msra.mxu1 %v8193_v24 }
 0x978   :  { %6460 = vmatprep.subr.bf16.mxu0 %v6459_v19  ;;  %6492 = vmatprep.subr.bf16.mxu1 %v6491_v41  ;;  %v3601_v19 = vld [vmem:[#allocation10 + $0xe80] sm:$0xff]  ;;  %v3603_v41 = vld [vmem:[#allocation10 + $0xe90] sm:$0xff] }
 0x979   :  { %v6469_v43 = vpack.c.bf16 %v3605_v27, %v3601_v19 }
 0x97a   :  { %3479 = vmatmul.mubr.f32.vlgmr.msra.gmra.mrb[14].mxu0 %v3195_v25  ;;  %3550 = vmatmul.mubr.f32.vlgmr.msra.gmra.mrb[14].mxu1 %v3195_v25  ;;  %v3606_v25 = vld [vmem:[#allocation10 + $0xea8] sm:$0xff] }
 0x97b   :  { %3713 = vmatprep.mubr.f32.mxu0 %v8738_v31  ;;  %3784 = vmatprep.mubr.f32.mxu1 %v8738_v31  ;;  %v6467_v3 = vpack.c.bf16 %v3606_v25, %v3602_v11  ;;  %v3620_v11 = vld [vmem:[#allocation10 + $0xf18] sm:$0xff] }
 0x97c   :  { %6462 = vmatpush1.bf16.msra.mxu0 %v6461_v44  ;;  %6494 = vmatpush1.bf16.msra.mxu1 %v6493_v51  ;;  %v3607_v44 = vld [vmem:[#allocation10 + $0xeb0] sm:$0xff]  ;;  %v3614_v51 = vld [vmem:[#allocation10 + $0xee8] sm:$0xff]  ;;  %v6507_v19 = vpack.c.bf16 %v3624_v29, %v3620_v11  ;;  %v3640_v11 = vld [vmem:[#allocation10 + $0xfb8] sm:$0xff] }
 0x97d   :  { %6464 = vmatprep.subr.bf16.mxu0 %v6463_v56  ;;  %6496 = vmatprep.subr.bf16.mxu1 %v6495_v59  ;;  %v6501_v35 = vpack.c.bf16 %v3607_v44, %v3603_v41  ;;  %v6471_v50 = vpack.c.bf16 %v3614_v51, %v3610_v42  ;;  %v3609_v56 = vld [vmem:[#allocation10 + $0xec0] sm:$0xff]  ;;  %v3611_v59 = vld [vmem:[#allocation10 + $0xed0] sm:$0xff]  ;;  %v3626_v44 = vld [vmem:[#allocation10 + $0xf48] sm:$0xff] }
 0x97e   :  { %v6473_v57 = vpack.c.bf16 %v3613_v0, %v3609_v56  ;;  %v3628_v42 = vld [vmem:[#allocation10 + $0xf58] sm:$0xff]  ;;  %v3637_v29 = vld [vmem:[#allocation10 + $0xfa0] sm:$0xff] }
 0x97f   :  { %v6511_v56 = vpack.c.bf16 %v3632_v49, %v3628_v42  ;;  %v3641_v49 = vld [vmem:[#allocation10 + $0xfc0] sm:$0xff] }
 0x980   :  { %6466 = vmatpush1.bf16.msra.mxu0 %v6465_v2  ;;  %6498 = vmatpush1.bf16.msra.mxu1 %v6497_v48  ;;  %v3615_v2 = vld [vmem:[#allocation10 + $0xef0] sm:$0xff]  ;;  %v3622_v48 = vld [vmem:[#allocation10 + $0xf28] sm:$0xff] }
 0x981   :  { %6468 = vmatprep.subr.bf16.mxu0 %v6467_v3  ;;  %6500 = vmatprep.subr.bf16.mxu1 %v6499_v34  ;;  %v6505_v14 = vpack.c.bf16 %v3615_v2, %v3611_v59  ;;  %v6475_v25 = vpack.c.bf16 %v3622_v48, %v3618_v18  ;;  %v3617_v3 = vld [vmem:[#allocation10 + $0xf00] sm:$0xff]  ;;  %v3619_v34 = vld [vmem:[#allocation10 + $0xf10] sm:$0xff]  ;;  %v3634_v2 = vld [vmem:[#allocation10 + $0xf88] sm:$0xff] }
 0x982   :  { %v6477_v27 = vpack.c.bf16 %v3621_v26, %v3617_v3  ;;  %v3636_v18 = vld [vmem:[#allocation10 + $0xf98] sm:$0xff] }
 0x983   :  { %v6515_v3 = vpack.c.bf16 %v3640_v11, %v3636_v18 }
 0x984   :  { %6470 = vmatpush1.bf16.msra.mxu0 %v6469_v43  ;;  %6502 = vmatpush1.bf16.msra.mxu1 %v6501_v35  ;;  %v3623_v43 = vld [vmem:[#allocation10 + $0xf30] sm:$0xff]  ;;  %v3630_v35 = vld [vmem:[#allocation10 + $0xf68] sm:$0xff] }
 0x985   :  { %6472 = vmatprep.subr.bf16.mxu0 %v6471_v50  ;;  %6504 = vmatprep.subr.bf16.mxu1 %v6503_v4  ;;  %v6509_v41 = vpack.c.bf16 %v3623_v43, %v3619_v34  ;;  %v6479_v51 = vpack.c.bf16 %v3630_v35, %v3626_v44  ;;  %v3625_v50 = vld [vmem:[#allocation10 + $0xf40] sm:$0xff]  ;;  %v3627_v4 = vld [vmem:[#allocation10 + $0xf50] sm:$0xff]  ;;  %v3642_v34 = vld [vmem:[#allocation10 + $0xfc8] sm:$0xff] }
 0x986   :  { %v6481_v0 = vpack.c.bf16 %v3629_v58, %v3625_v50  ;;  %v3644_v44 = vld [vmem:[#allocation10 + $0xfd8] sm:$0xff]  ;;  %v3645_v50 = vld [vmem:[#allocation10 + $0xfe0] sm:$0xff]  ;;  %v3643_v58 = vld [vmem:[#allocation10 + $0xfd0] sm:$0xff] }
 0x987   :  { %v3648_v35 = vld [vmem:[#allocation10 + $0xff8] sm:$0xff] }
 0x988   :  { %6474 = vmatpush1.bf16.msra.mxu0 %v6473_v57  ;;  %6506 = vmatpush1.bf16.msra.mxu1 %v6505_v14  ;;  %v3631_v57 = vld [vmem:[#allocation10 + $0xf70] sm:$0xff]  ;;  %v3638_v14 = vld [vmem:[#allocation10 + $0xfa8] sm:$0xff] }
 0x989   :  { %6476 = vmatprep.subr.bf16.mxu0 %v6475_v25  ;;  %6508 = vmatprep.subr.bf16.mxu1 %v6507_v19  ;;  %v6513_v59 = vpack.c.bf16 %v3631_v57, %v3627_v4  ;;  %v6483_v48 = vpack.c.bf16 %v3638_v14, %v3634_v2  ;;  %v3633_v25 = vld [vmem:[#allocation10 + $0xf80] sm:$0xff]  ;;  %v3635_v19 = vld [vmem:[#allocation10 + $0xf90] sm:$0xff] }
 0x98a   :  { %v6485_v26 = vpack.c.bf16 %v3637_v29, %v3633_v25 }
 0x98c   :  { %6478 = vmatpush1.bf16.msra.mxu0 %v6477_v27  ;;  %6510 = vmatpush1.bf16.msra.mxu1 %v6509_v41  ;;  %v3639_v27 = vld [vmem:[#allocation10 + $0xfb0] sm:$0xff]  ;;  %v3646_v41 = vld [vmem:[#allocation10 + $0xfe8] sm:$0xff] }
 0x98d   :  { %6480 = vmatprep.subr.bf16.mxu0 %v6479_v51  ;;  %6512 = vmatprep.subr.bf16.mxu1 %v6511_v56  ;;  %v6517_v43 = vpack.c.bf16 %v3639_v27, %v3635_v19  ;;  %v6487_v42 = vpack.c.bf16 %v3646_v41, %v3642_v34  ;;  %v6519_v51 = vpack.c.bf16 %v3648_v35, %v3644_v44 }
 0x98e   :  { %v6489_v56 = vpack.c.bf16 %v3645_v50, %v3641_v49 }
 0x990   :  { %6482 = vmatpush1.bf16.msra.mxu0 %v6481_v0  ;;  %6514 = vmatpush1.bf16.msra.mxu1 %v6513_v59  ;;  %v3647_v0 = vld [vmem:[#allocation10 + $0xff0] sm:$0xff] }
 0x991   :  { %6484 = vmatprep.subr.bf16.mxu0 %v6483_v48  ;;  %6516 = vmatprep.subr.bf16.mxu1 %v6515_v3  ;;  %v6521_v4 = vpack.c.bf16 %v3647_v0, %v3643_v58 }
 0x994   :  { %6486 = vmatpush1.bf16.msra.mxu0 %v6485_v26  ;;  %6518 = vmatpush1.bf16.msra.mxu1 %v6517_v43 }
 0x995   :  { %6488 = vmatprep.subr.bf16.mxu0 %v6487_v42  ;;  %6520 = vmatprep.subr.bf16.mxu1 %v6519_v51 }
 0x998   :  { %6490 = vmatpush1.bf16.msra.mxu0 %v6489_v56  ;;  %6522 = vmatpush1.bf16.msra.mxu1 %v6521_v4 }
 0x999   :  { %6524 = vmatprep.subr.bf16.mxu0 %v8031_v15  ;;  %6556 = vmatprep.subr.bf16.mxu1 %v8117_v23 }
 0xa4d   :  { %v3480_v57 = vpop.f32.mrb[14].mxu0  ;;  %v3551_v59 = vpop.f32.mrb[14].mxu1 }
 0xa4e   :  { %v6979_v2 = vadd.f32 %v3480_v57, %v8220_v36  ;;  %v3482_v14 = vpop.f32.mrb[15].mxu0  ;;  %v3553_v18 = vpop.f32.mrb[15].mxu1  ;;  %v6999_v29 = vadd.f32 %v3551_v59, %v8232_v1  ;;  %v3978_v57 = vld [vmem:[#allocation10 + $0x1028] sm:$0xff]  ;;  %v3976_v59 = vld [vmem:[#allocation10 + $0x1018] sm:$0xff] }
 0xa4f   :  { %v6980_v48 = vadd.f32 %v3482_v14, %v8223_v37  ;;  %v7000_v3 = vadd.f32 %v3553_v18, %v8739_v9  ;;  %v3980_v14 = vld [vmem:[#allocation10 + $0x1038] sm:$0xff]  ;;  %v3973_v18 = vld [vmem:[#allocation10 + $0x1000] sm:$0xff] }
 0xa50   :  { %v5383_v11 = vmul.f32 -1.442695, %v6979_v2  ;;  %v5385_v26 = vmul.f32 -1.442695, %v6999_v29  ;;  %v3975_v29 = vld [vmem:[#allocation10 + $0x1010] sm:$0xff] }
 0xa51   :  { %v5384_v25 = vmul.f32 -1.442695, %v6980_v48  ;;  %v3977_v48 = vld [vmem:[#allocation10 + $0x1020] sm:$0xff] }
 0xa52   :  { %7221 = vpow2.f32 %v5383_v11  ;;  %v6619_v11 = vpack.c.bf16 %v3980_v14, %v3976_v59  ;;  %v3996_v59 = vld [vmem:[#allocation10 + $0x10b8] sm:$0xff]  ;;  %v3993_v14 = vld [vmem:[#allocation10 + $0x10a0] sm:$0xff] }
 0xa53   :  { %7223 = vpow2.f32 %v5384_v25  ;;  %v6589_v25 = vpack.c.bf16 %v3977_v48, %v3973_v18 }
 0xa54   :  { %7225 = vtanh.f32 %v7000_v3  ;;  %v3979_v3 = vld [vmem:[#allocation10 + $0x1030] sm:$0xff] }
 0xa55   :  { %7227 = vpow2.f32 %v5385_v26  ;;  %v6621_v26 = vpack.c.bf16 %v3979_v3, %v3975_v29  ;;  %v3998_v3 = vld [vmem:[#allocation10 + $0x10c8] sm:$0xff] }
 0xa5c   :  { %v7222_v19 = vpop.eup %7221 }
 0xa5d   :  { %v3569_v27 = vadd.f32 1.0, %v7222_v19  ;;  %v7224_v34 = vpop.eup %7223  ;;  %v3982_v19 = vld [vmem:[#allocation10 + $0x1048] sm:$0xff] }
 0xa5e   :  { %v3570_v43 = vadd.f32 1.0, %v7224_v34  ;;  %v7226_v41 = vpop.eup %7225  ;;  %v3984_v34 = vld [vmem:[#allocation10 + $0x1058] sm:$0xff] }
 0xa5f   :  { %7229 = vrcp.f32 %v3569_v27  ;;  %v7228_v44 = vpop.eup %7227  ;;  %v3986_v27 = vld [vmem:[#allocation10 + $0x1068] sm:$0xff] }
 0xa60   :  { %7231 = vrcp.f32 %v3570_v43  ;;  %v3571_v49 = vadd.f32 1.0, %v7228_v44  ;;  %v6591_v43 = vpack.c.bf16 %v3986_v27, %v3982_v19  ;;  %v3981_v44 = vld [vmem:[#allocation10 + $0x1040] sm:$0xff]  ;;  %v4000_v19 = vld [vmem:[#allocation10 + $0x10d8] sm:$0xff] }
 0xa62   :  { %7233 = vrcp.f32 %v3571_v49  ;;  %v3983_v49 = vld [vmem:[#allocation10 + $0x1050] sm:$0xff] }
 0xa69   :  { %v7230_v35 = vpop.eup %7229 }
 0xa6a   :  { %v3580_v42 = vmul.f32 %v7230_v35, %v7226_v41  ;;  %v7232_v51 = vpop.eup %7231  ;;  %v3988_v41 = vld [vmem:[#allocation10 + $0x1078] sm:$0xff]  ;;  %v3985_v35 = vld [vmem:[#allocation10 + $0x1060] sm:$0xff] }
 0xa6b   :  { %v3579_v50 = vmul.f32 %v7232_v51, %v8485_v10  ;;  %v3974_v10 = vld [vmem:[#allocation10 + $0x1008] sm:$0xff]  ;;  %v6593_v51 = vpack.c.bf16 %v3985_v35, %v3981_v44 }
 0xa6c   :  { %v7234_v56 = vpop.eup %7233  ;;  %v6587_v2 = vpack.c.bf16 %v3978_v57, %v3974_v10  ;;  %v3992_v10 = vld [vmem:[#allocation10 + $0x1098] sm:$0xff] }
 0xa6d   :  { %v8529_v58 = vadd.f32 %v3580_v42, %v3579_v50  ;;  %v6623_v42 = vpack.c.bf16 %v3988_v41, %v3984_v34  ;;  %v3987_v50 = vld [vmem:[#allocation10 + $0x1070] sm:$0xff]  ;;  %v6627_v18 = vpack.c.bf16 %v3996_v59, %v3992_v10  ;;  %v4004_v34 = vld [vmem:[#allocation10 + $0x10f8] sm:$0xff]  ;;  %v4001_v41 = vld [vmem:[#allocation10 + $0x10e0] sm:$0xff] }
 0xa6e   :  { %v6631_v44 = vpack.c.bf16 %v4004_v34, %v4000_v19  ;;  %v4012_v10 = vld [vmem:[#allocation10 + $0x1138] sm:$0xff]  ;;  %v4009_v59 = vld [vmem:[#allocation10 + $0x1120] sm:$0xff] }
 0xa6f   :  { %7235 = vtanh.f32 %v8529_v58  ;;  %v4020_v19 = vld [vmem:[#allocation10 + $0x1178] sm:$0xff]  ;;  %v4017_v34 = vld [vmem:[#allocation10 + $0x1160] sm:$0xff] }
 0xa79   :  { %v7236_v0 = vpop.eup %7235 }
 0xa7a   :  { %v3583_v4 = vmul.f32 %v7236_v0, %v7234_v56  ;;  %v6625_v56 = vpack.c.bf16 %v3987_v50, %v3983_v49  ;;  %v3990_v0 = vld [vmem:[#allocation10 + $0x1088] sm:$0xff] }
 0xa7b   :  { %v4006_v50 = vld [vmem:[#allocation10 + $0x1108] sm:$0xff] }
 0xa7c   :  { %3714 = vmatmul.mubr.f32.vlgmr.msra.gmra.mrb[20].mxu0 %v3583_v4  ;;  %3785 = vmatmul.mubr.f32.vlgmr.msra.gmra.mrb[22].mxu1 %v3583_v4 }
 0xa7d   :  { %6526 = vmatpush1.bf16.msra.mxu0 %v8035_v21  ;;  %6558 = vmatpush1.bf16.msra.mxu1 %v8139_v32 }
 0xa7e   :  { %6528 = vmatprep.subr.bf16.mxu0 %v8038_v22  ;;  %6560 = vmatprep.subr.bf16.mxu1 %v8141_v33 }
 0xa7f   :  { %3866 = vmatprep.mubr.f32.mxu0 %v8738_v31  ;;  %3937 = vmatprep.mubr.f32.mxu1 %v8738_v31 }
 0xa81   :  { %6530 = vmatpush1.bf16.msra.mxu0 %v8046_v28  ;;  %6562 = vmatpush1.bf16.msra.mxu1 %v8149_v38 }
 0xa82   :  { %6532 = vmatprep.subr.bf16.mxu0 %v8049_v30  ;;  %6564 = vmatprep.subr.bf16.mxu1 %v8153_v39 }
 0xa85   :  { %6534 = vmatpush1.bf16.msra.mxu0 %v8057_v40  ;;  %6566 = vmatpush1.bf16.msra.mxu1 %v8159_v46 }
 0xa86   :  { %6536 = vmatprep.subr.bf16.mxu0 %v8060_v45  ;;  %6568 = vmatprep.subr.bf16.mxu1 %v8162_v47 }
 0xa89   :  { %6538 = vmatpush1.bf16.msra.mxu0 %v8066_v54  ;;  %6570 = vmatpush1.bf16.msra.mxu1 %v8167_v52 }
 0xa8a   :  { %6540 = vmatprep.subr.bf16.mxu0 %v8069_v55  ;;  %6572 = vmatprep.subr.bf16.mxu1 %v8170_v53 }
 0xa8d   :  { %6542 = vmatpush1.bf16.msra.mxu0 %v8075_v61  ;;  %6574 = vmatpush1.bf16.msra.mxu1 %v8175_v60 }
 0xa8e   :  { %6544 = vmatprep.subr.bf16.mxu0 %v8078_v62  ;;  %6576 = vmatprep.subr.bf16.mxu1 %v8178_v63 }
 0xa91   :  { %6546 = vmatpush1.bf16.msra.mxu0 %v8088_v5  ;;  %6578 = vmatpush1.bf16.msra.mxu1 %v8181_v7 }
 0xa92   :  { %6548 = vmatprep.subr.bf16.mxu0 %v8091_v6  ;;  %6580 = vmatprep.subr.bf16.mxu1 %v8184_v8 }
 0xa95   :  { %6550 = vmatpush1.bf16.msra.mxu0 %v8101_v12  ;;  %6582 = vmatpush1.bf16.msra.mxu1 %v8187_v16 }
 0xa96   :  { %6552 = vmatprep.subr.bf16.mxu0 %v8104_v13  ;;  %6584 = vmatprep.subr.bf16.mxu1 %v8190_v17 }
 0xa99   :  { %6554 = vmatpush1.bf16.msra.mxu0 %v8114_v20  ;;  %6586 = vmatpush1.bf16.msra.mxu1 %v8193_v24 }
 0xa9a   :  { %6588 = vmatprep.subr.bf16.mxu0 %v6587_v2  ;;  %6620 = vmatprep.subr.bf16.mxu1 %v6619_v11  ;;  %v3989_v2 = vld [vmem:[#allocation10 + $0x1080] sm:$0xff]  ;;  %v3991_v11 = vld [vmem:[#allocation10 + $0x1090] sm:$0xff] }
 0xa9b   :  { %v6597_v48 = vpack.c.bf16 %v3993_v14, %v3989_v2 }
 0xa9c   :  { %3867 = vmatmul.mubr.f32.vlgmr.msra.gmra.mrb[16].mxu0 %v3583_v4  ;;  %3938 = vmatmul.mubr.f32.vlgmr.msra.gmra.mrb[16].mxu1 %v3583_v4  ;;  %v3994_v4 = vld [vmem:[#allocation10 + $0x10a8] sm:$0xff] }
 0xa9d   :  { %4101 = vmatprep.mubr.f32.mxu0 %v8738_v31  ;;  %4172 = vmatprep.mubr.f32.mxu1 %v8738_v31  ;;  %v6595_v57 = vpack.c.bf16 %v3994_v4, %v3990_v0  ;;  %v4008_v0 = vld [vmem:[#allocation10 + $0x1118] sm:$0xff] }
 0xa9e   :  { %6590 = vmatpush1.bf16.msra.mxu0 %v6589_v25  ;;  %6622 = vmatpush1.bf16.msra.mxu1 %v6621_v26  ;;  %v3995_v25 = vld [vmem:[#allocation10 + $0x10b0] sm:$0xff]  ;;  %v4002_v26 = vld [vmem:[#allocation10 + $0x10e8] sm:$0xff]  ;;  %v6635_v2 = vpack.c.bf16 %v4012_v10, %v4008_v0  ;;  %v4028_v0 = vld [vmem:[#allocation10 + $0x11b8] sm:$0xff] }
 0xa9f   :  { %6592 = vmatprep.subr.bf16.mxu0 %v6591_v43  ;;  %6624 = vmatprep.subr.bf16.mxu1 %v6623_v42  ;;  %v6629_v29 = vpack.c.bf16 %v3995_v25, %v3991_v11  ;;  %v6599_v27 = vpack.c.bf16 %v4002_v26, %v3998_v3  ;;  %v3997_v43 = vld [vmem:[#allocation10 + $0x10c0] sm:$0xff]  ;;  %v3999_v42 = vld [vmem:[#allocation10 + $0x10d0] sm:$0xff]  ;;  %v4014_v25 = vld [vmem:[#allocation10 + $0x1148] sm:$0xff] }
 0xaa0   :  { %v6601_v35 = vpack.c.bf16 %v4001_v41, %v3997_v43  ;;  %v4016_v3 = vld [vmem:[#allocation10 + $0x1158] sm:$0xff]  ;;  %v4025_v10 = vld [vmem:[#allocation10 + $0x11a0] sm:$0xff] }
 0xaa1   :  { %v6639_v43 = vpack.c.bf16 %v4020_v19, %v4016_v3  ;;  %v4029_v19 = vld [vmem:[#allocation10 + $0x11c0] sm:$0xff] }
 0xaa2   :  { %6594 = vmatpush1.bf16.msra.mxu0 %v6593_v51  ;;  %6626 = vmatpush1.bf16.msra.mxu1 %v6625_v56  ;;  %v4003_v51 = vld [vmem:[#allocation10 + $0x10f0] sm:$0xff]  ;;  %v4010_v56 = vld [vmem:[#allocation10 + $0x1128] sm:$0xff] }
 0xaa3   :  { %6596 = vmatprep.subr.bf16.mxu0 %v6595_v57  ;;  %6628 = vmatprep.subr.bf16.mxu1 %v6627_v18  ;;  %v6633_v49 = vpack.c.bf16 %v4003_v51, %v3999_v42  ;;  %v6603_v4 = vpack.c.bf16 %v4010_v56, %v4006_v50  ;;  %v4005_v57 = vld [vmem:[#allocation10 + $0x1100] sm:$0xff]  ;;  %v4007_v18 = vld [vmem:[#allocation10 + $0x1110] sm:$0xff]  ;;  %v4022_v51 = vld [vmem:[#allocation10 + $0x1188] sm:$0xff] }
 0xaa4   :  { %v6605_v14 = vpack.c.bf16 %v4009_v59, %v4005_v57  ;;  %v4024_v50 = vld [vmem:[#allocation10 + $0x1198] sm:$0xff] }
 0xaa5   :  { %v6643_v57 = vpack.c.bf16 %v4028_v0, %v4024_v50 }
 0xaa6   :  { %6598 = vmatpush1.bf16.msra.mxu0 %v6597_v48  ;;  %6630 = vmatpush1.bf16.msra.mxu1 %v6629_v29  ;;  %v4011_v48 = vld [vmem:[#allocation10 + $0x1130] sm:$0xff]  ;;  %v4018_v29 = vld [vmem:[#allocation10 + $0x1168] sm:$0xff] }
 0xaa7   :  { %6600 = vmatprep.subr.bf16.mxu0 %v6599_v27  ;;  %6632 = vmatprep.subr.bf16.mxu1 %v6631_v44  ;;  %v6637_v11 = vpack.c.bf16 %v4011_v48, %v4007_v18  ;;  %v6607_v26 = vpack.c.bf16 %v4018_v29, %v4014_v25  ;;  %v4013_v27 = vld [vmem:[#allocation10 + $0x1140] sm:$0xff]  ;;  %v4015_v44 = vld [vmem:[#allocation10 + $0x1150] sm:$0xff]  ;;  %v4030_v18 = vld [vmem:[#allocation10 + $0x11c8] sm:$0xff] }
 0xaa8   :  { %v6609_v41 = vpack.c.bf16 %v4017_v34, %v4013_v27  ;;  %v4032_v25 = vld [vmem:[#allocation10 + $0x11d8] sm:$0xff]  ;;  %v4033_v27 = vld [vmem:[#allocation10 + $0x11e0] sm:$0xff]  ;;  %v4031_v34 = vld [vmem:[#allocation10 + $0x11d0] sm:$0xff] }
 0xaa9   :  { %v4036_v29 = vld [vmem:[#allocation10 + $0x11f8] sm:$0xff] }
 0xaaa   :  { %6602 = vmatpush1.bf16.msra.mxu0 %v6601_v35  ;;  %6634 = vmatpush1.bf16.msra.mxu1 %v6633_v49  ;;  %v4019_v35 = vld [vmem:[#allocation10 + $0x1170] sm:$0xff]  ;;  %v4026_v49 = vld [vmem:[#allocation10 + $0x11a8] sm:$0xff] }
 0xaab   :  { %6604 = vmatprep.subr.bf16.mxu0 %v6603_v4  ;;  %6636 = vmatprep.subr.bf16.mxu1 %v6635_v2  ;;  %v6641_v42 = vpack.c.bf16 %v4019_v35, %v4015_v44  ;;  %v6611_v56 = vpack.c.bf16 %v4026_v49, %v4022_v51  ;;  %v4021_v4 = vld [vmem:[#allocation10 + $0x1180] sm:$0xff]  ;;  %v4023_v2 = vld [vmem:[#allocation10 + $0x1190] sm:$0xff] }
 0xaac   :  { %v6613_v59 = vpack.c.bf16 %v4025_v10, %v4021_v4 }
 0xaae   :  { %6606 = vmatpush1.bf16.msra.mxu0 %v6605_v14  ;;  %6638 = vmatpush1.bf16.msra.mxu1 %v6637_v11  ;;  %v4027_v14 = vld [vmem:[#allocation10 + $0x11b0] sm:$0xff]  ;;  %v4034_v11 = vld [vmem:[#allocation10 + $0x11e8] sm:$0xff] }
 0xaaf   :  { %6608 = vmatprep.subr.bf16.mxu0 %v6607_v26  ;;  %6640 = vmatprep.subr.bf16.mxu1 %v6639_v43  ;;  %v6645_v48 = vpack.c.bf16 %v4027_v14, %v4023_v2  ;;  %v6615_v3 = vpack.c.bf16 %v4034_v11, %v4030_v18  ;;  %v6647_v26 = vpack.c.bf16 %v4036_v29, %v4032_v25 }
 0xab0   :  { %v6617_v43 = vpack.c.bf16 %v4033_v27, %v4029_v19 }
 0xab2   :  { %6610 = vmatpush1.bf16.msra.mxu0 %v6609_v41  ;;  %6642 = vmatpush1.bf16.msra.mxu1 %v6641_v42  ;;  %v4035_v41 = vld [vmem:[#allocation10 + $0x11f0] sm:$0xff] }
 0xab3   :  { %6612 = vmatprep.subr.bf16.mxu0 %v6611_v56  ;;  %6644 = vmatprep.subr.bf16.mxu1 %v6643_v57  ;;  %v6649_v44 = vpack.c.bf16 %v4035_v41, %v4031_v34 }
 0xab6   :  { %6614 = vmatpush1.bf16.msra.mxu0 %v6613_v59  ;;  %6646 = vmatpush1.bf16.msra.mxu1 %v6645_v48 }
 0xab7   :  { %6616 = vmatprep.subr.bf16.mxu0 %v6615_v3  ;;  %6648 = vmatprep.subr.bf16.mxu1 %v6647_v26 }
 0xaba   :  { %6618 = vmatpush1.bf16.msra.mxu0 %v6617_v43  ;;  %6650 = vmatpush1.bf16.msra.mxu1 %v6649_v44 }
 0xabb   :  { %6652 = vmatprep.subr.bf16.mxu0 %v8031_v15  ;;  %6684 = vmatprep.subr.bf16.mxu1 %v8117_v23 }
 0xb6f   :  { %v3868_v35 = vpop.f32.mrb[16].mxu0  ;;  %v3939_v42 = vpop.f32.mrb[16].mxu1 }
 0xb70   :  { %v6981_v51 = vadd.f32 %v3868_v35, %v8220_v36  ;;  %v3870_v49 = vpop.f32.mrb[17].mxu0  ;;  %v3941_v50 = vpop.f32.mrb[17].mxu1  ;;  %v7001_v10 = vadd.f32 %v3939_v42, %v8232_v1  ;;  %v4379_v35 = vld [vmem:[#allocation10 + $0x1290] sm:$0xff] }
 0xb71   :  { %v6982_v56 = vadd.f32 %v3870_v49, %v8223_v37  ;;  %v7002_v57 = vadd.f32 %v3941_v50, %v8739_v9  ;;  %v4383_v42 = vld [vmem:[#allocation10 + $0x12b0] sm:$0xff]  ;;  %v4386_v49 = vld [vmem:[#allocation10 + $0x12c8] sm:$0xff] }
 0xb72   :  { %v5386_v0 = vmul.f32 -1.442695, %v6981_v51  ;;  %v5388_v59 = vmul.f32 -1.442695, %v7001_v10  ;;  %v6757_v51 = vpack.c.bf16 %v4383_v42, %v4379_v35  ;;  %v4390_v50 = vld [vmem:[#allocation10 + $0x12e8] sm:$0xff]  ;;  %v4385_v10 = vld [vmem:[#allocation10 + $0x12c0] sm:$0xff] }
 0xb73   :  { %v5387_v4 = vmul.f32 -1.442695, %v6982_v56  ;;  %v4388_v56 = vld [vmem:[#allocation10 + $0x12d8] sm:$0xff]  ;;  %v4421_v35 = vld [vmem:[#allocation10 + $0x13e0] sm:$0xff]  ;;  %v4419_v42 = vld [vmem:[#allocation10 + $0x13d0] sm:$0xff] }
 0xb74   :  { %7237 = vpow2.f32 %v5386_v0  ;;  %v6727_v0 = vpack.c.bf16 %v4390_v50, %v4386_v49 }
 0xb75   :  { %7239 = vpow2.f32 %v5387_v4  ;;  %v4392_v4 = vld [vmem:[#allocation10 + $0x12f8] sm:$0xff] }
 0xb76   :  { %7241 = vtanh.f32 %v7002_v57  ;;  %v4389_v57 = vld [vmem:[#allocation10 + $0x12e0] sm:$0xff] }
 0xb77   :  { %7243 = vpow2.f32 %v5388_v59  ;;  %v6759_v59 = vpack.c.bf16 %v4392_v4, %v4388_v56 }
 0xb7e   :  { %v7238_v15 = vpop.eup %7237 }
 0xb7f   :  { %v3957_v2 = vadd.f32 1.0, %v7238_v15  ;;  %v7240_v23 = vpop.eup %7239  ;;  %v6729_v15 = vpack.c.bf16 %v4389_v57, %v4385_v10 }
 0xb80   :  { %v3958_v14 = vadd.f32 1.0, %v7240_v23  ;;  %v7242_v18 = vpop.eup %7241  ;;  %v4391_v23 = vld [vmem:[#allocation10 + $0x12f0] sm:$0xff] }
 0xb81   :  { %7245 = vrcp.f32 %v3957_v2  ;;  %v7244_v48 = vpop.eup %7243  ;;  %v4387_v2 = vld [vmem:[#allocation10 + $0x12d0] sm:$0xff] }
 0xb82   :  { %7247 = vrcp.f32 %v3958_v14  ;;  %v3959_v3 = vadd.f32 1.0, %v7244_v48  ;;  %v6761_v14 = vpack.c.bf16 %v4391_v23, %v4387_v2  ;;  %v4398_v48 = vld [vmem:[#allocation10 + $0x1328] sm:$0xff] }
 0xb84   :  { %7249 = vrcp.f32 %v3959_v3  ;;  %v4393_v3 = vld [vmem:[#allocation10 + $0x1300] sm:$0xff] }
 0xb8b   :  { %v7246_v11 = vpop.eup %7245 }
 0xb8c   :  { %v3968_v25 = vmul.f32 %v7246_v11, %v7242_v18  ;;  %v7248_v29 = vpop.eup %7247  ;;  %v4394_v18 = vld [vmem:[#allocation10 + $0x1308] sm:$0xff]  ;;  %v4396_v11 = vld [vmem:[#allocation10 + $0x1318] sm:$0xff] }
 0xb8d   :  { %v3967_v26 = vmul.f32 %v7248_v29, %v8529_v58  ;;  %v4381_v58 = vld [vmem:[#allocation10 + $0x12a0] sm:$0xff]  ;;  %v4400_v29 = vld [vmem:[#allocation10 + $0x1338] sm:$0xff] }
 0xb8e   :  { %v7250_v27 = vpop.eup %7249 }
 0xb8f   :  { %v8573_v19 = vadd.f32 %v3968_v25, %v3967_v26  ;;  %v6731_v25 = vpack.c.bf16 %v4398_v48, %v4394_v18  ;;  %v4397_v26 = vld [vmem:[#allocation10 + $0x1320] sm:$0xff] }
 0xb91   :  { %7251 = vtanh.f32 %v8573_v19 }
 0xb9b   :  { %v7252_v34 = vpop.eup %7251 }
 0xb9c   :  { %v3971_v43 = vmul.f32 %v7252_v34, %v7250_v27  ;;  %v6763_v27 = vpack.c.bf16 %v4400_v29, %v4396_v11  ;;  %v6733_v34 = vpack.c.bf16 %v4397_v26, %v4393_v3 }
 0xb9e   :  { %4102 = vmatmul.mubr.f32.vlgmr.msra.gmra.mrb[20].mxu0 %v3971_v43  ;;  %4173 = vmatmul.mubr.f32.vlgmr.msra.gmra.mrb[22].mxu1 %v3971_v43 }
 0xb9f   :  { %6654 = vmatpush1.bf16.msra.mxu0 %v8035_v21  ;;  %6686 = vmatpush1.bf16.msra.mxu1 %v8139_v32  ;;  %v4362_v21 = vld [vmem:[#allocation10 + $0x1208] sm:$0xff] }
 0xba0   :  { %6656 = vmatprep.subr.bf16.mxu0 %v8038_v22  ;;  %6688 = vmatprep.subr.bf16.mxu1 %v8141_v33  ;;  %v4366_v22 = vld [vmem:[#allocation10 + $0x1228] sm:$0xff]  ;;  %v4376_v33 = vld [vmem:[#allocation10 + $0x1278] sm:$0xff] }
 0xba1   :  { %4254 = vmatprep.mubr.f32.mxu0 %v8738_v31  ;;  %4325 = vmatprep.mubr.f32.mxu1 %v8738_v31 }
 0xba3   :  { %6658 = vmatpush1.bf16.msra.mxu0 %v8046_v28  ;;  %6690 = vmatpush1.bf16.msra.mxu1 %v8149_v38  ;;  %v4364_v28 = vld [vmem:[#allocation10 + $0x1218] sm:$0xff]  ;;  %v4369_v38 = vld [vmem:[#allocation10 + $0x1240] sm:$0xff] }
 0xba4   :  { %6660 = vmatprep.subr.bf16.mxu0 %v8049_v30  ;;  %6692 = vmatprep.subr.bf16.mxu1 %v8153_v39  ;;  %v6715_v30 = vpack.c.bf16 %v4366_v22, %v4362_v21  ;;  %v4373_v39 = vld [vmem:[#allocation10 + $0x1260] sm:$0xff]  ;;  %v4399_v21 = vld [vmem:[#allocation10 + $0x1330] sm:$0xff] }
 0xba7   :  { %6662 = vmatpush1.bf16.msra.mxu0 %v8057_v40  ;;  %6694 = vmatpush1.bf16.msra.mxu1 %v8159_v46  ;;  %v4368_v40 = vld [vmem:[#allocation10 + $0x1238] sm:$0xff] }
 0xba8   :  { %6664 = vmatprep.subr.bf16.mxu0 %v8060_v45  ;;  %6696 = vmatprep.subr.bf16.mxu1 %v8162_v47  ;;  %v4361_v45 = vld [vmem:[#allocation10 + $0x1200] sm:$0xff]  ;;  %v6721_v47 = vpack.c.bf16 %v4373_v39, %v4369_v38  ;;  %v4416_v38 = vld [vmem:[#allocation10 + $0x13b8] sm:$0xff] }
 0xbab   :  { %6666 = vmatpush1.bf16.msra.mxu0 %v8066_v54  ;;  %6698 = vmatpush1.bf16.msra.mxu1 %v8167_v52  ;;  %v4365_v54 = vld [vmem:[#allocation10 + $0x1220] sm:$0xff]  ;;  %v4371_v52 = vld [vmem:[#allocation10 + $0x1250] sm:$0xff] }
 0xbac   :  { %6668 = vmatprep.subr.bf16.mxu0 %v8069_v55  ;;  %6700 = vmatprep.subr.bf16.mxu1 %v8170_v53  ;;  %v6747_v55 = vpack.c.bf16 %v4368_v40, %v4364_v28  ;;  %v4375_v53 = vld [vmem:[#allocation10 + $0x1270] sm:$0xff]  ;;  %v4402_v28 = vld [vmem:[#allocation10 + $0x1348] sm:$0xff]  ;;  %v4404_v40 = vld [vmem:[#allocation10 + $0x1358] sm:$0xff] }
 0xbaf   :  { %6670 = vmatpush1.bf16.msra.mxu0 %v8075_v61  ;;  %6702 = vmatpush1.bf16.msra.mxu1 %v8175_v60  ;;  %v6717_v61 = vpack.c.bf16 %v4365_v54, %v4361_v45  ;;  %v6753_v60 = vpack.c.bf16 %v4375_v53, %v4371_v52  ;;  %v4408_v54 = vld [vmem:[#allocation10 + $0x1378] sm:$0xff]  ;;  %v4413_v52 = vld [vmem:[#allocation10 + $0x13a0] sm:$0xff]  ;;  %v4411_v53 = vld [vmem:[#allocation10 + $0x1390] sm:$0xff] }
 0xbb0   :  { %6672 = vmatprep.subr.bf16.mxu0 %v8078_v62  ;;  %6704 = vmatprep.subr.bf16.mxu1 %v8178_v63  ;;  %v4363_v62 = vld [vmem:[#allocation10 + $0x1210] sm:$0xff]  ;;  %v4378_v63 = vld [vmem:[#allocation10 + $0x1288] sm:$0xff] }
 0xbb3   :  { %6674 = vmatpush1.bf16.msra.mxu0 %v8088_v5  ;;  %6706 = vmatpush1.bf16.msra.mxu1 %v8181_v7  ;;  %v4367_v5 = vld [vmem:[#allocation10 + $0x1230] sm:$0xff]  ;;  %v4382_v7 = vld [vmem:[#allocation10 + $0x12a8] sm:$0xff] }
 0xbb4   :  { %6676 = vmatprep.subr.bf16.mxu0 %v8091_v6  ;;  %6708 = vmatprep.subr.bf16.mxu1 %v8184_v8  ;;  %v6749_v6 = vpack.c.bf16 %v4367_v5, %v4363_v62  ;;  %v4380_v8 = vld [vmem:[#allocation10 + $0x1298] sm:$0xff]  ;;  %v6767_v62 = vpack.c.bf16 %v4408_v54, %v4404_v40  ;;  %v4730_v40 = vld [vmem:[#allocation16] sm:$0xff] }
 0xbb7   :  { %6678 = vmatpush1.bf16.msra.mxu0 %v8101_v12  ;;  %6710 = vmatpush1.bf16.msra.mxu1 %v8187_v16  ;;  %v4370_v12 = vld [vmem:[#allocation10 + $0x1248] sm:$0xff]  ;;  %v6723_v16 = vpack.c.bf16 %v4382_v7, %v4378_v63  ;;  %v4415_v63 = vld [vmem:[#allocation10 + $0x13b0] sm:$0xff] }
 0xbb8   :  { %6680 = vmatprep.subr.bf16.mxu0 %v8104_v13  ;;  %6712 = vmatprep.subr.bf16.mxu1 %v8190_v17  ;;  %v4374_v13 = vld [vmem:[#allocation10 + $0x1268] sm:$0xff]  ;;  %v4384_v17 = vld [vmem:[#allocation10 + $0x12b8] sm:$0xff] }
 0xbb9   :  { %v6719_v32 = vpack.c.bf16 %v4374_v13, %v4370_v12  ;;  %v6755_v41 = vpack.c.bf16 %v4384_v17, %v4380_v8  ;;  %v4407_v12 = vld [vmem:[#allocation10 + $0x1370] sm:$0xff]  ;;  %v4410_v13 = vld [vmem:[#allocation10 + $0x1388] sm:$0xff] }
 0xbba   :  { %v4418_v7 = vld [vmem:[#allocation10 + $0x13c8] sm:$0xff] }
 0xbbb   :  { %6682 = vmatpush1.bf16.msra.mxu0 %v8114_v20  ;;  %6714 = vmatpush1.bf16.msra.mxu1 %v8193_v24  ;;  %v4372_v20 = vld [vmem:[#allocation10 + $0x1258] sm:$0xff]  ;;  %v4377_v24 = vld [vmem:[#allocation10 + $0x1280] sm:$0xff]  ;;  %v4422_v8 = vld [vmem:[#allocation10 + $0x13e8] sm:$0xff] }
 0xbbc   :  { %6716 = vmatprep.subr.bf16.mxu0 %v6715_v30  ;;  %6748 = vmatprep.subr.bf16.mxu1 %v6747_v55  ;;  %v6751_v46 = vpack.c.bf16 %v4376_v33, %v4372_v20  ;;  %v6725_v44 = vpack.c.bf16 %v4381_v58, %v4377_v24  ;;  %v4406_v30 = vld [vmem:[#allocation10 + $0x1368] sm:$0xff]  ;;  %v4401_v55 = vld [vmem:[#allocation10 + $0x1340] sm:$0xff]  ;;  %v4412_v33 = vld [vmem:[#allocation10 + $0x1398] sm:$0xff]  ;;  %v6743_v17 = vpack.c.bf16 %v4422_v8, %v4418_v7 }
 0xbbd   :  { %v6735_v45 = vpack.c.bf16 %v4406_v30, %v4402_v28  ;;  %v4420_v24 = vld [vmem:[#allocation10 + $0x13d8] sm:$0xff]  ;;  %v4733_v30 = vld [vmem:[#allocation16 + $0x18] sm:$0xff] }
 0xbbe   :  { %4255 = vmatmul.mubr.f32.vlgmr.msra.gmra.mrb[18].mxu0 %v3971_v43  ;;  %4326 = vmatmul.mubr.f32.vlgmr.msra.gmra.mrb[18].mxu1 %v3971_v43  ;;  %v4395_v43 = vld [vmem:[#allocation10 + $0x1310] sm:$0xff]  ;;  %v4424_v58 = vld [vmem:[#allocation10 + $0x13f8] sm:$0xff]  ;;  %v4749_v8 = vld [vmem:[#allocation16 + $0x98] sm:$0xff] }
 0xbbf   :  { %4489 = vmatprep.mubr.f32.mxu0 %v8738_v31  ;;  %4560 = vmatprep.mubr.f32.mxu1 %v8738_v31  ;;  %v6765_v22 = vpack.c.bf16 %v4399_v21, %v4395_v43  ;;  %v4731_v28 = vld [vmem:[#allocation16 + $0x8] sm:$0xff] }
 0xbc0   :  { %6718 = vmatpush1.bf16.msra.mxu0 %v6717_v61  ;;  %6750 = vmatpush1.bf16.msra.mxu1 %v6749_v6  ;;  %v4405_v61 = vld [vmem:[#allocation10 + $0x1360] sm:$0xff]  ;;  %v4403_v6 = vld [vmem:[#allocation10 + $0x1350] sm:$0xff]  ;;  %v6779_v54 = vpack.c.bf16 %v4733_v30, %v4731_v28 }
 0xbc1   :  { %6720 = vmatprep.subr.bf16.mxu0 %v6719_v32  ;;  %6752 = vmatprep.subr.bf16.mxu1 %v6751_v46  ;;  %v6737_v5 = vpack.c.bf16 %v4405_v61, %v4401_v55  ;;  %v6769_v20 = vpack.c.bf16 %v4407_v12, %v4403_v6  ;;  %v4414_v32 = vld [vmem:[#allocation10 + $0x13a8] sm:$0xff]  ;;  %v6771_v46 = vpack.c.bf16 %v4416_v38, %v4412_v33  ;;  %v4735_v61 = vld [vmem:[#allocation16 + $0x28] sm:$0xff]  ;;  %v4736_v6 = vld [vmem:[#allocation16 + $0x30] sm:$0xff] }
 0xbc2   :  { %v6739_v39 = vpack.c.bf16 %v4414_v32, %v4410_v13  ;;  %v4739_v13 = vld [vmem:[#allocation16 + $0x48] sm:$0xff]  ;;  %v4738_v33 = vld [vmem:[#allocation16 + $0x40] sm:$0xff]  ;;  %v4740_v38 = vld [vmem:[#allocation16 + $0x50] sm:$0xff] }
 0xbc3   :  { %v4747_v7 = vld [vmem:[#allocation16 + $0x88] sm:$0xff]  ;;  %v4770_v28 = vld [vmem:[#allocation16 + $0x140] sm:$0xff]  ;;  %v4772_v30 = vld [vmem:[#allocation16 + $0x150] sm:$0xff] }
 0xbc4   :  { %6722 = vmatpush1.bf16.msra.mxu0 %v6721_v47  ;;  %6754 = vmatpush1.bf16.msra.mxu1 %v6753_v60  ;;  %v4409_v47 = vld [vmem:[#allocation10 + $0x1380] sm:$0xff] }
 0xbc5   :  { %6724 = vmatprep.subr.bf16.mxu0 %v6723_v16  ;;  %6756 = vmatprep.subr.bf16.mxu1 %v6755_v41  ;;  %v6741_v60 = vpack.c.bf16 %v4413_v52, %v4409_v47  ;;  %v6773_v16 = vpack.c.bf16 %v4415_v63, %v4411_v53  ;;  %v4417_v41 = vld [vmem:[#allocation10 + $0x13c0] sm:$0xff]  ;;  %v4742_v53 = vld [vmem:[#allocation16 + $0x60] sm:$0xff] }
 0xbc6   :  { %v6745_v49 = vpack.c.bf16 %v4421_v35, %v4417_v41  ;;  %v4745_v47 = vld [vmem:[#allocation16 + $0x78] sm:$0xff]  ;;  %v4751_v41 = vld [vmem:[#allocation16 + $0xa8] sm:$0xff] }
 0xbc8   :  { %6726 = vmatpush1.bf16.msra.mxu0 %v6725_v44  ;;  %6758 = vmatpush1.bf16.msra.mxu1 %v6757_v51  ;;  %v6775_v44 = vpack.c.bf16 %v4424_v58, %v4420_v24  ;;  %v4423_v51 = vld [vmem:[#allocation10 + $0x13f0] sm:$0xff]  ;;  %v4748_v24 = vld [vmem:[#allocation16 + $0x90] sm:$0xff] }
 0xbc9   :  { %6728 = vmatprep.subr.bf16.mxu0 %v6727_v0  ;;  %6760 = vmatprep.subr.bf16.mxu1 %v6759_v59  ;;  %v6777_v50 = vpack.c.bf16 %v4423_v51, %v4419_v42  ;;  %v4750_v42 = vld [vmem:[#allocation16 + $0xa0] sm:$0xff]  ;;  %v4752_v51 = vld [vmem:[#allocation16 + $0xb0] sm:$0xff] }
 0xbcc   :  { %6730 = vmatpush1.bf16.msra.mxu0 %v6729_v15  ;;  %6762 = vmatpush1.bf16.msra.mxu1 %v6761_v14 }
 0xbcd   :  { %6732 = vmatprep.subr.bf16.mxu0 %v6731_v25  ;;  %6764 = vmatprep.subr.bf16.mxu1 %v6763_v27 }
 0xbd0   :  { %6734 = vmatpush1.bf16.msra.mxu0 %v6733_v34  ;;  %6766 = vmatpush1.bf16.msra.mxu1 %v6765_v22 }
 0xbd1   :  { %6736 = vmatprep.subr.bf16.mxu0 %v6735_v45  ;;  %6768 = vmatprep.subr.bf16.mxu1 %v6767_v62  ;;  %v4732_v45 = vld [vmem:[#allocation16 + $0x10] sm:$0xff]  ;;  %v4737_v62 = vld [vmem:[#allocation16 + $0x38] sm:$0xff] }
 0xbd2   :  { %v6781_v55 = vpack.c.bf16 %v4732_v45, %v4730_v40  ;;  %v6821_v40 = vpack.c.bf16 %v4772_v30, %v4770_v28  ;;  %v4775_v45 = vld [vmem:[#allocation16 + $0x168] sm:$0xff] }
 0xbd4   :  { %6738 = vmatpush1.bf16.msra.mxu0 %v6737_v5  ;;  %6770 = vmatpush1.bf16.msra.mxu1 %v6769_v20  ;;  %v6783_v5 = vpack.c.bf16 %v4737_v62, %v4735_v61  ;;  %v4741_v20 = vld [vmem:[#allocation16 + $0x58] sm:$0xff]  ;;  %v4774_v61 = vld [vmem:[#allocation16 + $0x160] sm:$0xff]  ;;  %v4776_v62 = vld [vmem:[#allocation16 + $0x170] sm:$0xff] }
 0xbd5   :  { %6740 = vmatprep.subr.bf16.mxu0 %v6739_v39  ;;  %6772 = vmatprep.subr.bf16.mxu1 %v6771_v46  ;;  %v6787_v32 = vpack.c.bf16 %v4741_v20, %v4739_v13  ;;  %v6789_v39 = vpack.c.bf16 %v4740_v38, %v4738_v33  ;;  %v4743_v46 = vld [vmem:[#allocation16 + $0x68] sm:$0xff]  ;;  %v4778_v13 = vld [vmem:[#allocation16 + $0x180] sm:$0xff]  ;;  %v4780_v20 = vld [vmem:[#allocation16 + $0x190] sm:$0xff] }
 0xbd6   :  { %v6791_v52 = vpack.c.bf16 %v4745_v47, %v4743_v46  ;;  %v4783_v33 = vld [vmem:[#allocation16 + $0x1a8] sm:$0xff]  ;;  %v4785_v38 = vld [vmem:[#allocation16 + $0x1b8] sm:$0xff]  ;;  %v4782_v46 = vld [vmem:[#allocation16 + $0x1a0] sm:$0xff] }
 0xbd7   :  { %v4784_v47 = vld [vmem:[#allocation16 + $0x1b0] sm:$0xff] }
 0xbd8   :  { %6742 = vmatpush1.bf16.msra.mxu0 %v6741_v60  ;;  %6774 = vmatpush1.bf16.msra.mxu1 %v6773_v16  ;;  %v4744_v60 = vld [vmem:[#allocation16 + $0x70] sm:$0xff]  ;;  %v6795_v16 = vpack.c.bf16 %v4749_v8, %v4747_v7 }
 0xbd9   :  { %6744 = vmatprep.subr.bf16.mxu0 %v6743_v17  ;;  %6776 = vmatprep.subr.bf16.mxu1 %v6775_v44  ;;  %v6793_v63 = vpack.c.bf16 %v4744_v60, %v4742_v53  ;;  %v4746_v17 = vld [vmem:[#allocation16 + $0x80] sm:$0xff]  ;;  %v4753_v44 = vld [vmem:[#allocation16 + $0xb8] sm:$0xff]  ;;  %v4787_v53 = vld [vmem:[#allocation16 + $0x1c8] sm:$0xff] }
 0xbda   :  { %v6797_v58 = vpack.c.bf16 %v4748_v24, %v4746_v17  ;;  %v6799_v35 = vpack.c.bf16 %v4753_v44, %v4751_v41  ;;  %v4789_v60 = vld [vmem:[#allocation16 + $0x1d8] sm:$0xff]  ;;  %v4788_v8 = vld [vmem:[#allocation16 + $0x1d0] sm:$0xff]  ;;  %v4790_v41 = vld [vmem:[#allocation16 + $0x1e0] sm:$0xff] }
 0xbdb   :  { %v6835_v7 = vpack.c.bf16 %v4789_v60, %v4787_v53  ;;  %v4793_v17 = vld [vmem:[#allocation16 + $0x1f8] sm:$0xff]  ;;  %v4792_v44 = vld [vmem:[#allocation16 + $0x1f0] sm:$0xff] }
 0xbdc   :  { %6746 = vmatpush1.bf16.msra.mxu0 %v6745_v49  ;;  %6778 = vmatpush1.bf16.msra.mxu1 %v6777_v50  ;;  %v6801_v49 = vpack.c.bf16 %v4752_v51, %v4750_v42  ;;  %v4755_v50 = vld [vmem:[#allocation16 + $0xc8] sm:$0xff]  ;;  %v4797_v51 = vld [vmem:[#allocation16 + $0x218] sm:$0xff] }
 0xbdd   :  { %6780 = vmatprep.subr.bf16.mxu0 %v6779_v54  ;;  %v4777_v54 = vld [vmem:[#allocation16 + $0x178] sm:$0xff]  ;;  %v4795_v42 = vld [vmem:[#allocation16 + $0x208] sm:$0xff] }
 0xc91   :  { %v4256_v56 = vpop.f32.mrb[18].mxu0  ;;  %v4327_v0 = vpop.f32.mrb[18].mxu1 }
 0xc92   :  { %v6983_v4 = vadd.f32 %v4256_v56, %v8220_v36  ;;  %v4258_v10 = vpop.f32.mrb[19].mxu0  ;;  %v4329_v57 = vpop.f32.mrb[19].mxu1  ;;  %v7003_v23 = vadd.f32 %v4327_v0, %v8232_v1  ;;  %v4757_v56 = vld [vmem:[#allocation16 + $0xd8] sm:$0xff] }
 0xc93   :  { %v6984_v59 = vadd.f32 %v4258_v10, %v8223_v37  ;;  %v7004_v14 = vadd.f32 %v4329_v57, %v8739_v9  ;;  %v6803_v0 = vpack.c.bf16 %v4757_v56, %v4755_v50  ;;  %v4756_v10 = vld [vmem:[#allocation16 + $0xd0] sm:$0xff] }
 0xc94   :  { %v5389_v15 = vmul.f32 -1.442695, %v6983_v4  ;;  %v5391_v18 = vmul.f32 -1.442695, %v7003_v23  ;;  %v4754_v4 = vld [vmem:[#allocation16 + $0xc0] sm:$0xff]  ;;  %v8741_v56 = vld [vmem:[#allocation38_spill] sm:$0xff] }
 0xc95   :  { %v5390_v2 = vmul.f32 -1.442695, %v6984_v59  ;;  %v6805_v57 = vpack.c.bf16 %v4756_v10, %v4754_v4  ;;  %v4759_v59 = vld [vmem:[#allocation16 + $0xe8] sm:$0xff]  ;;  %v4758_v23 = vld [vmem:[#allocation16 + $0xe0] sm:$0xff]  ;;  %v4571_v50 = vld [vmem:[#allocation11] sm:$0xf] }
 0xc96   :  { %7253 = vpow2.f32 %v5389_v15  ;;  %v4761_v15 = vld [vmem:[#allocation16 + $0xf8] sm:$0xff] }
 0xc97   :  { %7255 = vpow2.f32 %v5390_v2  ;;  %v6807_v2 = vpack.c.bf16 %v4761_v15, %v4759_v59  ;;  %v8742_v4 = vld [vmem:[#allocation40_spill] sm:$0xff]  ;;  %v8744_v15 = vld [vmem:[#allocation41_spill] sm:$0xff] }
 0xc98   :  { %7257 = vtanh.f32 %v7004_v14  ;;  %v4760_v14 = vld [vmem:[#allocation16 + $0xf0] sm:$0xff]  ;;  %v4584_v10 = vrot.slane %v4571_v50, %v8742_v4 }
 0xc99   :  { %7259 = vpow2.f32 %v5391_v18  ;;  %v6809_v18 = vpack.c.bf16 %v4760_v14, %v4758_v23 }
 0xca0   :  { %v7254_v48 = vpop.eup %7253 }
 0xca1   :  { %v4345_v11 = vadd.f32 1.0, %v7254_v48  ;;  %v7256_v25 = vpop.eup %7255  ;;  %v4763_v48 = vld [vmem:[#allocation16 + $0x108] sm:$0xff] }
 0xca2   :  { %v4346_v36 = vadd.f32 1.0, %v7256_v25  ;;  %v7258_v29 = vpop.eup %7257 }
 0xca3   :  { %7261 = vrcp.f32 %v4345_v11  ;;  %v7260_v3 = vpop.eup %7259  ;;  %v4765_v11 = vld [vmem:[#allocation16 + $0x118] sm:$0xff] }
 0xca4   :  { %7263 = vrcp.f32 %v4346_v36  ;;  %v4347_v34 = vadd.f32 1.0, %v7260_v3  ;;  %v6811_v25 = vpack.c.bf16 %v4765_v11, %v4763_v48  ;;  %v4762_v36 = vld [vmem:[#allocation16 + $0x100] sm:$0xff] }
 0xca6   :  { %7265 = vrcp.f32 %v4347_v34  ;;  %v4766_v34 = vld [vmem:[#allocation16 + $0x120] sm:$0xff] }
 0xcad   :  { %v7262_v37 = vpop.eup %7261 }
 0xcae   :  { %v4356_v26 = vmul.f32 %v7262_v37, %v7258_v29  ;;  %v7264_v27 = vpop.eup %7263  ;;  %v4764_v29 = vld [vmem:[#allocation16 + $0x110] sm:$0xff]  ;;  %v4767_v37 = vld [vmem:[#allocation16 + $0x128] sm:$0xff] }
 0xcaf   :  { %v4355_v43 = vmul.f32 %v7264_v27, %v8573_v19  ;;  %v4734_v19 = vld [vmem:[#allocation16 + $0x20] sm:$0xff]  ;;  %v6813_v3 = vpack.c.bf16 %v4764_v29, %v4762_v36 }
 0xcb0   :  { %v7266_v9 = vpop.eup %7265  ;;  %v6785_v12 = vpack.c.bf16 %v4736_v6, %v4734_v19  ;;  %v4779_v19 = vld [vmem:[#allocation16 + $0x188] sm:$0xff]  ;;  %v4781_v6 = vld [vmem:[#allocation16 + $0x198] sm:$0xff] }
 0xcb1   :  { %v4357_v1 = vadd.f32 %v4356_v26, %v4355_v43  ;;  %v4769_v26 = vld [vmem:[#allocation16 + $0x138] sm:$0xff]  ;;  %v4768_v43 = vld [vmem:[#allocation16 + $0x130] sm:$0xff] }
 0xcb2   :  { %v6815_v27 = vpack.c.bf16 %v4769_v26, %v4767_v37 }
 0xcb3   :  { %7267 = vtanh.f32 %v4357_v1  ;;  %v6817_v1 = vpack.c.bf16 %v4768_v43, %v4766_v34 }
 0xcbd   :  { %v7268_v21 = vpop.eup %7267 }
 0xcbe   :  { %v4359_v22 = vmul.f32 %v7268_v21, %v7266_v9  ;;  %v4771_v9 = vld [vmem:[#allocation16 + $0x148] sm:$0xff]  ;;  %v4773_v21 = vld [vmem:[#allocation16 + $0x158] sm:$0xff] }
 0xcc0   :  { %4490 = vmatmul.mubr.f32.vlgmr.msra.gmra.mrb[20].mxu0 %v4359_v22  ;;  %4561 = vmatmul.mubr.f32.vlgmr.msra.gmra.mrb[22].mxu1 %v4359_v22  ;;  %v6819_v22 = vpack.c.bf16 %v4773_v21, %v4771_v9 }
 0xcc1   :  { %6782 = vmatpush1.bf16.msra.mxu0 %v6781_v55  ;;  %v6823_v55 = vpack.c.bf16 %v4777_v54, %v4775_v45 }
 0xcc2   :  { %6784 = vmatprep.subr.bf16.mxu0 %v6783_v5  ;;  %v6825_v5 = vpack.c.bf16 %v4776_v62, %v4774_v61 }
 0xcc5   :  { %6786 = vmatpush1.bf16.msra.mxu0 %v6785_v12  ;;  %v6827_v12 = vpack.c.bf16 %v4781_v6, %v4779_v19 }
 0xcc6   :  { %6788 = vmatprep.subr.bf16.mxu0 %v6787_v32  ;;  %v6829_v32 = vpack.c.bf16 %v4780_v20, %v4778_v13 }
 0xcc9   :  { %6790 = vmatpush1.bf16.msra.mxu0 %v6789_v39  ;;  %v6831_v39 = vpack.c.bf16 %v4785_v38, %v4783_v33 }
 0xcca   :  { %6792 = vmatprep.subr.bf16.mxu0 %v6791_v52  ;;  %v6833_v52 = vpack.c.bf16 %v4784_v47, %v4782_v46 }
 0xccd   :  { %6794 = vmatpush1.bf16.msra.mxu0 %v6793_v63  ;;  %v4786_v63 = vld [vmem:[#allocation16 + $0x1c0] sm:$0xff] }
 0xcce   :  { %6796 = vmatprep.subr.bf16.mxu0 %v6795_v16  ;;  %v4791_v16 = vld [vmem:[#allocation16 + $0x1e8] sm:$0xff]  ;;  %v6837_v24 = vpack.c.bf16 %v4788_v8, %v4786_v63 }
 0xcd1   :  { %6798 = vmatpush1.bf16.msra.mxu0 %v6797_v58  ;;  %v6839_v58 = vpack.c.bf16 %v4793_v17, %v4791_v16 }
 0xcd2   :  { %6800 = vmatprep.subr.bf16.mxu0 %v6799_v35  ;;  %v6841_v35 = vpack.c.bf16 %v4792_v44, %v4790_v41 }
 0xcd5   :  { %6802 = vmatpush1.bf16.msra.mxu0 %v6801_v49  ;;  %v6843_v49 = vpack.c.bf16 %v4797_v51, %v4795_v42 }
 0xcd6   :  { %6804 = vmatprep.subr.bf16.mxu0 %v6803_v0  ;;  %v4576_v0 = vrot.slane %v4571_v50, %v8741_v56 }
 0xcd9   :  { %6806 = vmatpush1.bf16.msra.mxu0 %v6805_v57  ;;  %v8743_v57 = vld [vmem:[#allocation39_spill] sm:$0xff] }
 0xcda   :  { %6808 = vmatprep.subr.bf16.mxu0 %v6807_v2  ;;  %v4580_v59 = vrot.slane %v4571_v50, %v8743_v57  ;;  %v4588_v2 = vrot.slane %v4571_v50, %v8744_v15 }
 0xcdd   :  { %6810 = vmatpush1.bf16.msra.mxu0 %v6809_v18 }
 0xcde   :  { %6812 = vmatprep.subr.bf16.mxu0 %v6811_v25 }
 0xce1   :  { %6814 = vmatpush1.bf16.msra.mxu0 %v6813_v3 }
 0xce2   :  { %6816 = vmatprep.subr.bf16.mxu0 %v6815_v27 }
 0xce5   :  { %6818 = vmatpush1.bf16.msra.mxu0 %v6817_v1 }
 0xce6   :  { %6820 = vmatprep.subr.bf16.mxu0 %v6819_v22 }
 0xce9   :  { %6822 = vmatpush1.bf16.msra.mxu0 %v6821_v40 }
 0xcea   :  { %6824 = vmatprep.subr.bf16.mxu0 %v6823_v55 }
 0xced   :  { %6826 = vmatpush1.bf16.msra.mxu0 %v6825_v5 }
 0xcee   :  { %6828 = vmatprep.subr.bf16.mxu0 %v6827_v12 }
 0xcf1   :  { %6830 = vmatpush1.bf16.msra.mxu0 %v6829_v32 }
 0xcf2   :  { %6832 = vmatprep.subr.bf16.mxu0 %v6831_v39 }
 0xcf5   :  { %6834 = vmatpush1.bf16.msra.mxu0 %v6833_v52 }
 0xcf6   :  { %6836 = vmatprep.subr.bf16.mxu0 %v6835_v7 }
 0xcf9   :  { %6838 = vmatpush1.bf16.msra.mxu0 %v6837_v24 }
 0xcfa   :  { %6840 = vmatprep.subr.bf16.mxu0 %v6839_v58 }
 0xcfd   :  { %6842 = vmatpush1.bf16.msra.mxu0 %v6841_v35 }
 0xcfe   :  { %6844 = vmatprep.subr.bf16.mxu0 %v6843_v49 }
 0xd93   :  { %v4491_v23 = vpop.f32.mrb[20].mxu0  ;;  %v4562_v14 = vpop.f32.mrb[22].mxu1 }
 0xd94   :  { %v4593_v18 = vadd.f32 %v4576_v0, %v4491_v23  ;;  %v4595_v48 = vadd.f32 %v4584_v10, %v4562_v14  ;;  %v4493_v11 = vpop.f32.mrb[21].mxu0  ;;  %v4564_v25 = vpop.f32.mrb[23].mxu1 }
 0xd95   :  { %v4594_v36 = vadd.f32 %v4580_v59, %v4493_v11  ;;  %v4596_v29 = vadd.f32 %v4588_v2, %v4564_v25 }
 0xd96   :  { %v4599_v3 = vrot.slane %v4593_v18, 4  ;;  %v4611_v37 = vrot.slane %v4595_v48, 4 }
 0xd97   :  { %v4605_v26 = vrot.slane %v4594_v36, 4  ;;  %v4617_v27 = vrot.slane %v4596_v29, 4 }
 0xd98   :  { %v4600_v34 = vadd.f32 %v4599_v3, %v4593_v18  ;;  %v4612_v43 = vadd.f32 %v4611_v37, %v4595_v48 }
 0xd99   :  { %v4606_v1 = vadd.f32 %v4605_v26, %v4594_v36  ;;  %v4618_v9 = vadd.f32 %v4617_v27, %v4596_v29 }
 0xd9a   :  { %v4601_v21 = vrot.slane %v4600_v34, 2  ;;  %v4613_v22 = vrot.slane %v4612_v43, 2 }
 0xd9b   :  { %v4607_v28 = vrot.slane %v4606_v1, 2  ;;  %v4619_v30 = vrot.slane %v4618_v9, 2 }
 0xd9c   :  { %v4602_v40 = vadd.f32 %v4601_v21, %v4600_v34  ;;  %v4614_v45 = vadd.f32 %v4613_v22, %v4612_v43  ;;  %v4597_v22 = vld [vmem:[#allocation13] sm:$0xf] }
 0xd9d   :  { %v4608_v54 = vadd.f32 %v4607_v28, %v4606_v1  ;;  %v4620_v55 = vadd.f32 %v4619_v30, %v4618_v9  ;;  %v4598_v28 = vld [vmem:[#allocation14] sm:$0xf]  ;;  %v4680_v30 = vrot.slane %v4597_v22, %v8741_v56 }
 0xd9e   :  { %v4603_v61 = vrot.slane %v4602_v40, 1  ;;  %v4615_v62 = vrot.slane %v4614_v45, 1 }
 0xd9f   :  { %v4609_v5 = vrot.slane %v4608_v54, 1  ;;  %v4621_v19 = vrot.slane %v4620_v55, 1 }
 0xda0   :  { %v4604_v6 = vadd.f32 %v4603_v61, %v4602_v40  ;;  %v4616_v12 = vadd.f32 %v4615_v62, %v4614_v45  ;;  %v4688_v45 = vrot.slane %v4597_v22, %v8742_v4  ;;  %v4684_v61 = vrot.slane %v4597_v22, %v8743_v57 }
 0xda1   :  { %v4610_v13 = vadd.f32 %v4609_v5, %v4608_v54  ;;  %v4622_v20 = vadd.f32 %v4621_v19, %v4620_v55  ;;  %v4705_v5 = vrot.slane %v4598_v28, %v8741_v56 }
 0xda2   :  { %v4624_v32 = vmul.f32 0.125, %v4604_v6  ;;  %v4626_v33 = vmul.f32 0.125, %v4616_v12  ;;  %v4713_v6 = vrot.slane %v4598_v28, %v8742_v4  ;;  %v4692_v12 = vrot.slane %v4597_v22, %v8744_v15  ;;  %v4794_v4 = vld [vmem:[#allocation16 + $0x200] sm:$0xff]  ;;  %v4819_v22 = vld [vmem:[#allocation16 + $0x2c8] sm:$0xff] }
 0xda3   :  { %v4625_v38 = vmul.f32 0.125, %v4610_v13  ;;  %v4627_v39 = vmul.f32 0.125, %v4622_v20 }
 0xda4   :  { %v4628_v46 = vsub.f32 %v4593_v18, %v4624_v32  ;;  %v4630_v47 = vsub.f32 %v4595_v48, %v4626_v33  ;;  %v4709_v33 = vrot.slane %v4598_v28, %v8743_v57 }
 0xda5   :  { %v4629_v52 = vsub.f32 %v4594_v36, %v4625_v38  ;;  %v4631_v53 = vsub.f32 %v4596_v29, %v4627_v39 }
 0xda6   :  { %v4632_v60 = vmul.f32 %v4628_v46, %v4628_v46  ;;  %v4634_v63 = vmul.f32 %v4630_v47, %v4630_v47 }
 0xda7   :  { %v4633_v7 = vmul.f32 %v4629_v52, %v4629_v52  ;;  %v4635_v8 = vmul.f32 %v4631_v53, %v4631_v53 }
 0xda8   :  { %v4636_v16 = vrot.slane %v4632_v60, 4  ;;  %v4648_v17 = vrot.slane %v4634_v63, 4 }
 0xda9   :  { %v4642_v24 = vrot.slane %v4633_v7, 4  ;;  %v4654_v58 = vrot.slane %v4635_v8, 4 }
 0xdaa   :  { %v4637_v41 = vadd.f32 %v4636_v16, %v4632_v60  ;;  %v4649_v44 = vadd.f32 %v4648_v17, %v4634_v63  ;;  %v4717_v60 = vrot.slane %v4598_v28, %v8744_v15  ;;  %v4796_v17 = vld [vmem:[#allocation16 + $0x210] sm:$0xff]  ;;  %v4821_v28 = vld [vmem:[#allocation16 + $0x2d8] sm:$0xff] }
 0xdab   :  { %v4643_v35 = vadd.f32 %v4642_v24, %v4633_v7  ;;  %v4655_v42 = vadd.f32 %v4654_v58, %v4635_v8  ;;  %v4799_v24 = vld [vmem:[#allocation16 + $0x228] sm:$0xff]  ;;  %v6845_v58 = vpack.c.bf16 %v4796_v17, %v4794_v4  ;;  %v4837_v4 = vld [vmem:[#allocation16 + $0x358] sm:$0xff] }
 0xdac   :  { %v4638_v51 = vrot.slane %v4637_v41, 2  ;;  %v4650_v49 = vrot.slane %v4649_v44, 2 }
 0xdad   :  { %v4644_v50 = vrot.slane %v4643_v35, 2  ;;  %v4656_v0 = vrot.slane %v4655_v42, 2 }
 0xdae   :  { %v4639_v10 = vadd.f32 %v4638_v51, %v4637_v41  ;;  %v4651_v59 = vadd.f32 %v4650_v49, %v4649_v44  ;;  %v4805_v51 = vld [vmem:[#allocation16 + $0x258] sm:$0xff] }
 0xdaf   :  { %v4645_v2 = vadd.f32 %v4644_v50, %v4643_v35  ;;  %v4657_v23 = vadd.f32 %v4656_v0, %v4655_v42  ;;  %v4800_v35 = vld [vmem:[#allocation16 + $0x230] sm:$0xff]  ;;  %v4803_v42 = vld [vmem:[#allocation16 + $0x248] sm:$0xff] }
 0xdb0   :  { %v4640_v14 = vrot.slane %v4639_v10, 1  ;;  %v4652_v18 = vrot.slane %v4651_v59, 1  ;;  %v6851_v0 = vpack.c.bf16 %v4805_v51, %v4803_v42  ;;  %v4840_v42 = vld [vmem:[#allocation16 + $0x370] sm:$0xff]  ;;  %v4843_v51 = vld [vmem:[#allocation16 + $0x388] sm:$0xff] }
 0xdb1   :  { %v4646_v48 = vrot.slane %v4645_v2, 1  ;;  %v4658_v11 = vrot.slane %v4657_v23, 1 }
 0xdb2   :  { %v4641_v25 = vadd.f32 %v4640_v14, %v4639_v10  ;;  %v4653_v36 = vadd.f32 %v4652_v18, %v4651_v59  ;;  %v4802_v10 = vld [vmem:[#allocation16 + $0x240] sm:$0xff]  ;;  %v4804_v59 = vld [vmem:[#allocation16 + $0x250] sm:$0xff] }
 0xdb3   :  { %v4647_v29 = vadd.f32 %v4646_v48, %v4645_v2  ;;  %v4659_v3 = vadd.f32 %v4658_v11, %v4657_v23  ;;  %v4807_v2 = vld [vmem:[#allocation16 + $0x268] sm:$0xff]  ;;  %v4809_v23 = vld [vmem:[#allocation16 + $0x278] sm:$0xff]  ;;  %v6853_v14 = vpack.c.bf16 %v4804_v59, %v4802_v10  ;;  %v4806_v48 = vld [vmem:[#allocation16 + $0x260] sm:$0xff] }
 0xdb4   :  { %v4660_v37 = vmul.f32 0.125, %v4641_v25  ;;  %v4662_v26 = vmul.f32 0.125, %v4653_v36  ;;  %v6855_v18 = vpack.c.bf16 %v4809_v23, %v4807_v2  ;;  %v4808_v11 = vld [vmem:[#allocation16 + $0x270] sm:$0xff]  ;;  %v4811_v25 = vld [vmem:[#allocation16 + $0x288] sm:$0xff]  ;;  %v4813_v36 = vld [vmem:[#allocation16 + $0x298] sm:$0xff] }
 0xdb5   :  { %v4661_v27 = vmul.f32 0.125, %v4647_v29  ;;  %v4663_v34 = vmul.f32 0.125, %v4659_v3  ;;  %v6857_v29 = vpack.c.bf16 %v4808_v11, %v4806_v48  ;;  %v6859_v3 = vpack.c.bf16 %v4813_v36, %v4811_v25  ;;  %v4842_v10 = vld [vmem:[#allocation16 + $0x380] sm:$0xff]  ;;  %v4844_v59 = vld [vmem:[#allocation16 + $0x390] sm:$0xff]  ;;  %v4847_v2 = vld [vmem:[#allocation16 + $0x3a8] sm:$0xff] }
 0xdb6   :  { %v4664_v43 = vadd.f32 1e-05, %v4660_v37  ;;  %v4666_v1 = vadd.f32 1e-05, %v4662_v26  ;;  %v4810_v37 = vld [vmem:[#allocation16 + $0x280] sm:$0xff]  ;;  %v4812_v26 = vld [vmem:[#allocation16 + $0x290] sm:$0xff] }
 0xdb7   :  { %v4665_v9 = vadd.f32 1e-05, %v4661_v27  ;;  %v4667_v21 = vadd.f32 1e-05, %v4663_v34  ;;  %v4815_v27 = vld [vmem:[#allocation16 + $0x2a8] sm:$0xff]  ;;  %v4817_v34 = vld [vmem:[#allocation16 + $0x2b8] sm:$0xff] }
 0xdb8   :  { %7269 = vrsqrt.f32 %v4664_v43  ;;  %v6861_v43 = vpack.c.bf16 %v4812_v26, %v4810_v37  ;;  %v4849_v23 = vld [vmem:[#allocation16 + $0x3b8] sm:$0xff]  ;;  %v4846_v48 = vld [vmem:[#allocation16 + $0x3a0] sm:$0xff]  ;;  %v4848_v11 = vld [vmem:[#allocation16 + $0x3b0] sm:$0xff] }
 0xdb9   :  { %7271 = vrsqrt.f32 %v4666_v1  ;;  %v6863_v1 = vpack.c.bf16 %v4817_v34, %v4815_v27  ;;  %v4851_v25 = vld [vmem:[#allocation16 + $0x3c8] sm:$0xff]  ;;  %v4853_v36 = vld [vmem:[#allocation16 + $0x3d8] sm:$0xff]  ;;  %v4850_v37 = vld [vmem:[#allocation16 + $0x3c0] sm:$0xff] }
 0xdba   :  { %7273 = vrsqrt.f32 %v4665_v9  ;;  %v4814_v9 = vld [vmem:[#allocation16 + $0x2a0] sm:$0xff]  ;;  %v4852_v26 = vld [vmem:[#allocation16 + $0x3d0] sm:$0xff]  ;;  %v4855_v27 = vld [vmem:[#allocation16 + $0x3e8] sm:$0xff] }
 0xdbb   :  { %7275 = vrsqrt.f32 %v4667_v21  ;;  %v4816_v21 = vld [vmem:[#allocation16 + $0x2b0] sm:$0xff]  ;;  %v4857_v34 = vld [vmem:[#allocation16 + $0x3f8] sm:$0xff] }
 0xdc2   :  { %v7270_v40 = vpop.eup %7269 }
 0xdc3   :  { %v7272_v54 = vpop.eup %7271  ;;  %v4672_v55 = vmul.f32 %v7270_v40, %v4628_v46  ;;  %v6867_v40 = vpack.c.bf16 %v4821_v28, %v4819_v22 }
 0xdc4   :  { %v7274_v62 = vpop.eup %7273  ;;  %v4674_v19 = vmul.f32 %v7272_v54, %v4630_v47  ;;  %v4820_v54 = vld [vmem:[#allocation16 + $0x2d0] sm:$0xff] }
 0xdc5   :  { %v7276_v13 = vpop.eup %7275  ;;  %v4697_v20 = vmul.f32 %v4680_v30, %v4672_v55  ;;  %v4673_v32 = vmul.f32 %v7274_v62, %v4629_v52  ;;  %v4801_v52 = vld [vmem:[#allocation16 + $0x238] sm:$0xff]  ;;  %v6865_v30 = vpack.c.bf16 %v4816_v21, %v4814_v9  ;;  %v4823_v55 = vld [vmem:[#allocation16 + $0x2e8] sm:$0xff]  ;;  %v4854_v9 = vld [vmem:[#allocation16 + $0x3e0] sm:$0xff] }
 0xdc6   :  { %v4699_v38 = vmul.f32 %v4688_v45, %v4674_v19  ;;  %v4675_v39 = vmul.f32 %v7276_v13, %v4631_v53  ;;  %v6847_v44 = vpack.c.bf16 %v4801_v52, %v4799_v24  ;;  %v4798_v53 = vld [vmem:[#allocation16 + $0x220] sm:$0xff]  ;;  %v4829_v13 = vld [vmem:[#allocation16 + $0x318] sm:$0xff]  ;;  %v4856_v21 = vld [vmem:[#allocation16 + $0x3f0] sm:$0xff] }
 0xdc7   :  { %v4698_v46 = vmul.f32 %v4684_v61, %v4673_v32  ;;  %v4722_v63 = vadd.f32 %v4705_v5, %v4697_v20  ;;  %v6849_v50 = vpack.c.bf16 %v4800_v35, %v4798_v53  ;;  %v4818_v45 = vld [vmem:[#allocation16 + $0x2c0] sm:$0xff]  ;;  %v4825_v61 = vld [vmem:[#allocation16 + $0x2f8] sm:$0xff]  ;;  %v6905_v22 = vpack.c.bf16 %v4856_v21, %v4854_v9 }
 0xdc8   :  { %v8627_v7 = vadd.f32 %v4713_v6, %v4699_v38  ;;  %v4700_v8 = vmul.f32 %v4692_v12, %v4675_v39  ;;  %v6869_v62 = vpack.c.bf16 %v4820_v54, %v4818_v45  ;;  %v6871_v5 = vpack.c.bf16 %v4825_v61, %v4823_v55  ;;  %v4822_v19 = vld [vmem:[#allocation16 + $0x2e0] sm:$0xff]  ;;  %v4824_v6 = vld [vmem:[#allocation16 + $0x2f0] sm:$0xff]  ;;  %v4827_v12 = vld [vmem:[#allocation16 + $0x308] sm:$0xff] }
 0xdc9   :  { %v4723_v16 = vadd.f32 %v4709_v33, %v4698_v46  ;;  %v6873_v20 = vpack.c.bf16 %v4824_v6, %v4822_v19  ;;  %v6875_v32 = vpack.c.bf16 %v4829_v13, %v4827_v12  ;;  %v4826_v33 = vld [vmem:[#allocation16 + $0x300] sm:$0xff]  ;;  %v4828_v38 = vld [vmem:[#allocation16 + $0x310] sm:$0xff]  ;;  %v4831_v39 = vld [vmem:[#allocation16 + $0x328] sm:$0xff] }
 0xdca   :  { %v4725_v47 = vadd.f32 %v4717_v60, %v4700_v8  ;;  %v4833_v60 = vld [vmem:[#allocation16 + $0x338] sm:$0xff]  ;;  %v6877_v46 = vpack.c.bf16 %v4828_v38, %v4826_v33  ;;  %v4830_v8 = vld [vmem:[#allocation16 + $0x320] sm:$0xff]  ;;  %v5081_v55 = vld [vmem:[#allocation22 + $0x8] sm:$0xff] }
 0xdcb   :  { %7277 = vtanh.f32 %v4723_v16  ;;  %v4832_v16 = vld [vmem:[#allocation16 + $0x330] sm:$0xff]  ;;  %v4834_v52 = vld [vmem:[#allocation16 + $0x340] sm:$0xff] }
 0xdcc   :  { %7279 = vtanh.f32 %v4722_v63  ;;  %v6879_v63 = vpack.c.bf16 %v4833_v60, %v4831_v39  ;;  %v6881_v17 = vpack.c.bf16 %v4832_v16, %v4830_v8  ;;  %v5080_v54 = vld [vmem:[#allocation22] sm:$0xff]  ;;  %v5082_v19 = vld [vmem:[#allocation22 + $0x10] sm:$0xff]  ;;  %v5083_v6 = vld [vmem:[#allocation22 + $0x18] sm:$0xff] }
 0xdcd   :  { %7281 = vtanh.f32 %v4725_v47  ;;  %v4835_v47 = vld [vmem:[#allocation16 + $0x348] sm:$0xff]  ;;  %v6909_v61 = vpack.c.bf16 %v5081_v55, %v5080_v54  ;;  %v6913_v12 = vpack.c.bf16 %v5083_v6, %v5082_v19  ;;  %v5102_v60 = vld [vmem:[#allocation22 + $0xb0] sm:$0xff]  ;;  %v5087_v16 = vld [vmem:[#allocation22 + $0x38] sm:$0xff] }
 0xdce   :  { %v6883_v24 = vpack.c.bf16 %v4837_v4, %v4835_v47  ;;  %7283 = vtanh.f32 %v8627_v7  ;;  %v5098_v7 = vld [vmem:[#allocation22 + $0x90] sm:$0xff]  ;;  %v5100_v13 = vld [vmem:[#allocation22 + $0xa0] sm:$0xff]  ;;  %v5085_v38 = vld [vmem:[#allocation22 + $0x28] sm:$0xff] }
 0xdcf   :  { %v5084_v33 = vld [vmem:[#allocation22 + $0x20] sm:$0xff]  ;;  %v5086_v8 = vld [vmem:[#allocation22 + $0x30] sm:$0xff] }
 0xdd0   :  { %v6917_v39 = vpack.c.bf16 %v5085_v38, %v5084_v33  ;;  %v6921_v47 = vpack.c.bf16 %v5087_v16, %v5086_v8  ;;  %v5104_v4 = vld [vmem:[#allocation22 + $0xc0] sm:$0xff] }
 0xdd5   :  { %v7278_v41 = vpop.eup %7277 }
 0xdd6   :  { %v7280_v15 = vpop.eup %7279  ;;  %4934 = vmatprep.mubr.f32.mxu0 %v7278_v41  ;;  %v4839_v41 = vld [vmem:[#allocation16 + $0x368] sm:$0xff] }
 0xdd7   :  { %v7282_v49 = vpop.eup %7281  ;;  %4935 = vmatmul.mubr.f32.vlgmr.msra.gmra.mrb[22].mxu0 %v7280_v15  ;;  %v4838_v15 = vld [vmem:[#allocation16 + $0x360] sm:$0xff] }
 0xdd8   :  { %6846 = vmatpush1.bf16.msra.mxu0 %v6845_v58  ;;  %5005 = vmatprep.mubr.f32.mxu0 %v7282_v49  ;;  %v4836_v58 = vld [vmem:[#allocation16 + $0x350] sm:$0xff]  ;;  %v4845_v49 = vld [vmem:[#allocation16 + $0x398] sm:$0xff]  ;;  %v7284_v28 = vpop.eup %7283 }
 0xdd9   :  { %6848 = vmatprep.subr.bf16.mxu0 %v6847_v44  ;;  %v4841_v44 = vld [vmem:[#allocation16 + $0x378] sm:$0xff]  ;;  %v6885_v53 = vpack.c.bf16 %v4836_v58, %v4834_v52  ;;  %v5088_v52 = vld [vmem:[#allocation22 + $0x40] sm:$0xff]  ;;  %v5089_v58 = vld [vmem:[#allocation22 + $0x48] sm:$0xff] }
 0xdda   :  { %v6887_v35 = vpack.c.bf16 %v4841_v44, %v4839_v41  ;;  %v6925_v41 = vpack.c.bf16 %v5089_v58, %v5088_v52  ;;  %v5106_v44 = vld [vmem:[#allocation22 + $0xd0] sm:$0xff]  ;;  %v5012_v58 = vld [vmem:[#allocation19] sm:$0x3] }
 0xddc   :  { %6850 = vmatpush1.bf16.msra.mxu0 %v6849_v50  ;;  %v6889_v50 = vpack.c.bf16 %v4840_v42, %v4838_v15  ;;  %v5090_v15 = vld [vmem:[#allocation22 + $0x50] sm:$0xff]  ;;  %v5091_v42 = vld [vmem:[#allocation22 + $0x58] sm:$0xff] }
 0xddd   :  { %6852 = vmatprep.subr.bf16.mxu0 %v6851_v0  ;;  %v6891_v0 = vpack.c.bf16 %v4845_v49, %v4843_v51  ;;  %v6929_v51 = vpack.c.bf16 %v5091_v42, %v5090_v15  ;;  %v5108_v49 = vld [vmem:[#allocation22 + $0xe0] sm:$0xff] }
 0xde0   :  { %6854 = vmatpush1.bf16.msra.mxu0 %v6853_v14  ;;  %v6893_v14 = vpack.c.bf16 %v4844_v59, %v4842_v10  ;;  %v5093_v59 = vld [vmem:[#allocation22 + $0x68] sm:$0xff] }
 0xde1   :  { %6856 = vmatprep.subr.bf16.mxu0 %v6855_v18  ;;  %v6895_v18 = vpack.c.bf16 %v4849_v23, %v4847_v2  ;;  %v5110_v2 = vld [vmem:[#allocation22 + $0xf0] sm:$0xff]  ;;  %v5111_v23 = vld [vmem:[#allocation22 + $0xf8] sm:$0xff] }
 0xde4   :  { %6858 = vmatpush1.bf16.msra.mxu0 %v6857_v29  ;;  %v6897_v29 = vpack.c.bf16 %v4848_v11, %v4846_v48  ;;  %v5094_v48 = vld [vmem:[#allocation22 + $0x70] sm:$0xff]  ;;  %v5095_v11 = vld [vmem:[#allocation22 + $0x78] sm:$0xff] }
 0xde5   :  { %6860 = vmatprep.subr.bf16.mxu0 %v6859_v3  ;;  %v6899_v3 = vpack.c.bf16 %v4853_v36, %v4851_v25  ;;  %v6937_v25 = vpack.c.bf16 %v5095_v11, %v5094_v48  ;;  %v4858_v36 = vld [vmem:[#allocation17] sm:$0x3]  ;;  %v5227_v11 = vld [vmem:[%s8745_s6 + $0x10] sm:$0xff] }
 0xde8   :  { %6862 = vmatpush1.bf16.msra.mxu0 %v6861_v43  ;;  %v6901_v43 = vpack.c.bf16 %v4852_v26, %v4850_v37 }
 0xde9   :  { %6864 = vmatprep.subr.bf16.mxu0 %v6863_v1  ;;  %v6903_v1 = vpack.c.bf16 %v4857_v34, %v4855_v27 }
 0xdec   :  { %6866 = vmatpush1.bf16.msra.mxu0 %v6865_v30  ;;  %v5096_v30 = vld [vmem:[#allocation22 + $0x80] sm:$0xff] }
 0xded   :  { %6868 = vmatprep.subr.bf16.mxu0 %v6867_v40  ;;  %v5097_v40 = vld [vmem:[#allocation22 + $0x88] sm:$0xff] }
 0xdee   :  { %v6907_v45 = vpack.c.bf16 %v5097_v40, %v5096_v30 }
 0xdf0   :  { %6870 = vmatpush1.bf16.msra.mxu0 %v6869_v62  ;;  %6908 = vmatprep.subr.bf16.mxu1 %v6907_v45  ;;  %v5099_v62 = vld [vmem:[#allocation22 + $0x98] sm:$0xff] }
 0xdf1   :  { %6872 = vmatprep.subr.bf16.mxu0 %v6871_v5  ;;  %6910 = vmatpush3.bf16.msra.mxu1 %v6909_v61  ;;  %v6911_v5 = vpack.c.bf16 %v5099_v62, %v5098_v7 }
 0xdf3   :  { %6912 = vmatprep.subr.bf16.mxu1 %v6911_v5 }
 0xdf4   :  { %6874 = vmatpush1.bf16.msra.mxu0 %v6873_v20  ;;  %v5101_v20 = vld [vmem:[#allocation22 + $0xa8] sm:$0xff] }
 0xdf5   :  { %6876 = vmatprep.subr.bf16.mxu0 %v6875_v32  ;;  %6914 = vmatpush3.bf16.msra.mxu1 %v6913_v12  ;;  %v6915_v32 = vpack.c.bf16 %v5101_v20, %v5100_v13 }
 0xdf7   :  { %6916 = vmatprep.subr.bf16.mxu1 %v6915_v32 }
 0xdf8   :  { %6878 = vmatpush1.bf16.msra.mxu0 %v6877_v46  ;;  %v5103_v46 = vld [vmem:[#allocation22 + $0xb8] sm:$0xff] }
 0xdf9   :  { %6880 = vmatprep.subr.bf16.mxu0 %v6879_v63  ;;  %6918 = vmatpush3.bf16.msra.mxu1 %v6917_v39  ;;  %v6919_v63 = vpack.c.bf16 %v5103_v46, %v5102_v60 }
 0xdfb   :  { %6920 = vmatprep.subr.bf16.mxu1 %v6919_v63 }
 0xdfc   :  { %6882 = vmatpush1.bf16.msra.mxu0 %v6881_v17  ;;  %v5105_v17 = vld [vmem:[#allocation22 + $0xc8] sm:$0xff] }
 0xdfd   :  { %6884 = vmatprep.subr.bf16.mxu0 %v6883_v24  ;;  %6922 = vmatpush3.bf16.msra.mxu1 %v6921_v47  ;;  %v6923_v24 = vpack.c.bf16 %v5105_v17, %v5104_v4 }
 0xdff   :  { %6924 = vmatprep.subr.bf16.mxu1 %v6923_v24 }
 0xe00   :  { %6886 = vmatpush1.bf16.msra.mxu0 %v6885_v53  ;;  %v5107_v53 = vld [vmem:[#allocation22 + $0xd8] sm:$0xff] }
 0xe01   :  { %6888 = vmatprep.subr.bf16.mxu0 %v6887_v35  ;;  %6926 = vmatpush3.bf16.msra.mxu1 %v6925_v41  ;;  %v6927_v35 = vpack.c.bf16 %v5107_v53, %v5106_v44  ;;  %v5013_v41 = vld [vmem:[#allocation20] sm:$0x3]  ;;  %v5056_v44 = vrot.slane %v5012_v58, %v8741_v56 }
 0xe03   :  { %6928 = vmatprep.subr.bf16.mxu1 %v6927_v35  ;;  %v5060_v35 = vrot.slane %v5012_v58, %v8743_v57  ;;  %v5393_v58 = vld [vmem:[#allocation25] ss:$0 sm:$0xff] }
 0xe04   :  { %6890 = vmatpush1.bf16.msra.mxu0 %v6889_v50  ;;  %v5109_v50 = vld [vmem:[#allocation22 + $0xe8] sm:$0xff] }
 0xe05   :  { %6892 = vmatprep.subr.bf16.mxu0 %v6891_v0  ;;  %v5092_v0 = vld [vmem:[#allocation22 + $0x60] sm:$0xff]  ;;  %6930 = vmatpush3.bf16.msra.mxu1 %v6929_v51  ;;  %v6931_v10 = vpack.c.bf16 %v5109_v50, %v5108_v49  ;;  %v5069_v51 = vrot.slane %v5013_v41, %v8741_v56  ;;  %v5073_v50 = vrot.slane %v5013_v41, %v8743_v57 }
 0xe07   :  { %6932 = vmatprep.subr.bf16.mxu1 %v6931_v10 }
 0xe08   :  { %6894 = vmatpush1.bf16.msra.mxu0 %v6893_v14  ;;  %v6933_v14 = vpack.c.bf16 %v5093_v59, %v5092_v0 }
 0xe09   :  { %6896 = vmatprep.subr.bf16.mxu0 %v6895_v18  ;;  %v6935_v18 = vpack.c.bf16 %v5111_v23, %v5110_v2 }
 0xe0a   :  { %6934 = vmatpush3.bf16.msra.mxu1 %v6933_v14 }
 0xe0b   :  { %6936 = vmatprep.subr.bf16.mxu1 %v6935_v18  ;;  %v5225_v18 = vld [vmem:[%s8745_s6] sm:$0xff] }
 0xe0c   :  { %6898 = vmatpush1.bf16.msra.mxu0 %v6897_v29  ;;  %v4863_v29 = vrot.slane %v4858_v36, %v8741_v56  ;;  %v5226_v56 = vld [vmem:[%s8745_s6 + $0x8] sm:$0xff] }
 0xe0d   :  { %6900 = vmatprep.subr.bf16.mxu0 %v6899_v3  ;;  %v4867_v3 = vrot.slane %v4858_v36, %v8743_v57  ;;  %v6940_v48 = vpack.c.bf16 %v5226_v56, %v5225_v18  ;;  %v7713_v57 = vmov 0.0|0.0  }
 0xe0e   :  { %6938 = vmatpush3.bf16.msra.mxu1 %v6937_v25  ;;  %v5228_v25 = vld [vmem:[%s8745_s6 + $0x18] sm:$0xff] }
 0xe0f   :  { %6939 = vmatprep.subr.bf16.mxu1 %v7713_v57  ;;  %v6943_v36 = vpack.c.bf16 %v5228_v25, %v5227_v11 }
 0xe10   :  { %6902 = vmatpush1.bf16.msra.mxu0 %v6901_v43 }
 0xe11   :  { %6904 = vmatprep.subr.bf16.mxu0 %v6903_v1 }
 0xe14   :  { %6906 = vmatpush1.bf16.msra.mxu0 %v6905_v22 }
 0xe17   :  { %5006 = vmatmul.mubr.f32.vlgmr.msra.gmra.mrb[22].mxu0 %v7284_v28 }
 0xeea   :  { %v5007_v37 = vpop.f32.mrb[22].mxu0 }
 0xeeb   :  { %v7005_v26 = vadd.f32 %v5007_v37, %v4863_v29  ;;  %v5009_v27 = vpop.f32.mrb[23].mxu0  ;;  %v5229_v29 = vld [vmem:[%s8745_s6 + $0x20] sm:$0xff] }
 0xeec   :  { %v7006_v34 = vadd.f32 %v5009_v27, %v4867_v3  ;;  %v5230_v3 = vld [vmem:[%s8745_s6 + $0x28] sm:$0xff]  ;;  %v5232_v27 = vld [vmem:[%s8745_s6 + $0x38] sm:$0xff] }
 0xeed   :  { %v5014_v43 = vrot.slane %v7005_v26, 4  ;;  %v6946_v37 = vpack.c.bf16 %v5230_v3, %v5229_v29 }
 0xeee   :  { %v5020_v1 = vrot.slane %v7006_v34, 4 }
 0xeef   :  { %v5015_v9 = vadd.f32 %v7005_v26, %v5014_v43  ;;  %v5233_v43 = vld [vmem:[%s8745_s6 + $0x40] sm:$0xff] }
 0xef0   :  { %v5021_v21 = vadd.f32 %v7006_v34, %v5020_v1  ;;  %v5234_v1 = vld [vmem:[%s8745_s6 + $0x48] sm:$0xff] }
 0xef1   :  { %v5016_v22 = vrot.slane %v5015_v9, 2 }
 0xef2   :  { %v5022_v28 = vrot.slane %v5021_v21, 2 }
 0xef3   :  { %v5017_v30 = vadd.f32 %v5016_v22, %v5015_v9  ;;  %v6952_v9 = vpack.c.bf16 %v5234_v1, %v5233_v43  ;;  %v5236_v22 = vld [vmem:[%s8745_s6 + $0x58] sm:$0xff] }
 0xef4   :  { %v5023_v40 = vadd.f32 %v5022_v28, %v5021_v21  ;;  %v5235_v21 = vld [vmem:[%s8745_s6 + $0x50] sm:$0xff] }
 0xef5   :  { %v5018_v45 = vrot.slane %v5017_v30, 1  ;;  %v6955_v28 = vpack.c.bf16 %v5236_v22, %v5235_v21 }
 0xef6   :  { %v5024_v54 = vrot.slane %v5023_v40, 1 }
 0xef7   :  { %v5019_v55 = vadd.f32 %v5018_v45, %v5017_v30  ;;  %v5237_v30 = vld [vmem:[%s8745_s6 + $0x60] sm:$0xff] }
 0xef8   :  { %v5025_v61 = vadd.f32 %v5024_v54, %v5023_v40  ;;  %v5238_v40 = vld [vmem:[%s8745_s6 + $0x68] sm:$0xff]  ;;  %v5239_v54 = vld [vmem:[%s8745_s6 + $0x70] sm:$0xff] }
 0xef9   :  { %v5026_v7 = vmul.f32 0.125, %v5019_v55  ;;  %v6958_v45 = vpack.c.bf16 %v5238_v40, %v5237_v30  ;;  %v5240_v55 = vld [vmem:[%s8745_s6 + $0x78] sm:$0xff] }
 0xefa   :  { %v5027_v62 = vmul.f32 0.125, %v5025_v61  ;;  %v6961_v61 = vpack.c.bf16 %v5240_v55, %v5239_v54 }
 0xefb   :  { %v5028_v5 = vsub.f32 %v7005_v26, %v5026_v7  ;;  %v5231_v26 = vld [vmem:[%s8745_s6 + $0x30] sm:$0xff] }
 0xefc   :  { %v5029_v19 = vsub.f32 %v7006_v34, %v5027_v62  ;;  %v6949_v34 = vpack.c.bf16 %v5232_v27, %v5231_v26  ;;  %v5392_v62 = vld [vmem:[#allocation23] ss:$0 sm:$0xff] }
 0xefd   :  { %v5030_v6 = vmul.f32 %v5028_v5, %v5028_v5 }
 0xefe   :  { %v5031_v12 = vmul.f32 %v5029_v19, %v5029_v19 }
 0xeff   :  { %v5032_v13 = vrot.slane %v5030_v6, 4 }
 0xf00   :  { %v5038_v20 = vrot.slane %v5031_v12, 4 }
 0xf01   :  { %v5033_v32 = vadd.f32 %v5032_v13, %v5030_v6 }
 0xf02   :  { %v5039_v33 = vadd.f32 %v5038_v20, %v5031_v12 }
 0xf03   :  { %v5034_v38 = vrot.slane %v5033_v32, 2 }
 0xf04   :  { %v5040_v39 = vrot.slane %v5039_v33, 2 }
 0xf05   :  { %v5035_v60 = vadd.f32 %v5034_v38, %v5033_v32 }
 0xf06   :  { %v5041_v46 = vadd.f32 %v5040_v39, %v5039_v33 }
 0xf07   :  { %v5036_v63 = vrot.slane %v5035_v60, 1 }
 0xf08   :  { %v5042_v8 = vrot.slane %v5041_v46, 1 }
 0xf09   :  { %v5037_v16 = vadd.f32 %v5036_v63, %v5035_v60 }
 0xf0a   :  { %v5043_v47 = vadd.f32 %v5042_v8, %v5041_v46 }
 0xf0b   :  { %v5044_v4 = vmul.f32 0.125, %v5037_v16 }
 0xf0c   :  { %v5045_v17 = vmul.f32 0.125, %v5043_v47 }
 0xf0d   :  { %v5046_v24 = vadd.f32 1e-05, %v5044_v4 }
 0xf0e   :  { %v5047_v52 = vadd.f32 1e-05, %v5045_v17 }
 0xf0f   :  { %7285 = vrsqrt.f32 %v5046_v24 }
 0xf10   :  { %7287 = vrsqrt.f32 %v5047_v52 }
 0xf19   :  { %v7286_v53 = vpop.eup %7285 }
 0xf1a   :  { %v7288_v15 = vpop.eup %7287  ;;  %v5050_v42 = vmul.f32 %v7286_v53, %v5028_v5 }
 0xf1b   :  { %v5051_v49 = vmul.f32 %v7288_v15, %v5029_v19 }
 0xf1c   :  { %v5063_v0 = vmul.f32 %v5056_v44, %v5050_v42  ;;  %v5394_v44 = vld [vmem:[#allocation26] ss:$0 sm:$0xff]  ;;  %v5395_v42 = vld [vmem:[#allocation28] ss:$0 sm:$0xff] }
 0xf1d   :  { %v5064_v10 = vmul.f32 %v5060_v35, %v5051_v49 }
 0xf1e   :  { %v5076_v59 = vadd.f32 %v5069_v51, %v5063_v0 }
 0xf1f   :  { %v5077_v2 = vadd.f32 %v5073_v50, %v5064_v10 }
 0xf21   :  { %7289 = vtanh.f32 %v5077_v2 }
 0xf22   :  { %7291 = vtanh.f32 %v5076_v59 }
 0xf2b   :  { %v7290_v23 = vpop.eup %7289 }
 0xf2c   :  { %v7292_v14 = vpop.eup %7291  ;;  %5183 = vmatprep.mubr.f32.mxu1 %v7290_v23 }
 0xf2d   :  { %5184 = vmatmul.mubr.f32.vlgmr.msra.gmra.mrb[24].mxu1 %v7292_v14 }
 0xf2e   :  { %6941 = vmatpush3.bf16.msra.mxu1 %v6940_v48  ;;  %5480 = vmatprep.mubr.msk.f32.mxu1 %vm7714_vm1, %v8738_v31 }
 0xf2f   :  { %6942 = vmatprep.subr.bf16.mxu1 %v7713_v57 }
 0xf32   :  { %6944 = vmatpush3.bf16.msra.mxu1 %v6943_v36 }
 0xf33   :  { %6945 = vmatprep.subr.bf16.mxu1 %v7713_v57 }
 0xf36   :  { %6947 = vmatpush3.bf16.msra.mxu1 %v6946_v37 }
 0xf37   :  { %6948 = vmatprep.subr.bf16.mxu1 %v7713_v57 }
 0xf3a   :  { %6950 = vmatpush3.bf16.msra.mxu1 %v6949_v34 }
 0xf3b   :  { %6951 = vmatprep.subr.bf16.mxu1 %v7713_v57 }
 0xf3e   :  { %6953 = vmatpush3.bf16.msra.mxu1 %v6952_v9 }
 0xf3f   :  { %6954 = vmatprep.subr.bf16.mxu1 %v7713_v57 }
 0xf42   :  { %6956 = vmatpush3.bf16.msra.mxu1 %v6955_v28 }
 0xf43   :  { %6957 = vmatprep.subr.bf16.mxu1 %v7713_v57 }
 0xf46   :  { %6959 = vmatpush3.bf16.msra.mxu1 %v6958_v45 }
 0xf47   :  { %6960 = vmatprep.subr.bf16.mxu1 %v7713_v57 }
 0xf4a   :  { %6962 = vmatpush3.bf16.msra.mxu1 %v6961_v61 }
0x1000   :  { %v5428_v7 = vpop.f32.mrb[24].mxu1 }
0x1001   :  { %v5429_v5 = vpop.f32.mrb[25].mxu1 }
0x1002   :  { %v5430_v19 = vadd.f32 %v5429_v5, %v5428_v7 }
0x1004   :  { %v5186_v6 = vadd.f32 %v5430_v19, %v5392_v62 }
0x1006   :  { %v5191_v12 = vrot.slane %v5186_v6, 4 }
0x1008   :  { %v5192_v13 = vadd.f32 %v5191_v12, %v5186_v6 }
0x100a   :  { %v5193_v20 = vrot.slane %v5192_v13, 2 }
0x100c   :  { %v5194_v32 = vadd.f32 %v5193_v20, %v5192_v13 }
0x100e   :  { %v5195_v33 = vrot.slane %v5194_v32, 1 }
0x1010   :  { %v5196_v38 = vadd.f32 %v5195_v33, %v5194_v32 }
0x1012   :  { %v5197_v39 = vmul.f32 0.125, %v5196_v38 }
0x1014   :  { %v5198_v60 = vsub.f32 %v5186_v6, %v5197_v39 }
0x1016   :  { %v5199_v46 = vmul.f32 %v5198_v60, %v5198_v60 }
0x1018   :  { %v5200_v63 = vrot.slane %v5199_v46, 4 }
0x101a   :  { %v5201_v31 = vadd.f32 %v5200_v63, %v5199_v46 }
0x101c   :  { %v5202_v8 = vrot.slane %v5201_v31, 2 }
0x101e   :  { %v5203_v16 = vadd.f32 %v5202_v8, %v5201_v31 }
0x1020   :  { %v5204_v47 = vrot.slane %v5203_v16, 1 }
0x1022   :  { %v5205_v4 = vadd.f32 %v5204_v47, %v5203_v16 }
0x1024   :  { %v5206_v17 = vmul.f32 0.125, %v5205_v4 }
0x1026   :  { %v5207_v24 = vadd.f32 1e-05, %v5206_v17 }
0x1028   :  { %7293 = vrsqrt.f32 %v5207_v24 }
0x1032   :  { %v7294_v52 = vpop.eup %7293 }
0x1033   :  { %v5209_v41 = vmul.f32 %v7294_v52, %v5198_v60 }
0x1035   :  { %v5216_v53 = vmul.f32 %v5393_v58, %v5209_v41 }
0x1037   :  { %v5223_v35 = vadd.f32 %v5394_v44, %v5216_v53 }
0x1039   :  { %7295 = vtanh.f32 %v5223_v35 }
0x1043   :  { %v7296_v15 = vpop.eup %7295 }
0x1044   :  { %5481 = vmatmul.mubr.f32.vlgmr.msra.gmra.mrb[26].mxu1 %v7296_v15 }
0x1117   :  { %v5314_v51 = vpop.f32.mrb[26].mxu1 }
0x1118   :  { %v5315_v49 = vadd.f32 %v5395_v42, %v5314_v51  ;;  %v5482_v50 = vpop.f32.mrb[27].mxu1 }
0x111a   :  { %5319 = vst.msk [vmem:[%s8746_s1] sm:$0xff] %vm5318_vm2, %v5315_v49 }
0x111b   :  { %5324 = vsyncpa [#allocation4], 1 }
0x111c   :  { %5325 = vsyncpa [#allocation6], 1 }
0x111d   :  { %5326 = vsyncpa [#allocation9], 1 }
0x111e   :  { %5327 = vsyncpa [#allocation12], 1 }
0x111f   :  { %5328 = vsyncpa [#allocation15], 1 }
0x1120   :  { %5329 = vsyncpa [#allocation18], 1 }
0x1121   :  { %5330 = vsyncpa [#allocation21], 1 }
0x1122   :  { %5331 = vsyncpa [#allocation24], 1 }
0x1123   :  { %5332 = vsyncpa [#allocation27], 1 }

</bundles_post_ra>
